<compile_context>
chip_gen: v7x
topology: tpu7x:2x2x1
jax: 0.10.0
libtpu: 0.0.40
codegen_flags: <defaults>
</compile_context>

<pallas_src>
import jax
import jax.numpy as jnp
from jax import lax
from jax.experimental import pallas as pl
from jax.experimental.pallas import tpu as pltpu


def _round_up(x, m):
    return -(-x // m) * m


# ---------------------------------------------------------------------------
# Fused kernel: one grid step per image.
#   BN1 -> ReLU -> 1x1 conv (single deep matmul) -> BN2 -> ReLU
#   -> zero-padded bf16 scratch -> im2col (9 lane-aligned copies)
#   -> 3x3 conv as ONE matmul.
# ---------------------------------------------------------------------------
def _fused_kernel(x_ref, s1_ref, b1_ref, w1_ref, s2_ref, b2_ref, w2_ref,
                  o_ref, bpad_ref, patch_ref):
    Hp, Wp, Cbp = bpad_ref.shape
    H, W = Hp - 2, Wp - 2
    HW = H * W

    # ---- BN1 -> ReLU (f32 VPU math) -> bf16 MXU operand -------------------
    x = x_ref[0]                                            # (HW, Ct) f32
    a = jnp.maximum(x * s1_ref[...] + b1_ref[...], 0.0).astype(jnp.bfloat16)

    # ---- 1x1 conv: ONE deep-contraction matmul over the full concat -------
    z = jnp.dot(a, w1_ref[...],
                preferred_element_type=jnp.float32)         # (HW, Cbp) f32

    # ---- BN2 -> ReLU (padded channels are exactly zero) -------------------
    b = jnp.maximum(z * s2_ref[...] + b2_ref[...], 0.0).astype(jnp.bfloat16)

    # ---- zero-padded bottleneck in bf16 VMEM scratch -----------------------
    # Zero only the 1-pixel border (interior is fully overwritten each step).
    zrow = jnp.zeros((1, Wp, Cbp), jnp.bfloat16)
    zcol = jnp.zeros((H, 1, Cbp), jnp.bfloat16)
    bpad_ref[0:1, :, :] = zrow
    bpad_ref[Hp - 1:Hp, :, :] = zrow
    bpad_ref[1:H + 1, 0:1, :] = zcol
    bpad_ref[1:H + 1, Wp - 1:Wp, :] = zcol
    bpad_ref[1:H + 1, 1:W + 1, :] = b.reshape(H, W, Cbp)

    # ---- im2col: 9 lane-tile-aligned copies into (HW, 9*Cbp) --------------
    for dh in range(3):
        for dw in range(3):
            t = dh * 3 + dw
            patch_ref[:, t * Cbp:(t + 1) * Cbp] = (
                bpad_ref[dh:dh + H, dw:dw + W, :].reshape(HW, Cbp))

    # ---- 3x3 conv: ONE matmul, contraction depth 9*Cbp; no VMEM acc -------
    out = jnp.dot(patch_ref[...], w2_ref[...],
                  preferred_element_type=jnp.float32)       # (HW, K) f32
    o_ref[...] = out.reshape(o_ref.shape)


# ---------------------------------------------------------------------------
# DenseLayer wrapper
# ---------------------------------------------------------------------------
def _bn_scale_bias(gamma, beta, mean, var, eps):
    scale = gamma * lax.rsqrt(var + eps)
    bias = beta - mean * scale
    return scale, bias


def dense_layer_forward(prev, params):
    """prev: list of NHWC arrays (the dense-block history); returns (N,H,W,k)."""
    N, H, W = prev[0].shape[:3]
    HW = H * W
    Hp, Wp = H + 2, W + 2
    Ct = sum(int(p.shape[-1]) for p in prev)
    Cb = params["w1"].shape[1]              # 4*k bottleneck channels
    K = params["w2"].shape[-1]              # growth rate
    Cbp = _round_up(Cb, 128)                # lane-aligned bottleneck width

    s1, b1 = _bn_scale_bias(params["g1"], params["beta1"], params["mu1"],
                            params["var1"], params["eps"])
    s2, b2 = _bn_scale_bias(params["g2"], params["beta2"], params["mu2"],
                            params["var2"], params["eps"])

    # Channel concat (first op of the PyTorch layer) done once wrapper-side so
    # the 1x1 conv is a single deep-contraction matmul.
    x = jnp.concatenate(prev, axis=-1).reshape(N, HW, Ct)

    s1r = s1.reshape(1, Ct)
    b1r = b1.reshape(1, Ct)
    # Pad bottleneck channel dim to 128 lanes with zero weights / zero BN2
    # affine -> padded channels are exactly 0 after ReLU, and every in-kernel
    # bottleneck store/read is lane-tile aligned.
    w1p = (jnp.zeros((Ct, Cbp), jnp.float32)
           .at[:, :Cb].set(params["w1"]).astype(jnp.bfloat16))
    s2p = jnp.zeros((1, Cbp), jnp.float32).at[:, :Cb].set(s2)
    b2p = jnp.zeros((1, Cbp), jnp.float32).at[:, :Cb].set(b2)
    # 3x3 weights as one (9*Cbp, K) im2col matrix (tap-major, zero rows for
    # padded channels); tap order matches the kernel's dh*3+dw.
    w2p = (jnp.zeros((9, Cbp, K), jnp.float32)
           .at[:, :Cb, :].set(params["w2"].reshape(9, Cb, K))
           .reshape(9 * Cbp, K).astype(jnp.bfloat16))

    in_specs = [
        pl.BlockSpec((1, HW, Ct), lambda n: (n, 0, 0)),       # x
        pl.BlockSpec((1, Ct), lambda n: (0, 0)),              # s1
        pl.BlockSpec((1, Ct), lambda n: (0, 0)),              # b1
        pl.BlockSpec((Ct, Cbp), lambda n: (0, 0)),            # w1 (padded)
        pl.BlockSpec((1, Cbp), lambda n: (0, 0)),             # s2 (padded)
        pl.BlockSpec((1, Cbp), lambda n: (0, 0)),             # b2 (padded)
        pl.BlockSpec((9 * Cbp, K), lambda n: (0, 0)),         # w2 (im2col)
    ]
    scratch_shapes = [
        pltpu.VMEM((Hp, Wp, Cbp), jnp.bfloat16),              # padded bottleneck
        pltpu.VMEM((HW, 9 * Cbp), jnp.bfloat16),              # im2col patches
    ]

    # Scoped-VMEM budget from actual tile sizes (v5e default is only 16 MiB):
    # double-buffered inputs/outputs + scratches + headroom, capped below the
    # smallest physical VMEM (v7x: 64 MiB).
    def tile_bytes(shape, dtype):
        s = list(shape)
        s[-1] = _round_up(s[-1], 128)
        if len(s) >= 2:
            s[-2] = _round_up(s[-2], 16)
        nbytes = jnp.dtype(dtype).itemsize
        for d in s:
            nbytes *= d
        return nbytes

    vmem_est = (
        2 * (tile_bytes((1, HW, Ct), jnp.float32)
             + 2 * tile_bytes((1, Ct), jnp.float32)
             + tile_bytes((Ct, Cbp), jnp.bfloat16)
             + 2 * tile_bytes((1, Cbp), jnp.float32)
             + tile_bytes((9 * Cbp, K), jnp.bfloat16)
             + tile_bytes((1, HW, K), jnp.float32))
        + tile_bytes((Hp, Wp, Cbp), jnp.bfloat16)
        + tile_bytes((HW, 9 * Cbp), jnp.bfloat16))
    vmem_limit = int(min(max(vmem_est + (8 << 20), 32 << 20), 64 << 20))

    out_flat = pl.pallas_call(
        _fused_kernel,
        out_shape=jax.ShapeDtypeStruct((N, HW, K), jnp.float32),
        grid_spec=pltpu.PrefetchScalarGridSpec(
            num_scalar_prefetch=0,
            grid=(N,),
            in_specs=in_specs,
            out_specs=pl.BlockSpec((1, HW, K), lambda n: (n, 0, 0)),
            scratch_shapes=scratch_shapes),
        compiler_params=pltpu.CompilerParams(
            dimension_semantics=("parallel",),
            vmem_limit_bytes=vmem_limit),
    )(x, s1r, b1r, w1p, s2p, b2p, w2p)

    return out_flat.reshape(N, H, W, K)


# ---------------------------------------------------------------------------
# Parameter init + pure-JAX reference (same math) for a correctness check.
# ---------------------------------------------------------------------------
def init_dense_layer_params(key, in_c, k, magic=4, eps=1e-5):
    cb = magic * k
    ks = jax.random.split(key, 10)
    return {
        "g1": jax.random.normal(ks[0], (in_c,), jnp.float32) * 0.1 + 1.0,
        "beta1": jax.random.normal(ks[1], (in_c,), jnp.float32) * 0.1,
        "mu1": jax.random.normal(ks[2], (in_c,), jnp.float32) * 0.1,
        "var1": jax.random.uniform(ks[3], (in_c,), jnp.float32, 0.5, 1.5),
        "w1": jax.random.normal(ks[4], (in_c, cb), jnp.float32) * 0.05,
        "g2": jax.random.normal(ks[5], (cb,), jnp.float32) * 0.1 + 1.0,
        "beta2": jax.random.normal(ks[6], (cb,), jnp.float32) * 0.1,
        "mu2": jax.random.normal(ks[7], (cb,), jnp.float32) * 0.1,
        "var2": jax.random.uniform(ks[8], (cb,), jnp.float32, 0.5, 1.5),
        "w2": jax.random.normal(ks[9], (3, 3, cb, k), jnp.float32) * 0.05,
        "eps": eps,
    }


def dense_layer_reference(prev, params):
    x = jnp.concatenate(prev, axis=-1)
    s1, b1 = _bn_scale_bias(params["g1"], params["beta1"], params["mu1"],
                            params["var1"], params["eps"])
    s2, b2 = _bn_scale_bias(params["g2"], params["beta2"], params["mu2"],
                            params["var2"], params["eps"])
    a = jnp.maximum(x * s1 + b1, 0.0)
    z = jnp.einsum("nhwc,cd->nhwd", a, params["w1"])
    b = jnp.maximum(z * s2 + b2, 0.0)
    return lax.conv_general_dilated(
        b, params["w2"], window_strides=(1, 1), padding="SAME",
        dimension_numbers=("NHWC", "HWIO", "NHWC"))


if __name__ == "__main__":
    key = jax.random.PRNGKey(0)
    k_in1, k_in2, k_param = jax.random.split(key, 3)

    # DenseNet-like shapes: block input (init_c = 24 channels) plus one earlier
    # layer output (growth = 12), i.e. layer 2 of block 1: in_c = 36.
    N, H, W = 2, 16, 16
    growth = 12
    prev = [
        jax.random.normal(k_in1, (N, H, W, 24), jnp.float32),
        jax.random.normal(k_in2, (N, H, W, growth), jnp.float32),
    ]
    in_c = 24 + growth
    params = init_dense_layer_params(k_param, in_c, growth)

    out = jax.block_until_ready(dense_layer_forward(prev, params))
    ref = jax.block_until_ready(dense_layer_reference(prev, params))

    assert out.shape == (N, H, W, growth), out.shape
    # bf16 MXU operands vs. f32 reference -> loose tolerance.
    max_err = float(jnp.max(jnp.abs(out - ref)))
    assert jnp.allclose(out, ref, atol=5e-2, rtol=5e-2), max_err

    print("KERNEL_OK")
</pallas_src>

<mosaic_0001>
module attributes {stable_mosaic.version = 11 : i64} {
  func.func @_fused_kernel(%arg0: i32, %arg1: memref<1x256x36xf32, #tpu.memory_space<vmem>>, %arg2: memref<1x36xf32, #tpu.memory_space<vmem>>, %arg3: memref<1x36xf32, #tpu.memory_space<vmem>>, %arg4: memref<36x128xbf16, #tpu.memory_space<vmem>>, %arg5: memref<1x128xf32, #tpu.memory_space<vmem>>, %arg6: memref<1x128xf32, #tpu.memory_space<vmem>>, %arg7: memref<1152x12xbf16, #tpu.memory_space<vmem>>, %arg8: memref<1x256x12xf32, #tpu.memory_space<vmem>>, %arg9: memref<18x18x128xbf16, #tpu.memory_space<vmem>>, %arg10: memref<256x1152xbf16, #tpu.memory_space<vmem>>) attributes {dimension_semantics = [#tpu.dimension_semantics<parallel>], iteration_bounds = array<i64: 2>, scalar_prefetch = 0 : i64, scratch_operands = 2 : i64, tpu.core_type = #tpu.core_type<tc>, window_params = [{transform_indices = @transform_0, window_bounds = array<i64: 1, 256, 36>}, {pipeline_mode = #tpu.pipeline_mode<synchronous>, transform_indices = @transform_1, window_bounds = array<i64: 1, 36>}, {pipeline_mode = #tpu.pipeline_mode<synchronous>, transform_indices = @transform_2, window_bounds = array<i64: 1, 36>}, {pipeline_mode = #tpu.pipeline_mode<synchronous>, transform_indices = @transform_3, window_bounds = array<i64: 36, 128>}, {pipeline_mode = #tpu.pipeline_mode<synchronous>, transform_indices = @transform_4, window_bounds = array<i64: 1, 128>}, {pipeline_mode = #tpu.pipeline_mode<synchronous>, transform_indices = @transform_5, window_bounds = array<i64: 1, 128>}, {pipeline_mode = #tpu.pipeline_mode<synchronous>, transform_indices = @transform_6, window_bounds = array<i64: 1152, 12>}, {transform_indices = @transform_7, window_bounds = array<i64: 1, 256, 12>}]} {
    %c0 = arith.constant 0 : index
    %c0_0 = arith.constant 0 : index
    %c0_1 = arith.constant 0 : index
    %0 = vector.load %arg1[%c0, %c0_0, %c0_1] : memref<1x256x36xf32, #tpu.memory_space<vmem>>, vector<1x256x36xf32>
    %1 = vector.shape_cast %0 : vector<1x256x36xf32> to vector<256x36xf32>
    %c0_2 = arith.constant 0 : index
    %c0_3 = arith.constant 0 : index
    %2 = vector.load %arg2[%c0_2, %c0_3] : memref<1x36xf32, #tpu.memory_space<vmem>>, vector<1x36xf32>
    %3 = vector.broadcast %2 : vector<1x36xf32> to vector<256x36xf32>
    %4 = arith.mulf %1, %3 : vector<256x36xf32>
    %c0_4 = arith.constant 0 : index
    %c0_5 = arith.constant 0 : index
    %5 = vector.load %arg3[%c0_4, %c0_5] : memref<1x36xf32, #tpu.memory_space<vmem>>, vector<1x36xf32>
    %6 = vector.broadcast %5 : vector<1x36xf32> to vector<256x36xf32>
    %7 = arith.addf %4, %6 : vector<256x36xf32>
    %cst = arith.constant 0.000000e+00 : f32
    %8 = vector.broadcast %cst : f32 to vector<256x36xf32>
    %9 = arith.maximumf %7, %8 : vector<256x36xf32>
    %10 = arith.truncf %9 : vector<256x36xf32> to vector<256x36xbf16>
    %c0_6 = arith.constant 0 : index
    %c0_7 = arith.constant 0 : index
    %11 = vector.load %arg4[%c0_6, %c0_7] : memref<36x128xbf16, #tpu.memory_space<vmem>>, vector<36x128xbf16>
    %cst_8 = arith.constant dense<0.000000e+00> : vector<256x128xf32>
    %12 = tpu.matmul %10, %11, %cst_8 {dimension_numbers = #tpu.dot_dimension_numbers<[1], [0], [0], [1], [0, 0, 1, 1], [], []>} : vector<256x36xbf16>, vector<36x128xbf16>, vector<256x128xf32> -> vector<256x128xf32>
    %c0_9 = arith.constant 0 : index
    %c0_10 = arith.constant 0 : index
    %13 = vector.load %arg5[%c0_9, %c0_10] : memref<1x128xf32, #tpu.memory_space<vmem>>, vector<1x128xf32>
    %14 = vector.broadcast %13 : vector<1x128xf32> to vector<256x128xf32>
    %15 = arith.mulf %12, %14 : vector<256x128xf32>
    %c0_11 = arith.constant 0 : index
    %c0_12 = arith.constant 0 : index
    %16 = vector.load %arg6[%c0_11, %c0_12] : memref<1x128xf32, #tpu.memory_space<vmem>>, vector<1x128xf32>
    %17 = vector.broadcast %16 : vector<1x128xf32> to vector<256x128xf32>
    %18 = arith.addf %15, %17 : vector<256x128xf32>
    %cst_13 = arith.constant 0.000000e+00 : f32
    %19 = vector.broadcast %cst_13 : f32 to vector<256x128xf32>
    %20 = arith.maximumf %18, %19 : vector<256x128xf32>
    %21 = arith.truncf %20 : vector<256x128xf32> to vector<256x128xbf16>
    %cst_14 = arith.constant 0.000000e+00 : bf16
    %22 = vector.broadcast %cst_14 : bf16 to vector<1x18x128xbf16>
    %cst_15 = arith.constant 0.000000e+00 : bf16
    %23 = vector.broadcast %cst_15 : bf16 to vector<16x1x128xbf16>
    %c0_16 = arith.constant 0 : index
    %c0_17 = arith.constant 0 : index
    %c0_18 = arith.constant 0 : index
    %24 = vector.load %arg9[%c0_16, %c0_17, %c0_18] : memref<18x18x128xbf16, #tpu.memory_space<vmem>>, vector<1x18x128xbf16>
    tpu.vector_store %arg9[%c0_16, %c0_17, %c0_18], %22 {strides = array<i32>} : memref<18x18x128xbf16, #tpu.memory_space<vmem>>, vector<1x18x128xbf16>,
    %c17 = arith.constant 17 : index
    %c0_19 = arith.constant 0 : index
    %c0_20 = arith.constant 0 : index
    %25 = vector.load %arg9[%c17, %c0_19, %c0_20] : memref<18x18x128xbf16, #tpu.memory_space<vmem>>, vector<1x18x128xbf16>
    tpu.vector_store %arg9[%c17, %c0_19, %c0_20], %22 {strides = array<i32>} : memref<18x18x128xbf16, #tpu.memory_space<vmem>>, vector<1x18x128xbf16>,
    %c1 = arith.constant 1 : index
    %c0_21 = arith.constant 0 : index
    %c0_22 = arith.constant 0 : index
    %26 = vector.load %arg9[%c1, %c0_21, %c0_22] : memref<18x18x128xbf16, #tpu.memory_space<vmem>>, vector<16x1x128xbf16>
    tpu.vector_store %arg9[%c1, %c0_21, %c0_22], %23 {strides = array<i32>} : memref<18x18x128xbf16, #tpu.memory_space<vmem>>, vector<16x1x128xbf16>,
    %c1_23 = arith.constant 1 : index
    %c17_24 = arith.constant 17 : index
    %c0_25 = arith.constant 0 : index
    %27 = vector.load %arg9[%c1_23, %c17_24, %c0_25] : memref<18x18x128xbf16, #tpu.memory_space<vmem>>, vector<16x1x128xbf16>
    tpu.vector_store %arg9[%c1_23, %c17_24, %c0_25], %23 {strides = array<i32>} : memref<18x18x128xbf16, #tpu.memory_space<vmem>>, vector<16x1x128xbf16>,
    %28 = vector.shape_cast %21 : vector<256x128xbf16> to vector<16x16x128xbf16>
    %c1_26 = arith.constant 1 : index
    %c1_27 = arith.constant 1 : index
    %c0_28 = arith.constant 0 : index
    %29 = vector.load %arg9[%c1_26, %c1_27, %c0_28] : memref<18x18x128xbf16, #tpu.memory_space<vmem>>, vector<16x16x128xbf16>
    tpu.vector_store %arg9[%c1_26, %c1_27, %c0_28], %28 {strides = array<i32>} : memref<18x18x128xbf16, #tpu.memory_space<vmem>>, vector<16x16x128xbf16>,
    %c0_29 = arith.constant 0 : index
    %c0_30 = arith.constant 0 : index
    %c0_31 = arith.constant 0 : index
    %30 = vector.load %arg9[%c0_29, %c0_30, %c0_31] : memref<18x18x128xbf16, #tpu.memory_space<vmem>>, vector<16x16x128xbf16>
    %31 = vector.shape_cast %30 : vector<16x16x128xbf16> to vector<256x128xbf16>
    %c0_32 = arith.constant 0 : index
    %c0_33 = arith.constant 0 : index
    %32 = vector.load %arg10[%c0_32, %c0_33] : memref<256x1152xbf16, #tpu.memory_space<vmem>>, vector<256x128xbf16>
    tpu.vector_store %arg10[%c0_32, %c0_33], %31 {strides = array<i32>} : memref<256x1152xbf16, #tpu.memory_space<vmem>>, vector<256x128xbf16>,
    %c0_34 = arith.constant 0 : index
    %c1_35 = arith.constant 1 : index
    %c0_36 = arith.constant 0 : index
    %33 = vector.load %arg9[%c0_34, %c1_35, %c0_36] : memref<18x18x128xbf16, #tpu.memory_space<vmem>>, vector<16x16x128xbf16>
    %34 = vector.shape_cast %33 : vector<16x16x128xbf16> to vector<256x128xbf16>
    %c0_37 = arith.constant 0 : index
    %c128 = arith.constant 128 : index
    %35 = vector.load %arg10[%c0_37, %c128] : memref<256x1152xbf16, #tpu.memory_space<vmem>>, vector<256x128xbf16>
    tpu.vector_store %arg10[%c0_37, %c128], %34 {strides = array<i32>} : memref<256x1152xbf16, #tpu.memory_space<vmem>>, vector<256x128xbf16>,
    %c0_38 = arith.constant 0 : index
    %c2 = arith.constant 2 : index
    %c0_39 = arith.constant 0 : index
    %36 = vector.load %arg9[%c0_38, %c2, %c0_39] : memref<18x18x128xbf16, #tpu.memory_space<vmem>>, vector<16x16x128xbf16>
    %37 = vector.shape_cast %36 : vector<16x16x128xbf16> to vector<256x128xbf16>
    %c0_40 = arith.constant 0 : index
    %c256 = arith.constant 256 : index
    %38 = vector.load %arg10[%c0_40, %c256] : memref<256x1152xbf16, #tpu.memory_space<vmem>>, vector<256x128xbf16>
    tpu.vector_store %arg10[%c0_40, %c256], %37 {strides = array<i32>} : memref<256x1152xbf16, #tpu.memory_space<vmem>>, vector<256x128xbf16>,
    %c1_41 = arith.constant 1 : index
    %c0_42 = arith.constant 0 : index
    %c0_43 = arith.constant 0 : index
    %39 = vector.load %arg9[%c1_41, %c0_42, %c0_43] : memref<18x18x128xbf16, #tpu.memory_space<vmem>>, vector<16x16x128xbf16>
    %40 = vector.shape_cast %39 : vector<16x16x128xbf16> to vector<256x128xbf16>
    %c0_44 = arith.constant 0 : index
    %c384 = arith.constant 384 : index
    %41 = vector.load %arg10[%c0_44, %c384] : memref<256x1152xbf16, #tpu.memory_space<vmem>>, vector<256x128xbf16>
    tpu.vector_store %arg10[%c0_44, %c384], %40 {strides = array<i32>} : memref<256x1152xbf16, #tpu.memory_space<vmem>>, vector<256x128xbf16>,
    %c1_45 = arith.constant 1 : index
    %c1_46 = arith.constant 1 : index
    %c0_47 = arith.constant 0 : index
    %42 = vector.load %arg9[%c1_45, %c1_46, %c0_47] : memref<18x18x128xbf16, #tpu.memory_space<vmem>>, vector<16x16x128xbf16>
    %43 = vector.shape_cast %42 : vector<16x16x128xbf16> to vector<256x128xbf16>
    %c0_48 = arith.constant 0 : index
    %c512 = arith.constant 512 : index
    %44 = vector.load %arg10[%c0_48, %c512] : memref<256x1152xbf16, #tpu.memory_space<vmem>>, vector<256x128xbf16>
    tpu.vector_store %arg10[%c0_48, %c512], %43 {strides = array<i32>} : memref<256x1152xbf16, #tpu.memory_space<vmem>>, vector<256x128xbf16>,
    %c1_49 = arith.constant 1 : index
    %c2_50 = arith.constant 2 : index
    %c0_51 = arith.constant 0 : index
    %45 = vector.load %arg9[%c1_49, %c2_50, %c0_51] : memref<18x18x128xbf16, #tpu.memory_space<vmem>>, vector<16x16x128xbf16>
    %46 = vector.shape_cast %45 : vector<16x16x128xbf16> to vector<256x128xbf16>
    %c0_52 = arith.constant 0 : index
    %c640 = arith.constant 640 : index
    %47 = vector.load %arg10[%c0_52, %c640] : memref<256x1152xbf16, #tpu.memory_space<vmem>>, vector<256x128xbf16>
    tpu.vector_store %arg10[%c0_52, %c640], %46 {strides = array<i32>} : memref<256x1152xbf16, #tpu.memory_space<vmem>>, vector<256x128xbf16>,
    %c2_53 = arith.constant 2 : index
    %c0_54 = arith.constant 0 : index
    %c0_55 = arith.constant 0 : index
    %48 = vector.load %arg9[%c2_53, %c0_54, %c0_55] : memref<18x18x128xbf16, #tpu.memory_space<vmem>>, vector<16x16x128xbf16>
    %49 = vector.shape_cast %48 : vector<16x16x128xbf16> to vector<256x128xbf16>
    %c0_56 = arith.constant 0 : index
    %c768 = arith.constant 768 : index
    %50 = vector.load %arg10[%c0_56, %c768] : memref<256x1152xbf16, #tpu.memory_space<vmem>>, vector<256x128xbf16>
    tpu.vector_store %arg10[%c0_56, %c768], %49 {strides = array<i32>} : memref<256x1152xbf16, #tpu.memory_space<vmem>>, vector<256x128xbf16>,
    %c2_57 = arith.constant 2 : index
    %c1_58 = arith.constant 1 : index
    %c0_59 = arith.constant 0 : index
    %51 = vector.load %arg9[%c2_57, %c1_58, %c0_59] : memref<18x18x128xbf16, #tpu.memory_space<vmem>>, vector<16x16x128xbf16>
    %52 = vector.shape_cast %51 : vector<16x16x128xbf16> to vector<256x128xbf16>
    %c0_60 = arith.constant 0 : index
    %c896 = arith.constant 896 : index
    %53 = vector.load %arg10[%c0_60, %c896] : memref<256x1152xbf16, #tpu.memory_space<vmem>>, vector<256x128xbf16>
    tpu.vector_store %arg10[%c0_60, %c896], %52 {strides = array<i32>} : memref<256x1152xbf16, #tpu.memory_space<vmem>>, vector<256x128xbf16>,
    %c2_61 = arith.constant 2 : index
    %c2_62 = arith.constant 2 : index
    %c0_63 = arith.constant 0 : index
    %54 = vector.load %arg9[%c2_61, %c2_62, %c0_63] : memref<18x18x128xbf16, #tpu.memory_space<vmem>>, vector<16x16x128xbf16>
    %55 = vector.shape_cast %54 : vector<16x16x128xbf16> to vector<256x128xbf16>
    %c0_64 = arith.constant 0 : index
    %c1024 = arith.constant 1024 : index
    %56 = vector.load %arg10[%c0_64, %c1024] : memref<256x1152xbf16, #tpu.memory_space<vmem>>, vector<256x128xbf16>
    tpu.vector_store %arg10[%c0_64, %c1024], %55 {strides = array<i32>} : memref<256x1152xbf16, #tpu.memory_space<vmem>>, vector<256x128xbf16>,
    %c0_65 = arith.constant 0 : index
    %c0_66 = arith.constant 0 : index
    %57 = vector.load %arg10[%c0_65, %c0_66] : memref<256x1152xbf16, #tpu.memory_space<vmem>>, vector<256x1152xbf16>
    %c0_67 = arith.constant 0 : index
    %c0_68 = arith.constant 0 : index
    %58 = vector.load %arg7[%c0_67, %c0_68] : memref<1152x12xbf16, #tpu.memory_space<vmem>>, vector<1152x12xbf16>
    %cst_69 = arith.constant dense<0.000000e+00> : vector<256x12xf32>
    %59 = tpu.matmul %57, %58, %cst_69 {dimension_numbers = #tpu.dot_dimension_numbers<[1], [0], [0], [1], [0, 0, 1, 1], [], []>} : vector<256x1152xbf16>, vector<1152x12xbf16>, vector<256x12xf32> -> vector<256x12xf32>
    %60 = vector.shape_cast %59 : vector<256x12xf32> to vector<1x256x12xf32>
    %c0_70 = arith.constant 0 : index
    %c0_71 = arith.constant 0 : index
    %c0_72 = arith.constant 0 : index
    %61 = vector.load %arg8[%c0_70, %c0_71, %c0_72] : memref<1x256x12xf32, #tpu.memory_space<vmem>>, vector<1x256x12xf32>
    tpu.vector_store %arg8[%c0_70, %c0_71, %c0_72], %60 {strides = array<i32>} : memref<1x256x12xf32, #tpu.memory_space<vmem>>, vector<1x256x12xf32>,
    return
  }
  func.func @transform_0(%arg0: i32) -> (i32, i32, i32) {
    %c0_i32 = arith.constant 0 : i32
    %c0_i32_0 = arith.constant 0 : i32
    %c0_i32_1 = arith.constant 0 : i32
    return %arg0, %c0_i32, %c0_i32_0 : i32, i32, i32
  }
  func.func @transform_1(%arg0: i32) -> (i32, i32) {
    %c0_i32 = arith.constant 0 : i32
    %c0_i32_0 = arith.constant 0 : i32
    %c0_i32_1 = arith.constant 0 : i32
    return %c0_i32, %c0_i32_0 : i32, i32
  }
  func.func @transform_2(%arg0: i32) -> (i32, i32) {
    %c0_i32 = arith.constant 0 : i32
    %c0_i32_0 = arith.constant 0 : i32
    %c0_i32_1 = arith.constant 0 : i32
    return %c0_i32, %c0_i32_0 : i32, i32
  }
  func.func @transform_3(%arg0: i32) -> (i32, i32) {
    %c0_i32 = arith.constant 0 : i32
    %c0_i32_0 = arith.constant 0 : i32
    %c0_i32_1 = arith.constant 0 : i32
    return %c0_i32, %c0_i32_0 : i32, i32
  }
  func.func @transform_4(%arg0: i32) -> (i32, i32) {
    %c0_i32 = arith.constant 0 : i32
    %c0_i32_0 = arith.constant 0 : i32
    %c0_i32_1 = arith.constant 0 : i32
    return %c0_i32, %c0_i32_0 : i32, i32
  }
  func.func @transform_5(%arg0: i32) -> (i32, i32) {
    %c0_i32 = arith.constant 0 : i32
    %c0_i32_0 = arith.constant 0 : i32
    %c0_i32_1 = arith.constant 0 : i32
    return %c0_i32, %c0_i32_0 : i32, i32
  }
  func.func @transform_6(%arg0: i32) -> (i32, i32) {
    %c0_i32 = arith.constant 0 : i32
    %c0_i32_0 = arith.constant 0 : i32
    %c0_i32_1 = arith.constant 0 : i32
    return %c0_i32, %c0_i32_0 : i32, i32
  }
  func.func @transform_7(%arg0: i32) -> (i32, i32, i32) {
    %c0_i32 = arith.constant 0 : i32
    %c0_i32_0 = arith.constant 0 : i32
    %c0_i32_1 = arith.constant 0 : i32
    return %arg0, %c0_i32, %c0_i32_0 : i32, i32, i32
  }
}

</mosaic_0001>

<bundles_post_ra>
// kernel: tpu_custom_call.1
= control target key start
LH: loop header
LB: loop body
LE: loop exit
PB: predicated region body
PF: predicated region fallthrough
CT: control target
= control target key end

     0   :  { %s7017_s24 = smov 0   ;;  %s8735_s0 = inlined_call_operand.vmem [shape: f32[2,256,36], index: 0, kind: input, shape index: {}]   ;;  %s8736_s1 = inlined_call_operand.vmem [shape: f32[1,36], index: 1, kind: input, shape index: {}]   ;;  %s8737_s2 = inlined_call_operand.vmem [shape: f32[1,36], index: 2, kind: input, shape index: {}]   ;;  %s8738_s3 = inlined_call_operand.vmem [shape: bf16[36,128], index: 3, kind: input, shape index: {}]   ;;  %s8739_s4 = inlined_call_operand.vmem [shape: f32[1,128], index: 4, kind: input, shape index: {}]   ;;  %s8740_s5 = inlined_call_operand.vmem [shape: f32[1,128], index: 5, kind: input, shape index: {}]   ;;  %s8741_s6 = inlined_call_operand.vmem [shape: bf16[1152,12], index: 6, kind: input, shape index: {}]   ;;  %s8742_s7 = inlined_call_operand.vmem [shape: f32[2,256,12], index: 7, kind: output, shape index: {}]  }
   0x1 LB: > { %s5875_s25 = sadd.s32 4294967295, %s6974_s24   ;;  %p5879_p0 = scmp.ge.s32.totalorder %s6974_s24, 1  ;;  %s6974_s24 = sphi %s7017_s24, %s17_s24  }
   0x2   : > { %p237_p1 = scmp.lt.s32.totalorder %s6974_s24, 3 }
   0x4   : > { %p238_p2 = pnand %p5879_p0, %p237_p1 }
   0x6   : > { %241 = sbr.rel (%p238_p2) target bundleno = 873 (0x369), region = 48 }
   0xd   : > { %v6842_v0 = vld [vmem:[%s8738_s3] sm:$0xff]   ;;  %v6843_v1 = vld [vmem:[%s8738_s3 + $0x8] sm:$0xff]   ;;  %p269_p3 = scmp.lt.s32.totalorder %s5875_s25, 1  ;;  %v6844_v2 = vld [vmem:[%s8738_s3 + $0x10] ss:$0 sps:$4 sm:$0x33]  }
   0xe   : > { %6730 = vmatprep.subr.bf16.mxu0 %v6842_v0  ;;  %v7039_v3 = vld [vmem:[%s8736_s1] ss:$0 sm:$0xff]  ;;  %vm507_vm0 = vcmask 1041408   ;;  %vm458_vm1 = vcmask 293888   ;;  %vm806_vm2 = vcmask 1040384   ;;  %vm2178_vm10 = vcmask 1042432  }
   0xf   : > { %6731 = vmatpush3.bf16.msra.mxu0 %v6842_v0  ;;  %s8784_s25 = smov (!%p269_p3, %s5875_s25), 1  ;;  %v6845_v4 = vld [vmem:[%s8741_s6 + $0x40] sm:$0xff]   ;;  %v509_v11 = vsel %vm507_vm0, %v6844_v2, 0  ;;  %vm807_vm3 = vsmask.f32 256  ;;  %vm2179_vm11 = vcmask 1046532  }
  0x10   : > { %6732 = vmatprep.subr.bf16.mxu0 %v6843_v1  ;;  %v6846_v5 = vld [vmem:[%s8741_s6] sm:$0xff]   ;;  %s6205_s15 = sshll.u32 %s8784_s25, 8  ;;  %6258 = vmatprep.subr.bf16.mxu1 %v6845_v4  ;;  %vm7206_vm4 = vmand %vm806_vm2, %vm807_vm3  ;;  %vm857_vm5 = vsmask.f32 7938  ;;  %vm1615_vm7 = vsmask.f32 3328 }
  0x11   : > { %v7051_v6 = vld [vmem:[%s8737_s2] ss:$0 sm:$0xff]  ;;  %s7058_s20 = scalar_lea.vmem %s8735_s0, %s6205_s15  ;;  %6259 = vmatpush3.bf16.msra.mxu1 %v6846_v5  ;;  %vm7213_vm6 = vmand %vm806_vm2, %vm857_vm5  ;;  %vm1616_vm8 = vsmask.f32 7440  ;;  %vm1309_vm13 = vcmask 1043456   ;;  %s8632_s12 = scalar_lea.vmem %s8742_s7, %s6205_s15 }
  0x12   : > { %v6847_v7 = vld [vmem:[%s8741_s6 + $0xc0] sm:$0xff]   ;;  %v281_v9 = vld [vmem:[%s7058_s20 + $0x8] sm:$0xff]  ;;  %v282_v10 = vld [vmem:[%s7058_s20 + $0x10] sm:$0xff]  ;;  %vm987_vm14 = vsmask.f32 4368 }
  0x13   : > { %6733 = vmatpush3.bf16.msra.mxu0 %v6843_v1  ;;  %v280_v8 = vld [vmem:[%s7058_s20] sm:$0xff]  ;;  %v320_v13 = vmul.f32 %v7039_v3, %v281_v9  ;;  %v283_v14 = vld [vmem:[%s7058_s20 + $0x18] sm:$0xff]  ;;  %v321_v15 = vmul.f32 %v7039_v3, %v282_v10  ;;  %v285_v17 = vld [vmem:[%s7058_s20 + $0x28] sm:$0xff] }
  0x14   : > { %6832 = vmatprep.subr.msk.bf16.mxu0 %vm507_vm0, %v6844_v2  ;;  %v319_v12 = vmul.f32 %v7039_v3, %v280_v8  ;;  %v284_v16 = vld [vmem:[%s7058_s20 + $0x20] sm:$0xff]  ;;  %v322_v18 = vmul.f32 %v7039_v3, %v283_v14  ;;  %v324_v20 = vmul.f32 %v7039_v3, %v285_v17  ;;  %v286_v21 = vld [vmem:[%s7058_s20 + $0x30] sm:$0xff]  ;;  %v287_v22 = vld [vmem:[%s7058_s20 + $0x38] sm:$0xff] }
  0x15   : > { %v323_v19 = vmul.f32 %v7039_v3, %v284_v16  ;;  %v359_v24 = vadd.f32 %v7051_v6, %v320_v13  ;;  %v360_v25 = vadd.f32 %v7051_v6, %v321_v15  ;;  %v325_v26 = vmul.f32 %v7039_v3, %v286_v21  ;;  %v288_v31 = vld [vmem:[%s7058_s20 + $0x40] sm:$0xff]  ;;  %v289_v32 = vld [vmem:[%s7058_s20 + $0x48] sm:$0xff]  ;;  %v290_v37 = vld [vmem:[%s7058_s20 + $0x50] sm:$0xff] }
  0x16   : > { %v358_v23 = vadd.f32 %v7051_v6, %v319_v12  ;;  %v361_v27 = vadd.f32 %v7051_v6, %v322_v18  ;;  %v363_v29 = vadd.f32 %v7051_v6, %v324_v20  ;;  %v326_v30 = vmul.f32 %v7039_v3, %v287_v22  ;;  %v291_v42 = vld [vmem:[%s7058_s20 + $0x58] sm:$0xff]  ;;  %v292_v43 = vld [vmem:[%s7058_s20 + $0x60] sm:$0xff]  ;;  %v293_v48 = vld [vmem:[%s7058_s20 + $0x68] sm:$0xff] }
  0x17   : > { %6735 = vmatpush3.bf16.msra.mxu0 %v509_v11  ;;  %v362_v28 = vadd.f32 %v7051_v6, %v323_v19  ;;  %v391_v34 = vmax.f32 %v359_v24, 0.0  ;;  %v392_v35 = vmax.f32 %v360_v25, 0.0  ;;  %v364_v36 = vadd.f32 %v7051_v6, %v325_v26  ;;  %v294_v49 = vld [vmem:[%s7058_s20 + $0x70] sm:$0xff]  ;;  %v295_v58 = vld [vmem:[%s7058_s20 + $0x78] sm:$0xff]  ;;  %v296_v59 = vld [vmem:[%s7058_s20 + $0x80] sm:$0xff] }
  0x18   : > { %v390_v33 = vmax.f32 %v358_v23, 0.0  ;;  %6370 = vmatprep.subr.bf16.mxu0 %v6847_v7  ;;  %v393_v38 = vmax.f32 %v361_v27, 0.0  ;;  %v395_v40 = vmax.f32 %v363_v29, 0.0  ;;  %v365_v41 = vadd.f32 %v7051_v6, %v326_v30  ;;  %v297_v63 = vld [vmem:[%s7058_s20 + $0x88] sm:$0xff]  ;;  %v298_v0 = vld [vmem:[%s7058_s20 + $0x90] sm:$0xff]  ;;  %v299_v7 = vld [vmem:[%s7058_s20 + $0x98] sm:$0xff] }
  0x19   : > { %v394_v39 = vmax.f32 %v362_v28, 0.0  ;;  %v396_v45 = vmax.f32 %v364_v36, 0.0  ;;  %v327_v46 = vmul.f32 %v7039_v3, %v288_v31  ;;  %v328_v47 = vmul.f32 %v7039_v3, %v289_v32  ;;  %v6848_v8 = vld [vmem:[%s8741_s6 + $0x80] sm:$0xff]   ;;  %v301_v12 = vld [vmem:[%s7058_s20 + $0xa8] sm:$0xff]  ;;  %v302_v17 = vld [vmem:[%s7058_s20 + $0xb0] sm:$0xff] }
  0x1a   : > { %v422_v44 = vpack.c.bf16 %v391_v34, %v390_v33  ;;  %v423_v50 = vpack.c.bf16 %v393_v38, %v392_v35  ;;  %v397_v52 = vmax.f32 %v365_v41, 0.0  ;;  %v329_v53 = vmul.f32 %v7039_v3, %v290_v37  ;;  %v300_v11 = vld [vmem:[%s7058_s20 + $0xa0] sm:$0xff]  ;;  %v303_v22 = vld [vmem:[%s7058_s20 + $0xb8] sm:$0xff]  ;;  %v305_v29 = vld [vmem:[%s7058_s20 + $0xc8] sm:$0xff] }
  0x1b   : > { %v424_v51 = vpack.c.bf16 %v395_v40, %v394_v39  ;;  %v366_v54 = vadd.f32 %v7051_v6, %v327_v46  ;;  %v367_v55 = vadd.f32 %v7051_v6, %v328_v47  ;;  %v330_v56 = vmul.f32 %v7039_v3, %v291_v42  ;;  %v304_v25 = vld [vmem:[%s7058_s20 + $0xc0] sm:$0xff]  ;;  %v306_v33 = vld [vmem:[%s7058_s20 + $0xd0] sm:$0xff]  ;;  %v307_v36 = vld [vmem:[%s7058_s20 + $0xd8] sm:$0xff] }
  0x1c   : > { %6736 = vmatprep.mubr.msk.bf16.mxu0 %vm458_vm1, %v422_v44  ;;  %v331_v57 = vmul.f32 %v7039_v3, %v292_v43  ;;  %v368_v60 = vadd.f32 %v7051_v6, %v329_v53  ;;  %v332_v61 = vmul.f32 %v7039_v3, %v293_v48  ;;  %v333_v62 = vmul.f32 %v7039_v3, %v294_v49  ;;  %v308_v41 = vld [vmem:[%s7058_s20 + $0xe0] sm:$0xff]  ;;  %vm7288_vm9 = vmor %vm1615_vm7, %vm1616_vm8 }
  0x1d   : > { %6737 = vmatmul.mubr.msk.bf16.vlgmr.msra.gmra.mrb[0].mxu0 %vm458_vm1, %v423_v50  ;;  %v398_v1 = vmax.f32 %v366_v54, 0.0  ;;  %v399_v2 = vmax.f32 %v367_v55, 0.0  ;;  %v369_v4 = vadd.f32 %v7051_v6, %v330_v56  ;;  %v334_v10 = vmul.f32 %v7039_v3, %v295_v58  ;;  %v309_v50 = vld [vmem:[%s7058_s20 + $0xe8] sm:$0xff]  ;;  %v310_v55 = vld [vmem:[%s7058_s20 + $0xf0] sm:$0xff]  ;;  %vm7376_vm12 = vmor %vm2178_vm10, %vm2179_vm11 }
  0x1e   : > { %6740 = vmatprep.mubr.msk.bf16.mxu0 %vm458_vm1, %v424_v51  ;;  %v370_v5 = vadd.f32 %v7051_v6, %v331_v57  ;;  %v371_v9 = vadd.f32 %v7051_v6, %v332_v61  ;;  %v425_v13 = vpack.c.bf16 %v397_v52, %v396_v45  ;;  %v400_v14 = vmax.f32 %v368_v60, 0.0  ;;  %6371 = vmatpush3.bf16.msra.mxu0 %v6848_v8  ;;  %v311_v60 = vld [vmem:[%s7058_s20 + $0xf8] sm:$0xff]  ;;  %vm7409_vm15 = vmand %vm1309_vm13, %vm857_vm5 }
  0x1f   : > { %v401_v15 = vmax.f32 %v369_v4, 0.0  ;;  %v335_v16 = vmul.f32 %v7039_v3, %v296_v59  ;;  %v7124_v20 = vadd.f32 %v7051_v6, %v333_v62  ;;  %v336_v21 = vmul.f32 %v7039_v3, %v297_v63  ;;  %vm7416_vm0 = vmor %vm807_vm3, %vm987_vm14 }
  0x20   : > { %v402_v18 = vmax.f32 %v370_v5, 0.0  ;;  %v403_v19 = vmax.f32 %v371_v9, 0.0  ;;  %v426_v23 = vpack.c.bf16 %v399_v2, %v398_v1  ;;  %v337_v24 = vmul.f32 %v7039_v3, %v298_v0 }
  0x21   : > { %v373_v26 = vadd.f32 %v7051_v6, %v334_v10  ;;  %v374_v27 = vadd.f32 %v7051_v6, %v335_v16  ;;  %v338_v28 = vmul.f32 %v7039_v3, %v299_v7  ;;  %v375_v30 = vadd.f32 %v7051_v6, %v336_v21 }
  0x22   : > { %v339_v31 = vmul.f32 %v7039_v3, %v300_v11  ;;  %v340_v32 = vmul.f32 %v7039_v3, %v301_v12  ;;  %v404_v34 = vmax.f32 %v7124_v20, 0.0  ;;  %v341_v35 = vmul.f32 %v7039_v3, %v302_v17 }
  0x23   : > { %v427_v37 = vpack.c.bf16 %v401_v15, %v400_v14  ;;  %v428_v38 = vpack.c.bf16 %v403_v19, %v402_v18  ;;  %v376_v39 = vadd.f32 %v7051_v6, %v337_v24  ;;  %v342_v40 = vmul.f32 %v7039_v3, %v303_v22 }
  0x24   : > { %v405_v42 = vmax.f32 %v373_v26, 0.0  ;;  %v406_v43 = vmax.f32 %v374_v27, 0.0  ;;  %v377_v44 = vadd.f32 %v7051_v6, %v338_v28  ;;  %v343_v45 = vmul.f32 %v7039_v3, %v304_v25  ;;  %v6849_v28 = vld [vmem:[%s8741_s6 + $0x48] sm:$0xff]  }
  0x25   : > { %6741 = vmatmul.mubr.msk.bf16.gmra.mrb[4].mxu0 %vm458_vm1, %v425_v13  ;;  %v407_v46 = vmax.f32 %v375_v30, 0.0  ;;  %v378_v47 = vadd.f32 %v7051_v6, %v339_v31  ;;  %v379_v48 = vadd.f32 %v7051_v6, %v340_v32  ;;  %v344_v49 = vmul.f32 %v7039_v3, %v305_v29  ;;  %v6850_v29 = vld [vmem:[%s8741_s6 + $0x8] sm:$0xff]   ;;  %6260 = vmatprep.subr.bf16.mxu1 %v6849_v28  ;;  %v6853_v32 = vld [vmem:[%s8741_s6 + $0x50] sm:$0xff]  }
  0x26   : > { %6744 = vmatprep.mubr.msk.bf16.mxu0 %vm458_vm1, %v426_v23  ;;  %v380_v51 = vadd.f32 %v7051_v6, %v341_v35  ;;  %v381_v52 = vadd.f32 %v7051_v6, %v342_v40  ;;  %v345_v53 = vmul.f32 %v7039_v3, %v306_v33  ;;  %v346_v54 = vmul.f32 %v7039_v3, %v307_v36  ;;  %v6851_v30 = vld [vmem:[%s8741_s6 + $0xc8] sm:$0xff]   ;;  %v6854_v33 = vld [vmem:[%s8741_s6 + $0x10] sm:$0xff]  }
  0x27   : > { %v408_v56 = vmax.f32 %v376_v39, 0.0  ;;  %v382_v57 = vadd.f32 %v7051_v6, %v343_v45  ;;  %v383_v58 = vadd.f32 %v7051_v6, %v344_v49  ;;  %v347_v59 = vmul.f32 %v7039_v3, %v308_v41  ;;  %v6852_v31 = vld [vmem:[%s8741_s6 + $0x88] sm:$0xff]   ;;  %6261 = vmatpush3.bf16.msra.mxu1 %v6850_v29  ;;  %6372 = vmatprep.subr.bf16.mxu0 %v6851_v30  ;;  %v6856_v35 = vld [vmem:[%s8741_s6 + $0x90] sm:$0xff]   ;;  %v6857_v41 = vld [vmem:[%s8741_s6 + $0x58] sm:$0xff]  }
  0x28   : > { %v409_v61 = vmax.f32 %v377_v44, 0.0  ;;  %v384_v62 = vadd.f32 %v7051_v6, %v345_v53  ;;  %v385_v63 = vadd.f32 %v7051_v6, %v346_v54  ;;  %v348_v0 = vmul.f32 %v7039_v3, %v309_v50  ;;  %6373 = vmatpush3.bf16.msra.mxu0 %v6852_v31  ;;  %6262 = vmatprep.subr.bf16.mxu1 %v6853_v32  ;;  %v809_v40 = vld [vmem:[#allocation2 + $0xc] sm:$0x1]  ;;  %v6858_v44 = vld [vmem:[%s8741_s6 + $0x18] sm:$0xff]   ;;  %v815_v50 = vld [vmem:[#allocation2 + $0x24] sm:$0x1] }
  0x29   : > { %v410_v1 = vmax.f32 %v378_v47, 0.0  ;;  %v411_v2 = vmax.f32 %v379_v48, 0.0  ;;  %v386_v4 = vadd.f32 %v7051_v6, %v347_v59  ;;  %v349_v5 = vmul.f32 %v7039_v3, %v310_v55  ;;  %v818_v48 = vld [vmem:[#allocation2 + $0x30] sm:$0x1]  ;;  %v6860_v53 = vld [vmem:[%s8741_s6 + $0x98] sm:$0xff]   ;;  %v6861_v55 = vld [vmem:[%s8741_s6 + $0x60] sm:$0xff]  }
  0x2a   : > { %v412_v7 = vmax.f32 %v380_v51, 0.0  ;;  %v413_v8 = vmax.f32 %v381_v52, 0.0  ;;  %v387_v9 = vadd.f32 %v7051_v6, %v348_v0  ;;  %v350_v10 = vmul.f32 %v7039_v3, %v311_v60  ;;  %v6859_v52 = vld [vmem:[%s8741_s6 + $0xd8] sm:$0xff]   ;;  %v6865_v59 = vld [vmem:[%s8741_s6 + $0x68] sm:$0xff]  }
  0x2b   : > { %v414_v11 = vmax.f32 %v382_v57, 0.0  ;;  %v415_v12 = vmax.f32 %v383_v58, 0.0  ;;  %v388_v13 = vadd.f32 %v7051_v6, %v349_v5  ;;  %v416_v14 = vmax.f32 %v384_v62, 0.0  ;;  %6263 = vmatpush3.bf16.msra.mxu1 %v6854_v33  ;;  %v6863_v57 = vld [vmem:[%s8741_s6 + $0xe0] sm:$0xff]   ;;  %v6866_v60 = vld [vmem:[%s8741_s6 + $0x28] sm:$0xff]  }
  0x2c   : > { %v417_v15 = vmax.f32 %v385_v63, 0.0  ;;  %v389_v16 = vadd.f32 %v7051_v6, %v350_v10  ;;  %v418_v17 = vmax.f32 %v386_v4, 0.0  ;;  %v419_v18 = vmax.f32 %v387_v9, 0.0  ;;  %6264 = vmatprep.subr.bf16.mxu1 %v6857_v41  ;;  %v6864_v58 = vld [vmem:[%s8741_s6 + $0xa0] sm:$0xff]   ;;  %v6868_v62 = vld [vmem:[%s8741_s6 + $0xa8] sm:$0xff]   ;;  %v6869_v4 = vld [vmem:[%s8741_s6 + $0x70] sm:$0xff]  }
  0x2d   : > { %6745 = vmatmul.mubr.msk.bf16.gmra.mrb[8].mxu0 %vm458_vm1, %v427_v37  ;;  %v429_v19 = vpack.c.bf16 %v405_v42, %v404_v34  ;;  %v420_v20 = vmax.f32 %v388_v13, 0.0  ;;  %v430_v22 = vpack.c.bf16 %v407_v46, %v406_v43  ;;  %v431_v3 = vpack.c.bf16 %v409_v61, %v408_v56  ;;  %v6855_v34 = vld [vmem:[%s8741_s6 + $0xd0] sm:$0xff]   ;;  %v812_v37 = vld [vmem:[#allocation2 + $0x18] sm:$0x1]  ;;  %v862_v43 = vld [vmem:[#allocation2 + $0x20] sm:$0x1] }
  0x2e   : > { %6748 = vmatprep.mubr.msk.bf16.mxu0 %vm458_vm1, %v428_v38  ;;  %v421_v21 = vmax.f32 %v389_v16, 0.0  ;;  %v432_v23 = vpack.c.bf16 %v411_v2, %v410_v1  ;;  %v433_v24 = vpack.c.bf16 %v413_v8, %v412_v7  ;;  %v434_v25 = vpack.c.bf16 %v415_v12, %v414_v11  ;;  %6374 = vmatprep.subr.bf16.mxu0 %v6855_v34  ;;  %v859_v46 = vld [vmem:[#allocation2 + $0x14] sm:$0x1]  ;;  %v6862_v56 = vld [vmem:[%s8741_s6 + $0x20] sm:$0xff]   ;;  %v6867_v61 = vld [vmem:[%s8741_s6 + $0xe8] sm:$0xff]  }
  0x2f   : > { %v435_v6 = vpack.c.bf16 %v417_v15, %v416_v14  ;;  %v436_v26 = vpack.c.bf16 %v419_v18, %v418_v17  ;;  %v813_v38 = vsel %vm7206_vm4, 0, %v812_v37  ;;  %6375 = vmatpush3.bf16.msra.mxu0 %v6856_v35  ;;  %v810_v42 = vsel %vm7206_vm4, 0, %v809_v40  ;;  %6265 = vmatpush3.bf16.msra.mxu1 %v6858_v44  ;;  %v868_v0 = vld [vmem:[#allocation2 + $0x38] sm:$0x1]  ;;  %v865_v9 = vld [vmem:[#allocation2 + $0x2c] sm:$0x1] }
  0x30   : > { %v437_v27 = vpack.c.bf16 %v421_v21, %v420_v20  ;;  %814 = vst [vmem:[#allocation2 + $0x18] sm:$0x1] %v813_v38  ;;  %811 = vst [vmem:[#allocation2 + $0xc] sm:$0x1] %v810_v42  ;;  %v863_v45 = vsel %vm7213_vm6, 0, %v862_v43  ;;  %v860_v47 = vsel %vm7213_vm6, 0, %v859_v46  ;;  %6376 = vmatprep.subr.bf16.mxu0 %v6859_v52  ;;  %6266 = vmatprep.subr.bf16.mxu1 %v6861_v55 }
  0x31   : > { %864 = vst [vmem:[#allocation2 + $0x20] sm:$0x1] %v863_v45  ;;  %861 = vst [vmem:[#allocation2 + $0x14] sm:$0x1] %v860_v47  ;;  %v819_v49 = vsel %vm7206_vm4, 0, %v818_v48  ;;  %v816_v51 = vsel %vm7206_vm4, 0, %v815_v50 }
  0x32   : > { %820 = vst [vmem:[#allocation2 + $0x30] sm:$0x1] %v819_v49  ;;  %v6976_v54 = vmov 0   ;;  %817 = vst [vmem:[#allocation2 + $0x24] sm:$0x1] %v816_v51  ;;  %v869_v2 = vsel %vm7213_vm6, 0, %v868_v0 }
  0x33   : > { %798 = vst [vmem:[#allocation2] sm:$0xf] %v6976_v54  ;;  %799 = vst [vmem:[#allocation2 + $0x4] sm:$0xf] %v6976_v54  ;;  %6377 = vmatpush3.bf16.msra.mxu0 %v6860_v53  ;;  %6267 = vmatpush3.bf16.msra.mxu1 %v6862_v56  ;;  %v6870_v10 = vld [vmem:[%s8741_s6 + $0x30] sm:$0xff]   ;;  %v866_v13 = vsel %vm7213_vm6, 0, %v865_v9 }
  0x34   : > { %800 = vst [vmem:[#allocation2 + $0x8] sm:$0x1] %v6976_v54  ;;  %802 = vst [vmem:[#allocation2 + $0xcc] sm:$0xf] %v6976_v54  ;;  %6378 = vmatprep.subr.bf16.mxu0 %v6863_v57  ;;  %6268 = vmatprep.subr.bf16.mxu1 %v6865_v59  ;;  %v6871_v11 = vld [vmem:[%s8741_s6 + $0xf0] sm:$0xff]   ;;  %v6873_v21 = vld [vmem:[%s8741_s6 + $0x78] sm:$0xff]  }
  0x35   : > { %6749 = vmatmul.mubr.msk.bf16.gmra.mrb[12].mxu0 %vm458_vm1, %v429_v19  ;;  %803 = vst [vmem:[#allocation2 + $0xd0] sm:$0xf] %v6976_v54  ;;  %804 = vst [vmem:[#allocation2 + $0xd4] sm:$0x1] %v6976_v54  ;;  %v6872_v14 = vld [vmem:[%s8741_s6 + $0xb0] sm:$0xff]   ;;  %v6879_v43 = vld [vmem:[%s8741_s6 + $0x140] sm:$0xff]  }
  0x36   : > { %6752 = vmatprep.mubr.msk.bf16.mxu0 %vm458_vm1, %v430_v22  ;;  %870 = vst [vmem:[#allocation2 + $0x38] sm:$0x1] %v869_v2  ;;  %867 = vst [vmem:[#allocation2 + $0x2c] sm:$0x1] %v866_v13  ;;  %v824_v29 = vld [vmem:[#allocation2 + $0x48] sm:$0x1] }
  0x37   : > { %6379 = vmatpush3.bf16.msra.mxu0 %v6864_v58  ;;  %6269 = vmatpush3.bf16.msra.mxu1 %v6866_v60  ;;  %v825_v31 = vsel %vm7206_vm4, 0, %v824_v29  ;;  %v821_v32 = vld [vmem:[#allocation2 + $0x3c] sm:$0x1]  ;;  %v874_v33 = vld [vmem:[#allocation2 + $0x50] sm:$0x1]  ;;  %v6881_v44 = vld [vmem:[%s8741_s6 + $0x100] sm:$0xff]  }
  0x38   : > { %6380 = vmatprep.subr.bf16.mxu0 %v6867_v61  ;;  %6270 = vmatprep.subr.bf16.mxu1 %v6869_v4  ;;  %826 = vst [vmem:[#allocation2 + $0x48] sm:$0x1] %v825_v31  ;;  %v822_v37 = vsel %vm7206_vm4, 0, %v821_v32  ;;  %v875_v38 = vsel %vm7213_vm6, 0, %v874_v33  ;;  %v871_v41 = vld [vmem:[#allocation2 + $0x44] sm:$0x1] }
  0x39   : > { %823 = vst [vmem:[#allocation2 + $0x3c] sm:$0x1] %v822_v37  ;;  %876 = vst [vmem:[#allocation2 + $0x50] sm:$0x1] %v875_v38  ;;  %v872_v42 = vsel %vm7213_vm6, 0, %v871_v41  ;;  %v6884_v52 = vld [vmem:[%s8741_s6 + $0x148] sm:$0xff]  }
  0x3a   : > { %v1567_v63 = vld [vmem:[#allocation2] sm:$0xf]  ;;  %v1568_v1 = vld [vmem:[#allocation2 + $0x4] sm:$0xf]  ;;  %873 = vst [vmem:[#allocation2 + $0x44] sm:$0x1] %v872_v42 }
  0x3b   : > { %v1619_v5 = vshrl.u32 %v1567_v63, 16  ;;  %v1622_v7 = vshll.u32 %v1567_v63, 16  ;;  %v1628_v8 = vshll.u32 %v1568_v1, 16  ;;  %v1632_v12 = vshrl.u32 %v1568_v1, 16  ;;  %6381 = vmatpush3.bf16.msra.mxu0 %v6868_v62  ;;  %v1569_v15 = vld [vmem:[#allocation2 + $0x8] sm:$0x1]  ;;  %6271 = vmatpush3.bf16.msra.mxu1 %v6870_v10 }
  0x3c   : > { %6382 = vmatprep.subr.bf16.mxu0 %v6871_v11  ;;  %v1638_v20 = vshll.u32 %v1569_v15, 16  ;;  %6272 = vmatprep.subr.bf16.mxu1 %v6873_v21  ;;  %v6877_v35 = vld [vmem:[#allocation2] sm:$0xff]   ;;  %v827_v47 = vld [vmem:[#allocation2 + $0x54] sm:$0x1]  ;;  %v880_v49 = vld [vmem:[#allocation2 + $0x68] sm:$0x1] }
  0x3d   : > { %6753 = vmatmul.mubr.msk.bf16.gmra.mrb[16].mxu0 %vm458_vm1, %v431_v3  ;;  %v1621_v16 = vrot.slane %v1619_v5, 4  ;;  %v1624_v17 = vrot.slane %v1622_v7, 5  ;;  %v1630_v18 = vrot.slane %v1628_v8, 5  ;;  %v1634_v19 = vrot.slane %v1632_v12, 4  ;;  %v6874_v3 = vld [vmem:[%s8741_s6 + $0x38] sm:$0xff]   ;;  %v6887_v54 = vld [vmem:[%s8741_s6 + $0x108] sm:$0xff]  }
  0x3e   : > { %6756 = vmatprep.mubr.msk.bf16.mxu0 %vm458_vm1, %v432_v23  ;;  %v6875_v23 = vld [vmem:[%s8741_s6 + $0xf8] sm:$0xff]   ;;  %v830_v45 = vld [vmem:[#allocation2 + $0x60] sm:$0x1]  ;;  %v828_v48 = vsel %vm7206_vm4, 0, %v827_v47  ;;  %v881_v50 = vsel %vm7213_vm6, 0, %v880_v49  ;;  %v6890_v63 = vld [vmem:[%s8741_s6 + $0x150] sm:$0xff]  }
  0x3f   : > { %v1625_v22 = vor.u32 %v1624_v17, %v1621_v16  ;;  %6383 = vmatpush3.bf16.msra.mxu0 %v6872_v14  ;;  %6273 = vmatpush3.bf16.msra.mxu1 %v6874_v3  ;;  %v831_v46 = vsel %vm7206_vm4, 0, %v830_v45  ;;  %829 = vst [vmem:[#allocation2 + $0x54] sm:$0x1] %v828_v48  ;;  %882 = vst [vmem:[#allocation2 + $0x68] sm:$0x1] %v881_v50  ;;  %v6893_v0 = vld [vmem:[%s8741_s6 + $0x110] sm:$0xff]  }
  0x40   : > { %6384 = vmatprep.subr.bf16.mxu0 %v6875_v23  ;;  %6482 = vmatprep.subr.bf16.mxu1 %v6879_v43  ;;  %832 = vst [vmem:[#allocation2 + $0x60] sm:$0x1] %v831_v46  ;;  %v877_v51 = vld [vmem:[#allocation2 + $0x5c] sm:$0x1]  ;;  %v836_v55 = vld [vmem:[#allocation2 + $0x78] sm:$0x1] }
  0x41   : > { %v878_v53 = vsel %vm7213_vm6, 0, %v877_v51  ;;  %v837_v56 = vsel %vm7206_vm4, 0, %v836_v55  ;;  %v833_v57 = vld [vmem:[#allocation2 + $0x6c] sm:$0x1]  ;;  %v886_v59 = vld [vmem:[#allocation2 + $0x80] sm:$0x1] }
  0x42   : > { %879 = vst [vmem:[#allocation2 + $0x5c] sm:$0x1] %v878_v53  ;;  %838 = vst [vmem:[#allocation2 + $0x78] sm:$0x1] %v837_v56  ;;  %v834_v58 = vsel %vm7206_vm4, 0, %v833_v57  ;;  %v887_v60 = vsel %vm7213_vm6, 0, %v886_v59 }
  0x43   : > { %835 = vst [vmem:[#allocation2 + $0x6c] sm:$0x1] %v834_v58  ;;  %888 = vst [vmem:[#allocation2 + $0x80] sm:$0x1] %v887_v60  ;;  %v883_v61 = vld [vmem:[#allocation2 + $0x74] sm:$0x1] }
  0x44   : > { %v884_v62 = vsel %vm7213_vm6, 0, %v883_v61  ;;  %v842_v1 = vld [vmem:[#allocation2 + $0x90] sm:$0x1]  ;;  %v839_v4 = vld [vmem:[#allocation2 + $0x84] sm:$0x1]  ;;  %v6896_v11 = vld [vmem:[%s8741_s6 + $0x158] sm:$0xff]  }
  0x45   : > { %6757 = vmatmul.mubr.msk.bf16.gmra.mrb[20].mxu0 %vm458_vm1, %v433_v24  ;;  %885 = vst [vmem:[#allocation2 + $0x74] sm:$0x1] %v884_v62  ;;  %v843_v2 = vsel %vm7206_vm4, 0, %v842_v1  ;;  %v840_v5 = vsel %vm7206_vm4, 0, %v839_v4  ;;  %v892_v7 = vld [vmem:[#allocation2 + $0x98] sm:$0x1] }
  0x46   : > { %6760 = vmatprep.mubr.msk.bf16.mxu0 %vm458_vm1, %v434_v25  ;;  %v1635_v25 = vor.u32 %v1634_v19, %v1630_v18  ;;  %844 = vst [vmem:[#allocation2 + $0x90] sm:$0x1] %v843_v2  ;;  %841 = vst [vmem:[#allocation2 + $0x84] sm:$0x1] %v840_v5  ;;  %v893_v8 = vsel %vm7213_vm6, 0, %v892_v7  ;;  %v6897_v12 = vld [vmem:[%s8741_s6 + $0x1c0] sm:$0xff]  }
  0x47   : > { %894 = vst [vmem:[#allocation2 + $0x98] sm:$0x1] %v893_v8  ;;  %v889_v9 = vld [vmem:[#allocation2 + $0x8c] sm:$0x1]  ;;  %v6900_v13 = vld [vmem:[%s8741_s6 + $0x118] sm:$0xff]   ;;  %v6908_v42 = vld [vmem:[%s8741_s6 + $0x120] sm:$0xff]  }
  0x48   : > { %v1636_v28 = vrot.slane %v1635_v25, 4  ;;  %v890_v10 = vsel %vm7213_vm6, 0, %v889_v9  ;;  %v848_v14 = vld [vmem:[#allocation2 + $0xa8] sm:$0x1]  ;;  %v2083_v16 = vld [vmem:[#allocation2 + $0x4] sm:$0xf] }
  0x49   : > { %891 = vst [vmem:[#allocation2 + $0x8c] sm:$0x1] %v890_v10  ;;  %v849_v15 = vsel %vm7206_vm4, 0, %v848_v14  ;;  %v845_v17 = vld [vmem:[#allocation2 + $0x9c] sm:$0x1] }
  0x4a   : > { %850 = vst [vmem:[#allocation2 + $0xa8] sm:$0x1] %v849_v15  ;;  %v898_v19 = vld [vmem:[#allocation2 + $0xb0] sm:$0x1]  ;;  %v2082_v3 = vld [vmem:[#allocation2] sm:$0xe] }
  0x4b   : > { %v899_v21 = vsel %vm7213_vm6, 0, %v898_v19  ;;  %v2084_v23 = vld [vmem:[#allocation2 + $0x8] sm:$0x1] }
  0x4c   : > { %900 = vst [vmem:[#allocation2 + $0xb0] sm:$0x1] %v899_v21 }
  0x4d   : > { %6761 = vmatmul.mubr.msk.bf16.gmra.mrb[24].mxu0 %vm458_vm1, %v435_v6  ;;  %v1640_v6 = vrot.slane %v1638_v20, 5  ;;  %v2183_v20 = vrot.slane %v2083_v16, 5 }
  0x4e   : > { %6764 = vmatprep.mubr.msk.bf16.mxu0 %vm458_vm1, %v436_v26  ;;  %v1626_v26 = vrot.slane %v1625_v22, 4  ;;  %v7367_v22 = vld [vmem:[%s8739_s4] ss:$0 sm:$0xff] }
  0x4f   : > { %v1641_v34 = vsel %vm7288_vm9, %v1636_v28, %v1640_v6  ;;  %v7372_v6 = vld [vmem:[%s8740_s5] ss:$0 sm:$0xff]  ;;  %v5971_v28 = vrot.slane %v2082_v3, 9  ;;  %v2185_v29 = vrot.slane %v2183_v20, 4 }
  0x50   : > { %v1631_v30 = vsel %vm7288_vm9, %v1626_v26, %v1630_v18  ;;  %v846_v18 = vsel %vm7206_vm4, 0, %v845_v17 }
  0x51   : > { %v5955_v40 = vcombine.low %v1631_v30, %v1641_v34  ;;  %847 = vst [vmem:[#allocation2 + $0x9c] sm:$0x1] %v846_v18  ;;  %v2186_v30 = vrot.slane %v2084_v23, 5  ;;  %v895_v34 = vld [vmem:[#allocation2 + $0xa4] sm:$0x1]  ;;  %v7395_v47 = vsel %vm7376_vm12, %v5971_v28, %v2183_v20 }
  0x52   : > { %v896_v41 = vsel %vm7213_vm6, 0, %v895_v34  ;;  %v1311_v18 = vld [vmem:[#allocation2 + $0xc] sm:$0xf] }
  0x53   : > { %5014 = vmatprep.mubr.bf16.mxu1 %v5955_v40  ;;  %897 = vst [vmem:[#allocation2 + $0xa4] sm:$0x1] %v896_v41  ;;  %v7399_v48 = vsel %vm7376_vm12, %v2185_v29, %v2186_v30 }
  0x54   : > { %5015 = vmatmul.mubr.bf16.vlgmr.msra.gmra.mrb[0].mxu1 %v6877_v35  ;;  %v6904_v35 = vld [vmem:[%s8741_s6 + $0x160] sm:$0xff]   ;;  %v5987_v56 = vcombine.low %v7395_v47, %v7399_v48 }
  0x55   : > { %6765 = vmatmul.mubr.msk.bf16.gmra.mrb[28].mxu0 %vm458_vm1, %v437_v27  ;;  %v6876_v27 = vld [vmem:[%s8741_s6 + $0xb8] sm:$0xff]   ;;  %6483 = vmatpush3.bf16.msra.mxu1 %v6881_v44  ;;  %vm5787_vm1 = vcmask 97280  }
  0x56   : > { %6385 = vmatpush3.bf16.msra.mxu0 %v6876_v27  ;;  %6484 = vmatprep.subr.bf16.mxu1 %v6884_v52 }
  0x57   : > { %6594 = vmatprep.subr.bf16.mxu0 %v6897_v12 }
  0x59   : > { %6485 = vmatpush3.bf16.msra.mxu1 %v6887_v54 }
  0x5a   : > { %6486 = vmatprep.subr.bf16.mxu1 %v6890_v63 }
  0x5d   : > { %6487 = vmatpush3.bf16.msra.mxu1 %v6893_v0 }
  0x5e   : > { %6488 = vmatprep.subr.bf16.mxu1 %v6896_v11  ;;  %v1318_v11 = vld [vmem:[#allocation2 + $0x18] sm:$0xf] }
  0x61   : > { %6489 = vmatpush3.bf16.msra.mxu1 %v6900_v13 }
  0x62   : > { %6490 = vmatprep.subr.bf16.mxu1 %v6904_v35 }
  0x65   : > { %6491 = vmatpush3.bf16.msra.mxu1 %v6908_v42 }
  0xf0   : > { %v6738_v25 = vpop.f32.mrb[0].mxu0 }
  0xf1   : > { %v681_v26 = vmul.f32 %v6738_v25, %v7367_v22  ;;  %v545_v27 = vpop.f32.mrb[1].mxu0  ;;  %v1322_v25 = vld [vmem:[#allocation2 + $0x20] sm:$0x1] }
  0xf2   : > { %v679_v31 = vmul.f32 %v7367_v22, %v545_v27  ;;  %v6739_v32 = vpop.f32.mrb[2].mxu0 }
  0xf3   : > { %v720_v37 = vadd.f32 %v7372_v6, %v681_v26  ;;  %v682_v38 = vmul.f32 %v6739_v32, %v7367_v22  ;;  %v548_v40 = vpop.f32.mrb[3].mxu0 }
  0xf4   : > { %v718_v43 = vadd.f32 %v7372_v6, %v679_v31  ;;  %v680_v44 = vmul.f32 %v7367_v22, %v548_v40  ;;  %v1315_v31 = vld [vmem:[#allocation2 + $0x14] sm:$0x1] }
  0xf5   : > { %v752_v45 = vmax.f32 %v720_v37, 0.0  ;;  %v721_v46 = vadd.f32 %v7372_v6, %v682_v38 }
  0xf6   : > { %v750_v49 = vmax.f32 %v718_v43, 0.0  ;;  %v719_v50 = vadd.f32 %v7372_v6, %v680_v44 }
  0xf7   : > { %v6209_v51 = vpack.c.bf16 %v752_v45, %v752_v45  ;;  %v753_v52 = vmax.f32 %v721_v46, 0.0 }
  0xf8   : > { %v6207_v53 = vpack.c.bf16 %v750_v49, %v750_v49  ;;  %v751_v54 = vmax.f32 %v719_v50, 0.0  ;;  %v6742_v55 = vpop.f32.mrb[4].mxu0 }
  0xf9   : > { %v1007_v57 = vshrl.u32 %v6209_v51, 16  ;;  %v1010_v58 = vshll.u32 %v6209_v51, 16  ;;  %v6210_v59 = vpack.c.bf16 %v753_v52, %v753_v52  ;;  %v685_v60 = vmul.f32 %v6742_v55, %v7367_v22  ;;  %v561_v61 = vpop.f32.mrb[5].mxu0 }
  0xfa   : > { %v990_v62 = vshrl.u32 %v6207_v53, 16  ;;  %v993_v63 = vshll.u32 %v6207_v53, 16  ;;  %v6208_v0 = vpack.c.bf16 %v751_v54, %v751_v54  ;;  %v683_v1 = vmul.f32 %v7367_v22, %v561_v61  ;;  %v6743_v2 = vpop.f32.mrb[6].mxu0 }
  0xfb   : > { %v1009_v4 = vrot.slane %v1007_v57, 7  ;;  %v1015_v5 = vshrl.u32 %v6210_v59, 16  ;;  %v1018_v7 = vshll.u32 %v6210_v59, 16  ;;  %v724_v8 = vadd.f32 %v7372_v6, %v685_v60  ;;  %v564_v9 = vpop.f32.mrb[7].mxu0  ;;  %v1332_v59 = vld [vmem:[#allocation2 + $0x30] sm:$0xf] }
  0xfc   : > { %v992_v12 = vrot.slane %v990_v62, 7  ;;  %v998_v13 = vshrl.u32 %v6208_v0, 16  ;;  %v1001_v14 = vshll.u32 %v6208_v0, 16  ;;  %v722_v15 = vadd.f32 %v7372_v6, %v683_v1 }
  0xfd   : > { %v1012_v16 = vor.u32 %v1010_v58, %v1009_v4  ;;  %v1013_v17 = vrot.slane %v1009_v4, 4  ;;  %v1017_v19 = vrot.slane %v1015_v5, 7  ;;  %v756_v20 = vmax.f32 %v724_v8, 0.0  ;;  %v1325_v4 = vld [vmem:[#allocation2 + $0x24] sm:$0xf] }
  0xfe   : > { %v995_v21 = vor.u32 %v993_v63, %v992_v12  ;;  %v996_v3 = vrot.slane %v992_v12, 4  ;;  %v1000_v26 = vrot.slane %v998_v13, 7  ;;  %v754_v27 = vmax.f32 %v722_v15, 0.0 }
  0xff   : > { %v1319_v28 = vsel %vm7409_vm15, %v1012_v16, %v1318_v11  ;;  %v1020_v29 = vor.u32 %v1018_v7, %v1017_v19  ;;  %v1022_v30 = vrot.slane %v1017_v19, 4  ;;  %v6213_v32 = vpack.c.bf16 %v756_v20, %v756_v20 }
 0x100   : > { %1320 = vst [vmem:[#allocation2 + $0x18] sm:$0xf] %v1319_v28  ;;  %v1312_v34 = vsel %vm7409_vm15, %v995_v21, %v1311_v18  ;;  %v1003_v35 = vor.u32 %v1001_v14, %v1000_v26  ;;  %v1005_v37 = vrot.slane %v1000_v26, 4  ;;  %v6211_v38 = vpack.c.bf16 %v754_v27, %v754_v27  ;;  %v6746_v40 = vpop.f32.mrb[8].mxu0 }
 0x101   : > { %1313 = vst [vmem:[#allocation2 + $0xc] sm:$0xf] %v1312_v34  ;;  %v1021_v41 = vsel %vm7416_vm0, %v1013_v17, %v1020_v29  ;;  %v1323_v42 = vsel %vm7206_vm4, %v1022_v30, %v1322_v25  ;;  %v1041_v43 = vshrl.u32 %v6213_v32, 16  ;;  %v1044_v44 = vshll.u32 %v6213_v32, 16  ;;  %v577_v45 = vpop.f32.mrb[9].mxu0  ;;  %v6901_v34 = vld [vmem:[%s8741_s6 + $0x180] sm:$0xff]  }
 0x102   : > { %1321 = vst [vmem:[#allocation2 + $0x1c] sm:$0xf] %v1021_v41  ;;  %1324 = vst [vmem:[#allocation2 + $0x20] sm:$0x1] %v1323_v42  ;;  %v1004_v46 = vsel %vm7416_vm0, %v996_v3, %v1003_v35  ;;  %v1316_v49 = vsel %vm7206_vm4, %v1005_v37, %v1315_v31  ;;  %v1024_v50 = vshrl.u32 %v6211_v38, 16  ;;  %v1027_v51 = vshll.u32 %v6211_v38, 16 }
 0x103   : > { %v6747_v52 = vpop.f32.mrb[10].mxu0  ;;  %1314 = vst [vmem:[#allocation2 + $0x10] sm:$0xf] %v1004_v46  ;;  %1317 = vst [vmem:[#allocation2 + $0x14] sm:$0x1] %v1316_v49  ;;  %v7432_v53 = vrot.slane %v1041_v43, 7  ;;  %v686_v54 = vmul.f32 %v6743_v2, %v7367_v22  ;;  %v684_v55 = vmul.f32 %v7367_v22, %v564_v9  ;;  %v689_v57 = vmul.f32 %v6746_v40, %v7367_v22 }
 0x104   : > { %v580_v58 = vpop.f32.mrb[11].mxu0  ;;  %v7437_v60 = vrot.slane %v1024_v50, 7  ;;  %v687_v61 = vmul.f32 %v7367_v22, %v577_v45  ;;  %v690_v62 = vmul.f32 %v6747_v52, %v7367_v22  ;;  %v6905_v41 = vld [vmem:[%s8741_s6 + $0x1c8] sm:$0xff]   ;;  %v1336_v42 = vld [vmem:[#allocation2 + $0x38] sm:$0x1] }
 0x105   : > { %v688_v63 = vmul.f32 %v7367_v22, %v580_v58  ;;  %v1046_v0 = vor.u32 %v1044_v44, %v7432_v53  ;;  %v1047_v1 = vrot.slane %v7432_v53, 4  ;;  %v725_v2 = vadd.f32 %v7372_v6, %v686_v54  ;;  %v1329_v43 = vld [vmem:[#allocation2 + $0x2c] sm:$0x1]  ;;  %v1346_v54 = vld [vmem:[#allocation2 + $0x48] sm:$0xf] }
 0x106   : > { %v723_v5 = vadd.f32 %v7372_v6, %v684_v55  ;;  %v1029_v7 = vor.u32 %v1027_v51, %v7437_v60  ;;  %v1030_v8 = vrot.slane %v7437_v60, 4  ;;  %v728_v9 = vadd.f32 %v7372_v6, %v689_v57  ;;  %v1339_v55 = vld [vmem:[#allocation2 + $0x3c] sm:$0xf] }
 0x107   : > { %v726_v11 = vadd.f32 %v7372_v6, %v687_v61  ;;  %v1333_v12 = vsel %vm7409_vm15, %v1046_v0, %v1332_v59  ;;  %v757_v13 = vmax.f32 %v725_v2, 0.0  ;;  %v729_v15 = vadd.f32 %v7372_v6, %v690_v62  ;;  %v6909_v59 = vld [vmem:[%s8741_s6 + $0x188] sm:$0xff]  }
 0x108   : > { %v755_v14 = vmax.f32 %v723_v5, 0.0  ;;  %1334 = vst [vmem:[#allocation2 + $0x30] sm:$0xf] %v1333_v12  ;;  %v1326_v16 = vsel %vm7409_vm15, %v1029_v7, %v1325_v4  ;;  %v760_v17 = vmax.f32 %v728_v9, 0.0  ;;  %v727_v19 = vadd.f32 %v7372_v6, %v688_v63  ;;  %v7456_v20 = vld [vmem:[#allocation2 + $0xc] sm:$0xf] }
 0x109   : > { %v758_v18 = vmax.f32 %v726_v11, 0.0  ;;  %1327 = vst [vmem:[#allocation2 + $0x24] sm:$0xf] %v1326_v16  ;;  %v6214_v21 = vpack.c.bf16 %v757_v13, %v757_v13  ;;  %v761_v25 = vmax.f32 %v729_v15, 0.0  ;;  %v1643_v26 = vshrl.u32 %v7456_v20, 16  ;;  %v6750_v27 = vpop.f32.mrb[12].mxu0 }
 0x10a   : > { %v6212_v3 = vpack.c.bf16 %v755_v14, %v755_v14  ;;  %v6217_v28 = vpack.c.bf16 %v760_v17, %v760_v17  ;;  %v759_v30 = vmax.f32 %v727_v19, 0.0  ;;  %v6878_v31 = vld [vmem:[#allocation2 + $0xc] sm:$0xff]   ;;  %v7460_v32 = vmul.f32 %v6750_v27, %v7367_v22  ;;  %v6880_v50 = vld [vmem:[#allocation2 + $0x18] sm:$0xff]   ;;  %v7481_v9 = vpop.f32.mrb[13].mxu0  ;;  %v1572_v13 = vld [vmem:[#allocation2 + $0x14] sm:$0x1] }
 0x10b   : > { %v6215_v29 = vpack.c.bf16 %v758_v18, %v758_v18  ;;  %v1049_v35 = vshrl.u32 %v6214_v21, 16  ;;  %v1052_v37 = vshll.u32 %v6214_v21, 16  ;;  %5175 = vmatprep.mubr.bf16.mxu0 %v6878_v31  ;;  %v6218_v57 = vpack.c.bf16 %v761_v25, %v761_v25  ;;  %v1571_v12 = vld [vmem:[#allocation2 + $0x10] sm:$0xf]  ;;  %v2085_v18 = vld [vmem:[#allocation2 + $0xc] sm:$0xe] }
 0x10c   : > { %v1032_v38 = vshrl.u32 %v6212_v3, 16  ;;  %v1035_v40 = vshll.u32 %v6212_v3, 16  ;;  %v1075_v44 = vshrl.u32 %v6217_v28, 16  ;;  %v1078_v45 = vshll.u32 %v6217_v28, 16  ;;  %5176 = vmatmul.mubr.bf16.vlgmr.msra.gmra.mrb[32].mxu0 %v5987_v56  ;;  %v7499_v19 = vpop.f32.mrb[14].mxu0  ;;  %v6912_v3 = vld [vmem:[%s8741_s6 + $0x168] sm:$0xff]  }
 0x10d   : > { %v1058_v46 = vshrl.u32 %v6215_v29, 16  ;;  %v1061_v49 = vshll.u32 %v6215_v29, 16  ;;  %v1051_v51 = vrot.slane %v1049_v35, 7  ;;  %v7468_v58 = vpack.c.bf16 %v759_v30, %v759_v30  ;;  %5183 = vmatprep.mubr.bf16.mxu0 %v6880_v50  ;;  %6595 = vmatpush3.bf16.msra.mxu0 %v6901_v34  ;;  %v2086_v21 = vld [vmem:[#allocation2 + $0x10] sm:$0xf] }
 0x10e   : > { %v1034_v52 = vrot.slane %v1032_v38, 7  ;;  %v7476_v61 = vrot.slane %v1075_v44, 7  ;;  %v1645_v63 = vrot.slane %v1643_v26, 4  ;;  %v1646_v0 = vshll.u32 %v7456_v20, 16  ;;  %6596 = vmatprep.subr.bf16.mxu0 %v6905_v41  ;;  %v1350_v25 = vld [vmem:[#allocation2 + $0x50] sm:$0x1]  ;;  %6492 = vmatprep.subr.bf16.mxu1 %v6912_v3 }
 0x10f   : > { %v7478_v62 = vrot.slane %v1058_v46, 7  ;;  %v1054_v4 = vor.u32 %v1052_v37, %v1051_v51  ;;  %v1056_v2 = vrot.slane %v1051_v51, 4  ;;  %v1083_v60 = vshrl.u32 %v6218_v57, 16  ;;  %v1343_v31 = vld [vmem:[#allocation2 + $0x44] sm:$0x1] }
 0x110   : > { %v1037_v5 = vor.u32 %v1035_v40, %v1034_v52  ;;  %v1039_v7 = vrot.slane %v1034_v52, 4  ;;  %v1080_v47 = vor.u32 %v1078_v45, %v7476_v61  ;;  %v1081_v48 = vrot.slane %v7476_v61, 4  ;;  %v2087_v37 = vld [vmem:[#allocation2 + $0x14] sm:$0x1] }
 0x111   : > { %v1063_v56 = vor.u32 %v1061_v49, %v7478_v62  ;;  %v1064_v11 = vrot.slane %v7478_v62, 4  ;;  %v1055_v14 = vsel %vm7416_vm0, %v1047_v1, %v1054_v4  ;;  %v1337_v15 = vsel %vm7206_vm4, %v1056_v2, %v1336_v42  ;;  %6597 = vmatpush3.bf16.msra.mxu0 %v6909_v59 }
 0x112   : > { %v1038_v16 = vsel %vm7416_vm0, %v1030_v8, %v1037_v5  ;;  %v1330_v17 = vsel %vm7206_vm4, %v1039_v7, %v1329_v43  ;;  %1335 = vst [vmem:[#allocation2 + $0x34] sm:$0xf] %v1055_v14  ;;  %1338 = vst [vmem:[#allocation2 + $0x38] sm:$0x1] %v1337_v15  ;;  %v1347_v53 = vsel %vm7409_vm15, %v1080_v47, %v1346_v54  ;;  %v1086_v20 = vshll.u32 %v6218_v57, 16  ;;  %v7505_v8 = vpop.f32.mrb[15].mxu0 }
 0x113   : > { %1328 = vst [vmem:[#allocation2 + $0x28] sm:$0xf] %v1038_v16  ;;  %1331 = vst [vmem:[#allocation2 + $0x2c] sm:$0x1] %v1330_v17  ;;  %v1340_v1 = vsel %vm7409_vm15, %v1063_v56, %v1339_v55  ;;  %v1066_v26 = vshrl.u32 %v7468_v58, 16  ;;  %v1069_v27 = vshll.u32 %v7468_v58, 16  ;;  %v732_v56 = vadd.f32 %v7372_v6, %v7460_v32 }
 0x114   : > { %1348 = vst [vmem:[#allocation2 + $0x48] sm:$0xf] %v1347_v53  ;;  %1341 = vst [vmem:[#allocation2 + $0x3c] sm:$0xf] %v1340_v1  ;;  %v1648_v28 = vrot.slane %v1646_v0, 5  ;;  %v1652_v29 = vshll.u32 %v1571_v12, 16 }
 0x115   : > { %v1085_v30 = vrot.slane %v1083_v60, 7  ;;  %v1656_v34 = vshrl.u32 %v1571_v12, 16  ;;  %v1662_v35 = vshll.u32 %v1572_v13, 16  ;;  %v5972_v38 = vrot.slane %v2085_v18, 9  ;;  %v7512_v44 = vpop.f32.mrb[16].mxu0 }
 0x116   : > { %v1068_v40 = vrot.slane %v1066_v26, 7  ;;  %v1649_v41 = vor.u32 %v1648_v28, %v1645_v63  ;;  %v1654_v42 = vrot.slane %v1652_v29, 5  ;;  %v2190_v43 = vrot.slane %v2086_v21, 5  ;;  %v7514_v51 = vpop.f32.mrb[17].mxu0  ;;  %v1573_v58 = vld [vmem:[#allocation2 + $0x18] sm:$0xf] }
 0x117   : > { %v1088_v45 = vor.u32 %v1086_v20, %v1085_v30  ;;  %v1090_v46 = vrot.slane %v1085_v30, 4  ;;  %v1658_v49 = vrot.slane %v1656_v34, 4  ;;  %v1664_v50 = vrot.slane %v1662_v35, 5  ;;  %v1574_v0 = vld [vmem:[#allocation2 + $0x1c] sm:$0xf]  ;;  %v7522_v4 = vpop.f32.mrb[18].mxu0 }
 0x118   : > { %v1071_v52 = vor.u32 %v1069_v27, %v1068_v40  ;;  %v1073_v54 = vrot.slane %v1068_v40, 4  ;;  %v1650_v55 = vrot.slane %v1649_v41, 4  ;;  %v2191_v57 = vsel %vm7376_vm12, %v5972_v38, %v2190_v43  ;;  %v1575_v13 = vld [vmem:[#allocation2 + $0x20] sm:$0x1]  ;;  %v7536_v53 = vpop.f32.mrb[19].mxu0  ;;  %v6882_v29 = vld [vmem:[#allocation2 + $0xc] sm:$0xff]  }
 0x119   : > { %v1089_v59 = vsel %vm7416_vm0, %v1081_v48, %v1088_v45  ;;  %v1351_v61 = vsel %vm7206_vm4, %v1090_v46, %v1350_v25  ;;  %v1659_v62 = vor.u32 %v1658_v49, %v1654_v42  ;;  %v2192_v63 = vrot.slane %v2190_v43, 4  ;;  %v2088_v21 = vld [vmem:[#allocation2 + $0x18] sm:$0xe]  ;;  %v7541_v27 = vpop.f32.mrb[20].mxu0 }
 0x11a   : > { %1349 = vst [vmem:[#allocation2 + $0x4c] sm:$0xf] %v1089_v59  ;;  %1352 = vst [vmem:[#allocation2 + $0x50] sm:$0x1] %v1351_v61  ;;  %v1072_v2 = vsel %vm7416_vm0, %v1064_v11, %v1071_v52  ;;  %v1344_v5 = vsel %vm7206_vm4, %v1073_v54, %v1343_v31  ;;  %v1655_v7 = vsel %vm7288_vm9, %v1650_v55, %v1654_v42  ;;  %v2193_v47 = vrot.slane %v2087_v37, 5  ;;  %v6883_v18 = vld [vmem:[#allocation2 + $0x24] sm:$0xff]  }
 0x11b   : > { %1342 = vst [vmem:[#allocation2 + $0x40] sm:$0xf] %v1072_v2  ;;  %1345 = vst [vmem:[#allocation2 + $0x44] sm:$0x1] %v1344_v5  ;;  %v1660_v48 = vrot.slane %v1659_v62, 4  ;;  %v691_v12 = vmul.f32 %v7367_v22, %v7481_v9  ;;  %v1667_v14 = vshrl.u32 %v1573_v58, 16  ;;  %v694_v38 = vmul.f32 %v7499_v19, %v7367_v22 }
 0x11c   : > { %v2194_v11 = vsel %vm7376_vm12, %v2192_v63, %v2193_v47  ;;  %v1670_v15 = vshll.u32 %v1573_v58, 16  ;;  %v1676_v16 = vshll.u32 %v1574_v0, 16  ;;  %v1680_v17 = vshrl.u32 %v1574_v0, 16  ;;  %v7543_v35 = vpop.f32.mrb[21].mxu0  ;;  %v1360_v19 = vld [vmem:[#allocation2 + $0x60] sm:$0xf] }
 0x11d   : > { %v1665_v1 = vsel %vm7288_vm9, %v1660_v48, %v1664_v50  ;;  %v5988_v60 = vcombine.low %v2191_v57, %v2194_v11  ;;  %v764_v20 = vmax.f32 %v732_v56, 0.0  ;;  %v730_v32 = vadd.f32 %v7372_v6, %v691_v12  ;;  %v7549_v42 = vpop.f32.mrb[22].mxu0  ;;  %v2089_v50 = vld [vmem:[#allocation2 + $0x1c] sm:$0xf]  ;;  %v1353_v62 = vld [vmem:[#allocation2 + $0x54] sm:$0xf] }
 0x11e   : > { %v5956_v9 = vcombine.low %v1655_v7, %v1665_v1  ;;  %v1669_v3 = vrot.slane %v1667_v14, 4  ;;  %v1672_v25 = vrot.slane %v1670_v15, 5  ;;  %v1678_v26 = vrot.slane %v1676_v16, 5  ;;  %v2090_v11 = vld [vmem:[#allocation2 + $0x20] sm:$0x1] }
 0x11f   : > { %5184 = vmatmul.mubr.bf16.gmra.mrb[36].mxu0 %v5988_v60  ;;  %v6221_v28 = vpack.c.bf16 %v764_v20, %v764_v20  ;;  %v762_v30 = vmax.f32 %v730_v32, 0.0  ;;  %v1682_v31 = vrot.slane %v1680_v17, 4  ;;  %v1686_v34 = vshll.u32 %v1575_v13, 16  ;;  %v1576_v16 = vld [vmem:[#allocation2 + $0x24] sm:$0xf]  ;;  %v6885_v20 = vld [vmem:[#allocation2 + $0x18] sm:$0xff]  }
 0x120   : > { %5022 = vmatprep.mubr.bf16.mxu1 %v5956_v9  ;;  %v1673_v37 = vor.u32 %v1672_v25, %v1669_v3  ;;  %5191 = vmatprep.mubr.bf16.mxu0 %v6883_v18  ;;  %v692_v40 = vmul.f32 %v7367_v22, %v7505_v8  ;;  %v5973_v41 = vrot.slane %v2088_v21, 9  ;;  %v733_v55 = vadd.f32 %v7372_v6, %v694_v38  ;;  %v1577_v32 = vld [vmem:[#allocation2 + $0x28] sm:$0xf]  ;;  %v7567_v38 = vpop.f32.mrb[23].mxu0 }
 0x121   : > { %v1109_v43 = vshrl.u32 %v6221_v28, 16  ;;  %v1112_v45 = vshll.u32 %v6221_v28, 16  ;;  %5023 = vmatmul.mubr.bf16.gmra.mrb[4].mxu1 %v6882_v29  ;;  %v6219_v46 = vpack.c.bf16 %v762_v30, %v762_v30  ;;  %v1683_v49 = vor.u32 %v1682_v31, %v1678_v26  ;;  %v1364_v29 = vld [vmem:[#allocation2 + $0x68] sm:$0x1]  ;;  %v1357_v30 = vld [vmem:[#allocation2 + $0x5c] sm:$0x1] }
 0x122   : > { %v1674_v52 = vrot.slane %v1673_v37, 4  ;;  %v1688_v54 = vrot.slane %v1686_v34, 5  ;;  %v731_v57 = vadd.f32 %v7372_v6, %v692_v40  ;;  %v765_v0 = vmax.f32 %v733_v55, 0.0  ;;  %v3985_v24 = vld [vmem:[#allocation2 + $0x44] sm:$0x1] }
 0x123   : > { %v7553_v58 = vrot.slane %v1109_v43, 7  ;;  %v1092_v59 = vshrl.u32 %v6219_v46, 16  ;;  %v1095_v8 = vshll.u32 %v6219_v46, 16  ;;  %v1684_v61 = vrot.slane %v1683_v49, 4 }
 0x124   : > { %v1679_v63 = vsel %vm7288_vm9, %v1674_v52, %v1678_v26  ;;  %v763_v2 = vmax.f32 %v731_v57, 0.0  ;;  %v2197_v5 = vrot.slane %v2089_v50, 5  ;;  %v6222_v13 = vpack.c.bf16 %v765_v0, %v765_v0  ;;  %v1578_v26 = vld [vmem:[#allocation2 + $0x2c] sm:$0x1]  ;;  %v2092_v0 = vld [vmem:[#allocation2 + $0x28] sm:$0xf] }
 0x125   : > { %v1114_v7 = vor.u32 %v1112_v45, %v7553_v58  ;;  %v1115_v47 = vrot.slane %v7553_v58, 4  ;;  %v1094_v48 = vrot.slane %v1092_v59, 7  ;;  %v1689_v56 = vsel %vm7288_vm9, %v1684_v61, %v1688_v54  ;;  %v1579_v59 = vld [vmem:[#allocation2 + $0x30] sm:$0xf] }
 0x126   : > { %v5957_v12 = vcombine.low %v1679_v63, %v1689_v56  ;;  %v6220_v14 = vpack.c.bf16 %v763_v2, %v763_v2  ;;  %v2198_v15 = vsel %vm7376_vm12, %v5973_v41, %v2197_v5  ;;  %v2199_v60 = vrot.slane %v2197_v5, 4  ;;  %v2093_v2 = vld [vmem:[#allocation2 + $0x2c] sm:$0x1] }
 0x127   : > { %v1361_v17 = vsel %vm7409_vm15, %v1114_v7, %v1360_v19  ;;  %v1097_v18 = vor.u32 %v1095_v8, %v1094_v48  ;;  %v1098_v1 = vrot.slane %v1094_v48, 4  ;;  %v1117_v21 = vshrl.u32 %v6222_v13, 16  ;;  %v2091_v19 = vld [vmem:[#allocation2 + $0x24] sm:$0xe] }
 0x128   : > { %1362 = vst [vmem:[#allocation2 + $0x60] sm:$0xf] %v1361_v17  ;;  %5030 = vmatprep.mubr.bf16.mxu1 %v5957_v12  ;;  %v1120_v9 = vshll.u32 %v6222_v13, 16  ;;  %v1100_v3 = vshrl.u32 %v6220_v14, 16  ;;  %v1103_v25 = vshll.u32 %v6220_v14, 16  ;;  %v2200_v31 = vrot.slane %v2090_v11, 5 }
 0x129   : > { %v1354_v28 = vsel %vm7409_vm15, %v1097_v18, %v1353_v62  ;;  %5031 = vmatmul.mubr.bf16.gmra.mrb[8].mxu1 %v6885_v20  ;;  %v1691_v34 = vshrl.u32 %v1576_v16, 16  ;;  %v1694_v37 = vshll.u32 %v1576_v16, 16  ;;  %v1119_v40 = vrot.slane %v1117_v21, 7  ;;  %v6886_v12 = vld [vmem:[#allocation2 + $0x30] sm:$0xff]   ;;  %v7579_v16 = vpop.f32.mrb[24].mxu0 }
 0x12a   : > { %1355 = vst [vmem:[#allocation2 + $0x54] sm:$0xf] %v1354_v28  ;;  %v1102_v41 = vrot.slane %v1100_v3, 7  ;;  %v1700_v43 = vshll.u32 %v1577_v32, 16  ;;  %v1704_v45 = vshrl.u32 %v1577_v32, 16  ;;  %v2201_v46 = vsel %vm7376_vm12, %v2199_v60, %v2200_v31  ;;  %v7585_v20 = vpop.f32.mrb[25].mxu0 }
 0x12b   : > { %v1693_v49 = vrot.slane %v1691_v34, 4  ;;  %v1696_v50 = vrot.slane %v1694_v37, 5  ;;  %v1710_v52 = vshll.u32 %v1578_v26, 16  ;;  %v1122_v54 = vor.u32 %v1120_v9, %v1119_v40  ;;  %v1580_v13 = vld [vmem:[#allocation2 + $0x34] sm:$0xf]  ;;  %v7592_v26 = vpop.f32.mrb[26].mxu0 }
 0x12c   : > { %v1124_v55 = vrot.slane %v1119_v40, 4  ;;  %v1105_v57 = vor.u32 %v1103_v25, %v1102_v41  ;;  %v1107_v58 = vrot.slane %v1102_v41, 4  ;;  %v5989_v8 = vcombine.low %v2198_v15, %v2201_v46  ;;  %v6913_v32 = vld [vmem:[%s8741_s6 + $0x1d0] sm:$0xff]   ;;  %v7598_v31 = vpop.f32.mrb[27].mxu0 }
 0x12d   : > { %v1697_v61 = vor.u32 %v1696_v50, %v1693_v49  ;;  %v1702_v62 = vrot.slane %v1700_v43, 5  ;;  %v1706_v63 = vrot.slane %v1704_v45, 4  ;;  %v1123_v5 = vsel %vm7416_vm0, %v1115_v47, %v1122_v54  ;;  %6598 = vmatprep.subr.bf16.mxu0 %v6913_v32  ;;  %v7602_v43 = vpop.f32.mrb[28].mxu0  ;;  %v6888_v50 = vld [vmem:[#allocation2 + $0x24] sm:$0xff]   ;;  %v6889_v54 = vld [vmem:[#allocation2 + $0x3c] sm:$0xff]  }
 0x12e   : > { %v1365_v7 = vsel %vm7206_vm4, %v1124_v55, %v1364_v29  ;;  %v1106_v48 = vsel %vm7416_vm0, %v1098_v1, %v1105_v57  ;;  %v1358_v56 = vsel %vm7206_vm4, %v1107_v58, %v1357_v30  ;;  %1363 = vst [vmem:[#allocation2 + $0x64] sm:$0xf] %v1123_v5  ;;  %5192 = vmatmul.mubr.bf16.gmra.mrb[40].mxu0 %v5989_v8  ;;  %v1712_v15 = vrot.slane %v1710_v52, 5  ;;  %v1581_v30 = vld [vmem:[#allocation2 + $0x38] sm:$0x1] }
 0x12f   : > { %1366 = vst [vmem:[#allocation2 + $0x68] sm:$0x1] %v1365_v7  ;;  %1356 = vst [vmem:[#allocation2 + $0x58] sm:$0xf] %v1106_v48  ;;  %v1698_v14 = vrot.slane %v1697_v61, 4  ;;  %v1707_v11 = vor.u32 %v1706_v63, %v1702_v62  ;;  %v5974_v47 = vrot.slane %v2091_v19, 9  ;;  %5199 = vmatprep.mubr.bf16.mxu0 %v6886_v12  ;;  %v697_v1 = vmul.f32 %v7512_v44, %v7367_v22 }
 0x130   : > { %1359 = vst [vmem:[#allocation2 + $0x5c] sm:$0x1] %v1358_v56  ;;  %v2204_v17 = vrot.slane %v2092_v0, 5  ;;  %v2207_v18 = vrot.slane %v2093_v2, 5  ;;  %v695_v60 = vmul.f32 %v7367_v22, %v7514_v51  ;;  %v1715_v3 = vshrl.u32 %v1579_v59, 16  ;;  %v7606_v61 = vpop.f32.mrb[29].mxu0 }
 0x131   : > { %v1703_v21 = vsel %vm7288_vm9, %v1698_v14, %v1702_v62  ;;  %v1708_v9 = vrot.slane %v1707_v11, 4  ;;  %v1718_v25 = vshll.u32 %v1579_v59, 16  ;;  %v736_v51 = vadd.f32 %v7372_v6, %v697_v1  ;;  %v2094_v55 = vld [vmem:[#allocation2 + $0x30] sm:$0xe]  ;;  %v2095_v8 = vld [vmem:[#allocation2 + $0x34] sm:$0xf] }
 0x132   : > { %v2205_v44 = vsel %vm7376_vm12, %v5974_v47, %v2204_v17  ;;  %v2206_v28 = vrot.slane %v2204_v17, 4  ;;  %v734_v29 = vadd.f32 %v7372_v6, %v695_v60  ;;  %v1717_v37 = vrot.slane %v1715_v3, 4  ;;  %v6916_v62 = vld [vmem:[%s8741_s6 + $0x128] sm:$0xff]   ;;  %v2096_v12 = vld [vmem:[#allocation2 + $0x38] sm:$0x1] }
 0x133   : > { %v1713_v34 = vsel %vm7288_vm9, %v1708_v9, %v1712_v15  ;;  %v1720_v40 = vrot.slane %v1718_v25, 5  ;;  %v1724_v41 = vshll.u32 %v1580_v13, 16  ;;  %v768_v49 = vmax.f32 %v736_v51, 0.0  ;;  %v1582_v17 = vld [vmem:[#allocation2 + $0x3c] sm:$0xf]  ;;  %6493 = vmatpush3.bf16.msra.mxu1 %v6916_v62 }
 0x134   : > { %v5958_v45 = vcombine.low %v1703_v21, %v1713_v34  ;;  %v2208_v46 = vsel %vm7376_vm12, %v2206_v28, %v2207_v18  ;;  %v766_v52 = vmax.f32 %v734_v29, 0.0  ;;  %v1728_v59 = vshrl.u32 %v1580_v13, 16  ;;  %v1374_v18 = vld [vmem:[#allocation2 + $0x78] sm:$0xf]  ;;  %v1367_v3 = vld [vmem:[#allocation2 + $0x6c] sm:$0xf] }
 0x135   : > { %v5990_v57 = vcombine.low %v2205_v44, %v2208_v46  ;;  %v1721_v58 = vor.u32 %v1720_v40, %v1717_v37  ;;  %v1726_v19 = vrot.slane %v1724_v41, 5  ;;  %v6225_v63 = vpack.c.bf16 %v768_v49, %v768_v49  ;;  %v1583_v40 = vld [vmem:[#allocation2 + $0x40] sm:$0xf]  ;;  %v1584_v49 = vld [vmem:[#allocation2 + $0x44] sm:$0x1] }
 0x136   : > { %5038 = vmatprep.mubr.bf16.mxu1 %v5958_v45  ;;  %v6223_v0 = vpack.c.bf16 %v766_v52, %v766_v52  ;;  %v1734_v2 = vshll.u32 %v1581_v30, 16  ;;  %v698_v5 = vmul.f32 %v7522_v4, %v7367_v22  ;;  %v1730_v48 = vrot.slane %v1728_v59, 4  ;;  %v6917_v59 = vld [vmem:[%s8741_s6 + $0x190] sm:$0xff]  }
 0x137   : > { %5200 = vmatmul.mubr.bf16.gmra.mrb[44].mxu0 %v5990_v57  ;;  %5039 = vmatmul.mubr.bf16.gmra.mrb[12].mxu1 %v6888_v50  ;;  %v1722_v7 = vrot.slane %v1721_v58, 4  ;;  %v696_v56 = vmul.f32 %v7367_v22, %v7536_v53  ;;  %v5975_v13 = vrot.slane %v2094_v55, 9  ;;  %v1143_v14 = vshrl.u32 %v6225_v63, 16  ;;  %v7631_v50 = vpop.f32.mrb[30].mxu0  ;;  %v7637_v58 = vld [vmem:[#allocation2 + $0x3c] sm:$0xe] }
 0x138   : > { %v1146_v11 = vshll.u32 %v6225_v63, 16  ;;  %v1126_v15 = vshrl.u32 %v6223_v0, 16  ;;  %v1129_v47 = vshll.u32 %v6223_v0, 16  ;;  %5207 = vmatprep.mubr.bf16.mxu0 %v6889_v54  ;;  %v1731_v1 = vor.u32 %v1730_v48, %v1726_v19  ;;  %v6924_v48 = vld [vmem:[%s8741_s6 + $0x130] sm:$0xff]   ;;  %6599 = vmatpush3.bf16.msra.mxu0 %v6917_v59 }
 0x139   : > { %v1727_v4 = vsel %vm7288_vm9, %v1722_v7, %v1726_v19  ;;  %v1736_v60 = vrot.slane %v1734_v2, 5  ;;  %v737_v32 = vadd.f32 %v7372_v6, %v698_v5  ;;  %v7618_v21 = vrot.slane %v1143_v14, 7  ;;  %v7639_v19 = vpop.f32.mrb[31].mxu0  ;;  %v6891_v2 = vld [vmem:[#allocation2 + $0x30] sm:$0xff]   ;;  %v6921_v7 = vld [vmem:[%s8741_s6 + $0x1d8] sm:$0xff]  }
 0x13a   : > { %v7620_v22 = vrot.slane %v1126_v15, 7  ;;  %v735_v53 = vadd.f32 %v7372_v6, %v696_v56  ;;  %v2211_v9 = vrot.slane %v2095_v8, 5  ;;  %v1732_v25 = vrot.slane %v1731_v1, 4  ;;  %v6920_v8 = vld [vmem:[%s8741_s6 + $0x170] sm:$0xff]   ;;  %v1378_v56 = vld [vmem:[#allocation2 + $0x80] sm:$0x1]  ;;  %6600 = vmatprep.subr.bf16.mxu0 %v6921_v7 }
 0x13b   : > { %v769_v44 = vmax.f32 %v737_v32, 0.0  ;;  %v2214_v28 = vrot.slane %v2096_v12, 5  ;;  %v1739_v51 = vshrl.u32 %v1582_v17, 16  ;;  %v1148_v29 = vor.u32 %v1146_v11, %v7618_v21  ;;  %v6925_v15 = vld [vmem:[%s8741_s6 + $0x198] sm:$0xff]   ;;  %v2098_v32 = vld [vmem:[#allocation2 + $0x40] sm:$0xf]  ;;  %6494 = vmatprep.subr.bf16.mxu1 %v6920_v8 }
 0x13c   : > { %v1149_v30 = vrot.slane %v7618_v21, 4  ;;  %v1131_v34 = vor.u32 %v1129_v47, %v7620_v22  ;;  %v1132_v37 = vrot.slane %v7620_v22, 4  ;;  %v1737_v41 = vsel %vm7288_vm9, %v1732_v25, %v1736_v60  ;;  %v6928_v47 = vld [vmem:[%s8741_s6 + $0x178] sm:$0xff]   ;;  %6495 = vmatpush3.bf16.msra.mxu1 %v6924_v48  ;;  %6601 = vmatpush3.bf16.msra.mxu0 %v6925_v15  ;;  %v1585_v8 = vld [vmem:[#allocation2 + $0x48] sm:$0xf]  ;;  %v7698_v22 = vld [vmem:[%s8741_s6 + $0x200] sm:$0xff]  }
 0x13d   : > { %v6226_v45 = vpack.c.bf16 %v769_v44, %v769_v44  ;;  %v767_v6 = vmax.f32 %v735_v53, 0.0  ;;  %v2212_v46 = vsel %vm7376_vm12, %v5975_v13, %v2211_v9  ;;  %v1375_v52 = vsel %vm7409_vm15, %v1148_v29, %v1374_v18  ;;  %v6892_v53 = vld [vmem:[#allocation2 + $0x48] sm:$0xff]   ;;  %6496 = vmatprep.subr.bf16.mxu1 %v6928_v47  ;;  %v7691_v48 = vld [vmem:[%s8739_s4] ss:$0 sm:$0xff] }
 0x13e   : > { %v1368_v54 = vsel %vm7409_vm15, %v1131_v34, %v1367_v3  ;;  %v5959_v55 = vcombine.low %v1727_v4, %v1737_v41  ;;  %v2213_v57 = vrot.slane %v2211_v9, 4  ;;  %1376 = vst [vmem:[#allocation2 + $0x78] sm:$0xf] %v1375_v52  ;;  %v1741_v5 = vrot.slane %v1739_v51, 4  ;;  %v2099_v52 = vld [vmem:[#allocation2 + $0x44] sm:$0x1] }
 0x13f   : > { %1369 = vst [vmem:[#allocation2 + $0x6c] sm:$0xf] %v1368_v54  ;;  %v1151_v62 = vshrl.u32 %v6226_v45, 16  ;;  %v1154_v63 = vshll.u32 %v6226_v45, 16  ;;  %v6224_v0 = vpack.c.bf16 %v767_v6, %v767_v6  ;;  %v1742_v13 = vshll.u32 %v1582_v17, 16  ;;  %v6929_v17 = vld [vmem:[%s8741_s6 + $0x1e0] sm:$0xff]  }
 0x140   : > { %5046 = vmatprep.mubr.bf16.mxu1 %v5959_v55  ;;  %v2215_v12 = vsel %vm7376_vm12, %v2213_v57, %v2214_v28  ;;  %v1748_v14 = vshll.u32 %v1583_v40, 16  ;;  %v1752_v11 = vshrl.u32 %v1583_v40, 16  ;;  %v1758_v44 = vshll.u32 %v1584_v49, 16  ;;  %v6932_v28 = vld [vmem:[%s8741_s6 + $0x138] sm:$0xff]   ;;  %v1371_v40 = vld [vmem:[#allocation2 + $0x74] sm:$0x1]  ;;  %6602 = vmatprep.subr.bf16.mxu0 %v6929_v17 }
 0x141   : > { %v1153_v18 = vrot.slane %v1151_v62, 7  ;;  %v1134_v4 = vshrl.u32 %v6224_v0, 16  ;;  %v1137_v1 = vshll.u32 %v6224_v0, 16  ;;  %v5991_v60 = vcombine.low %v2212_v46, %v2215_v12  ;;  %5047 = vmatmul.mubr.bf16.gmra.mrb[16].mxu1 %v6891_v2  ;;  %v6933_v54 = vld [vmem:[%s8741_s6 + $0x1a0] sm:$0xff]   ;;  %v6934_v62 = vld [vmem:[%s8741_s6 + $0x1e8] sm:$0xff]  }
 0x142   : > { %v1744_v9 = vrot.slane %v1742_v13, 5  ;;  %v1750_v3 = vrot.slane %v1748_v14, 5  ;;  %v1754_v25 = vrot.slane %v1752_v11, 4  ;;  %v5976_v41 = vrot.slane %v7637_v58, 9  ;;  %6497 = vmatpush3.bf16.msra.mxu1 %v6932_v28  ;;  %v1586_v12 = vld [vmem:[#allocation2 + $0x4c] sm:$0xf]  ;;  %6603 = vmatpush3.bf16.msra.mxu0 %v6933_v54 }
 0x143   : > { %v1156_v51 = vor.u32 %v1154_v63, %v1153_v18  ;;  %v1158_v29 = vrot.slane %v1153_v18, 4  ;;  %v1136_v34 = vrot.slane %v1134_v4, 7  ;;  %5208 = vmatmul.mubr.bf16.gmra.mrb[48].mxu0 %v5991_v60  ;;  %v1760_v46 = vrot.slane %v1758_v44, 5  ;;  %v1587_v11 = vld [vmem:[#allocation2 + $0x50] sm:$0x1]  ;;  %v6895_v60 = vld [vmem:[#allocation2 + $0x54] sm:$0xff]   ;;  %6604 = vmatprep.subr.bf16.mxu0 %v6934_v62 }
 0x144   : > { %5215 = vmatprep.mubr.bf16.mxu0 %v6892_v53  ;;  %v1745_v45 = vor.u32 %v1744_v9, %v1741_v5  ;;  %v1755_v6 = vor.u32 %v1754_v25, %v1750_v3  ;;  %v2218_v49 = vrot.slane %v2098_v32, 5  ;;  %v2221_v7 = vrot.slane %v2099_v52, 5  ;;  %v7711_v18 = vld [vmem:[%s8740_s5] ss:$0 sm:$0xff]  ;;  %v2100_v32 = vld [vmem:[#allocation2 + $0x48] sm:$0xe]  ;;  %6816 = vmatprep.subr.bf16.mxu1 %v7698_v22 }
 0x145   : > { %v1157_v55 = vsel %vm7416_vm0, %v1149_v30, %v1156_v51  ;;  %v1379_v57 = vsel %vm7206_vm4, %v1158_v29, %v1378_v56  ;;  %v1139_v58 = vor.u32 %v1137_v1, %v1136_v34  ;;  %v1141_v59 = vrot.slane %v1136_v34, 4  ;;  %v6894_v53 = vld [vmem:[#allocation2 + $0x3c] sm:$0xff]   ;;  %v6936_v44 = vld [vmem:[%s8741_s6 + $0x1f0] sm:$0xff]  }
 0x146   : > { %1377 = vst [vmem:[#allocation2 + $0x7c] sm:$0xf] %v1157_v55  ;;  %1380 = vst [vmem:[#allocation2 + $0x80] sm:$0x1] %v1379_v57  ;;  %v1746_v63 = vrot.slane %v1745_v45, 4  ;;  %v1756_v0 = vrot.slane %v1755_v6, 4  ;;  %v2219_v21 = vsel %vm7376_vm12, %v5976_v41, %v2218_v49  ;;  %v701_v56 = vmul.f32 %v7691_v48, %v7541_v27 }
 0x147   : > { %v2220_v2 = vrot.slane %v2218_v49, 4  ;;  %v1140_v30 = vsel %vm7416_vm0, %v1132_v37, %v1139_v58  ;;  %v1372_v5 = vsel %vm7206_vm4, %v1141_v59, %v1371_v40  ;;  %v699_v14 = vmul.f32 %v7691_v48, %v7543_v35  ;;  %v6935_v35 = vld [vmem:[%s8741_s6 + $0x1a8] sm:$0xff]   ;;  %v6938_v55 = vld [vmem:[%s8741_s6 + $0x1b0] sm:$0xff]  }
 0x148   : > { %1370 = vst [vmem:[#allocation2 + $0x70] sm:$0xf] %v1140_v30  ;;  %1373 = vst [vmem:[#allocation2 + $0x74] sm:$0x1] %v1372_v5  ;;  %v1751_v37 = vsel %vm7288_vm9, %v1746_v63, %v1750_v3  ;;  %v1761_v13 = vsel %vm7288_vm9, %v1756_v0, %v1760_v46  ;;  %v1763_v15 = vshrl.u32 %v1585_v8, 16  ;;  %v740_v4 = vadd.f32 %v7711_v18, %v701_v56 }
 0x149   : > { %v5960_v27 = vcombine.low %v1751_v37, %v1761_v13  ;;  %v2222_v47 = vsel %vm7376_vm12, %v2220_v2, %v2221_v7  ;;  %v1766_v1 = vshll.u32 %v1585_v8, 16  ;;  %v738_v9 = vadd.f32 %v7711_v18, %v699_v14  ;;  %6605 = vmatpush3.bf16.msra.mxu0 %v6935_v35  ;;  %v2101_v8 = vld [vmem:[#allocation2 + $0x4c] sm:$0xf] }
 0x14a   : > { %v5992_v17 = vcombine.low %v2219_v21, %v2222_v47  ;;  %v1765_v3 = vrot.slane %v1763_v15, 4  ;;  %v1772_v25 = vshll.u32 %v1586_v12, 16  ;;  %v772_v28 = vmax.f32 %v740_v4, 0.0  ;;  %6606 = vmatprep.subr.bf16.mxu0 %v6936_v44  ;;  %v1388_v15 = vld [vmem:[#allocation2 + $0x90] sm:$0xf] }
 0x14b   : > { %5054 = vmatprep.mubr.bf16.mxu1 %v5960_v27  ;;  %v1768_v51 = vrot.slane %v1766_v1, 5  ;;  %v1776_v29 = vshrl.u32 %v1586_v12, 16  ;;  %v1782_v34 = vshll.u32 %v1587_v11, 16  ;;  %v770_v40 = vmax.f32 %v738_v9, 0.0  ;;  %v6940_v11 = vld [vmem:[%s8741_s6 + $0x1b8] sm:$0xff]  }
 0x14c   : > { %5216 = vmatmul.mubr.bf16.gmra.mrb[52].mxu0 %v5992_v17  ;;  %5055 = vmatmul.mubr.bf16.gmra.mrb[20].mxu1 %v6894_v53  ;;  %v1774_v41 = vrot.slane %v1772_v25, 5  ;;  %v702_v45 = vmul.f32 %v7691_v48, %v7549_v42  ;;  %v700_v6 = vmul.f32 %v7691_v48, %v7567_v38  ;;  %v6229_v46 = vpack.c.bf16 %v772_v28, %v772_v28  ;;  %v2102_v42 = vld [vmem:[#allocation2 + $0x50] sm:$0x1]  ;;  %v6939_v38 = vld [vmem:[%s8741_s6 + $0x1f8] sm:$0xff]   ;;  %v1381_v47 = vld [vmem:[#allocation2 + $0x84] sm:$0xf] }
 0x14d   : > { %v1769_v52 = vor.u32 %v1768_v51, %v1765_v3  ;;  %v1778_v49 = vrot.slane %v1776_v29, 4  ;;  %v1784_v54 = vrot.slane %v1782_v34, 5  ;;  %5223 = vmatprep.mubr.bf16.mxu0 %v6895_v60  ;;  %v6227_v57 = vpack.c.bf16 %v770_v40, %v770_v40  ;;  %6607 = vmatpush3.bf16.msra.mxu0 %v6938_v55  ;;  %v1588_v9 = vld [vmem:[#allocation2 + $0x54] sm:$0xf]  ;;  %v1589_v51 = vld [vmem:[#allocation2 + $0x58] sm:$0xf] }
 0x14e   : > { %v741_v58 = vadd.f32 %v7711_v18, %v702_v45  ;;  %v739_v59 = vadd.f32 %v7711_v18, %v700_v6  ;;  %v5977_v62 = vrot.slane %v2100_v32, 9  ;;  %v1177_v63 = vshrl.u32 %v6229_v46, 16  ;;  %6608 = vmatprep.subr.bf16.mxu0 %v6939_v38  ;;  %v6898_v45 = vld [vmem:[#allocation2 + $0x48] sm:$0xff]  }
 0x14f   : > { %v1180_v0 = vshll.u32 %v6229_v46, 16  ;;  %v1770_v21 = vrot.slane %v1769_v52, 4  ;;  %v1779_v2 = vor.u32 %v1778_v49, %v1774_v41  ;;  %v1160_v30 = vshrl.u32 %v6227_v57, 16  ;;  %v1392_v52 = vld [vmem:[#allocation2 + $0x98] sm:$0x1] }
 0x150   : > { %v1163_v5 = vshll.u32 %v6227_v57, 16  ;;  %v773_v7 = vmax.f32 %v741_v58, 0.0  ;;  %v771_v56 = vmax.f32 %v739_v59, 0.0  ;;  %v1179_v12 = vrot.slane %v1177_v63, 7  ;;  %v1385_v57 = vld [vmem:[#allocation2 + $0x8c] sm:$0x1] }
 0x151   : > { %v1775_v37 = vsel %vm7288_vm9, %v1770_v21, %v1774_v41  ;;  %v1780_v13 = vrot.slane %v1779_v2, 4  ;;  %v2225_v14 = vrot.slane %v2101_v8, 5  ;;  %v1162_v27 = vrot.slane %v1160_v30, 7  ;;  %6609 = vmatpush3.bf16.msra.mxu0 %v6940_v11  ;;  %v1590_v63 = vld [vmem:[#allocation2 + $0x5c] sm:$0x1] }
 0x152   : > { %v6230_v4 = vpack.c.bf16 %v773_v7, %v773_v7  ;;  %v6228_v1 = vpack.c.bf16 %v771_v56, %v771_v56  ;;  %v2228_v60 = vrot.slane %v2102_v42, 5  ;;  %v1182_v32 = vor.u32 %v1180_v0, %v1179_v12  ;;  %6768 = vmatprep.subr.bf16.mxu0 %v7698_v22  ;;  %v2103_v21 = vld [vmem:[#allocation2 + $0x54] sm:$0xe]  ;;  %v2104_v22 = vld [vmem:[#allocation2 + $0x58] sm:$0xf] }
 0x153   : > { %v1183_v35 = vrot.slane %v1179_v12, 4  ;;  %v1785_v17 = vsel %vm7288_vm9, %v1780_v13, %v1784_v54  ;;  %v2226_v53 = vsel %vm7376_vm12, %v5977_v62, %v2225_v14  ;;  %v1165_v3 = vor.u32 %v1163_v5, %v1162_v27  ;;  %v2105_v56 = vld [vmem:[#allocation2 + $0x5c] sm:$0x1]  ;;  %v6899_v13 = vld [vmem:[#allocation2 + $0x60] sm:$0xff]  }
 0x154   : > { %v1166_v25 = vrot.slane %v1162_v27, 4  ;;  %v5961_v44 = vcombine.low %v1775_v37, %v1785_v17  ;;  %v1185_v28 = vshrl.u32 %v6230_v4, 16  ;;  %v1389_v29 = vsel %vm7409_vm15, %v1182_v32, %v1388_v15 }
 0x155   : > { %v1188_v34 = vshll.u32 %v6230_v4, 16  ;;  %v1168_v40 = vshrl.u32 %v6228_v1, 16  ;;  %v1171_v41 = vshll.u32 %v6228_v1, 16  ;;  %1390 = vst [vmem:[#allocation2 + $0x90] sm:$0xf] %v1389_v29  ;;  %v1382_v6 = vsel %vm7409_vm15, %v1165_v3, %v1381_v47 }
 0x156   : > { %5062 = vmatprep.mubr.bf16.mxu1 %v5961_v44  ;;  %v1187_v46 = vrot.slane %v1185_v28, 7  ;;  %v2227_v49 = vrot.slane %v2225_v14, 4  ;;  %v1787_v54 = vshrl.u32 %v1588_v9, 16  ;;  %1383 = vst [vmem:[#allocation2 + $0x84] sm:$0xf] %v1382_v6  ;;  %v1790_v58 = vshll.u32 %v1588_v9, 16 }
 0x157   : > { %v1170_v55 = vrot.slane %v1168_v40, 7  ;;  %5063 = vmatmul.mubr.bf16.gmra.mrb[24].mxu1 %v6898_v45  ;;  %v1796_v59 = vshll.u32 %v1589_v51, 16  ;;  %v1800_v8 = vshrl.u32 %v1589_v51, 16  ;;  %v1806_v4 = vshll.u32 %v1590_v63, 16  ;;  %v1591_v1 = vld [vmem:[#allocation2 + $0x60] sm:$0xf] }
 0x158   : > { %v1190_v42 = vor.u32 %v1188_v34, %v1187_v46  ;;  %v1192_v62 = vrot.slane %v1187_v46, 4  ;;  %v2229_v38 = vsel %vm7376_vm12, %v2227_v49, %v2228_v60  ;;  %v1789_v0 = vrot.slane %v1787_v54, 4  ;;  %v1592_v44 = vld [vmem:[#allocation2 + $0x64] sm:$0xf]  ;;  %v1593_v6 = vld [vmem:[#allocation2 + $0x68] sm:$0x1] }
 0x159   : > { %v1173_v2 = vor.u32 %v1171_v41, %v1170_v55  ;;  %v1175_v30 = vrot.slane %v1170_v55, 4  ;;  %v5993_v5 = vcombine.low %v2226_v53, %v2229_v38  ;;  %v1792_v7 = vrot.slane %v1790_v58, 5  ;;  %v6903_v55 = vld [vmem:[#allocation2 + $0x6c] sm:$0xff]  }
 0x15a   : > { %v1191_v12 = vsel %vm7416_vm0, %v1183_v35, %v1190_v42  ;;  %v1393_v37 = vsel %vm7206_vm4, %v1192_v62, %v1392_v52  ;;  %v1798_v14 = vrot.slane %v1796_v59, 5  ;;  %v1802_v11 = vrot.slane %v1800_v8, 4  ;;  %v6902_v8 = vld [vmem:[#allocation2 + $0x54] sm:$0xff]  }
 0x15b   : > { %1391 = vst [vmem:[#allocation2 + $0x94] sm:$0xf] %v1191_v12  ;;  %1394 = vst [vmem:[#allocation2 + $0x98] sm:$0x1] %v1393_v37  ;;  %v1174_v15 = vsel %vm7416_vm0, %v1166_v25, %v1173_v2  ;;  %v1386_v27 = vsel %vm7206_vm4, %v1175_v30, %v1385_v57  ;;  %5224 = vmatmul.mubr.bf16.gmra.mrb[56].mxu0 %v5993_v5  ;;  %v1793_v47 = vor.u32 %v1792_v7, %v1789_v0  ;;  %v2107_v37 = vld [vmem:[#allocation2 + $0x64] sm:$0xf] }
 0x15c   : > { %1384 = vst [vmem:[#allocation2 + $0x88] sm:$0xf] %v1174_v15  ;;  %1387 = vst [vmem:[#allocation2 + $0x8c] sm:$0x1] %v1386_v27  ;;  %5231 = vmatprep.mubr.bf16.mxu0 %v6899_v13  ;;  %v1803_v60 = vor.u32 %v1802_v11, %v1798_v14  ;;  %v5978_v32 = vrot.slane %v2103_v21, 9  ;;  %v2232_v35 = vrot.slane %v2104_v22, 5  ;;  %v705_v3 = vmul.f32 %v7691_v48, %v7579_v16 }
 0x15d   : > { %v2235_v17 = vrot.slane %v2105_v56, 5  ;;  %v1794_v53 = vrot.slane %v1793_v47, 4  ;;  %v1808_v9 = vrot.slane %v1806_v4, 5  ;;  %v703_v25 = vmul.f32 %v7691_v48, %v7585_v20  ;;  %v2106_v16 = vld [vmem:[#allocation2 + $0x60] sm:$0xe] }
 0x15e   : > { %v1804_v28 = vrot.slane %v1803_v60, 4  ;;  %v2233_v51 = vsel %vm7376_vm12, %v5978_v32, %v2232_v35  ;;  %v2234_v29 = vrot.slane %v2232_v35, 4  ;;  %v1811_v34 = vshrl.u32 %v1591_v1, 16  ;;  %v2108_v13 = vld [vmem:[#allocation2 + $0x68] sm:$0x1] }
 0x15f   : > { %v1799_v40 = vsel %vm7288_vm9, %v1794_v53, %v1798_v14  ;;  %v744_v41 = vadd.f32 %v7711_v18, %v705_v3  ;;  %v742_v45 = vadd.f32 %v7711_v18, %v703_v25  ;;  %v1814_v46 = vshll.u32 %v1591_v1, 16  ;;  %v1402_v32 = vld [vmem:[#allocation2 + $0xa8] sm:$0xf] }
 0x160   : > { %v1809_v20 = vsel %vm7288_vm9, %v1804_v28, %v1808_v9  ;;  %v2236_v52 = vsel %vm7376_vm12, %v2234_v29, %v2235_v17  ;;  %v1813_v49 = vrot.slane %v1811_v34, 4  ;;  %v1820_v54 = vshll.u32 %v1592_v44, 16 }
 0x161   : > { %v5962_v57 = vcombine.low %v1799_v40, %v1809_v20  ;;  %v5994_v58 = vcombine.low %v2233_v51, %v2236_v52  ;;  %v776_v59 = vmax.f32 %v744_v41, 0.0  ;;  %v774_v42 = vmax.f32 %v742_v45, 0.0 }
 0x162   : > { %v1816_v62 = vrot.slane %v1814_v46, 5  ;;  %v1822_v38 = vrot.slane %v1820_v54, 5  ;;  %v1824_v63 = vshrl.u32 %v1592_v44, 16  ;;  %v1830_v0 = vshll.u32 %v1593_v6, 16  ;;  %v1594_v46 = vld [vmem:[#allocation2 + $0x6c] sm:$0xf] }
 0x163   : > { %5070 = vmatprep.mubr.bf16.mxu1 %v5962_v57  ;;  %5232 = vmatmul.mubr.bf16.gmra.mrb[60].mxu0 %v5994_v58  ;;  %v6233_v21 = vpack.c.bf16 %v776_v59, %v776_v59  ;;  %v6231_v2 = vpack.c.bf16 %v774_v42, %v774_v42  ;;  %v706_v30 = vmul.f32 %v7691_v48, %v7592_v26  ;;  %v5979_v5 = vrot.slane %v2106_v16, 9  ;;  %v1595_v16 = vld [vmem:[#allocation2 + $0x70] sm:$0xf]  ;;  %v1596_v42 = vld [vmem:[#allocation2 + $0x74] sm:$0x1] }
 0x164   : > { %5071 = vmatmul.mubr.bf16.gmra.mrb[28].mxu1 %v6902_v8  ;;  %v1817_v7 = vor.u32 %v1816_v62, %v1813_v49  ;;  %v1826_v22 = vrot.slane %v1824_v63, 4  ;;  %v1832_v56 = vrot.slane %v1830_v0, 5  ;;  %5239 = vmatprep.mubr.bf16.mxu0 %v6903_v55  ;;  %v704_v12 = vmul.f32 %v7691_v48, %v7598_v31  ;;  %v1395_v31 = vld [vmem:[#allocation2 + $0x9c] sm:$0xf]  ;;  %v6906_v55 = vld [vmem:[#allocation2 + $0x60] sm:$0xff]  }
 0x165   : > { %v1211_v14 = vshrl.u32 %v6233_v21, 16  ;;  %v1214_v11 = vshll.u32 %v6233_v21, 16  ;;  %v1194_v15 = vshrl.u32 %v6231_v2, 16  ;;  %v1197_v27 = vshll.u32 %v6231_v2, 16  ;;  %v1406_v62 = vld [vmem:[#allocation2 + $0xb0] sm:$0x1] }
 0x166   : > { %v1818_v47 = vrot.slane %v1817_v7, 4  ;;  %v1827_v4 = vor.u32 %v1826_v22, %v1822_v38  ;;  %v745_v1 = vadd.f32 %v7711_v18, %v706_v30  ;;  %v743_v26 = vadd.f32 %v7711_v18, %v704_v12  ;;  %v2109_v30 = vld [vmem:[#allocation2 + $0x6c] sm:$0xe] }
 0x167   : > { %v7778_v60 = vrot.slane %v1211_v14, 7  ;;  %v7780_v35 = vrot.slane %v1194_v15, 7  ;;  %v2239_v17 = vrot.slane %v2107_v37, 5  ;;  %v2242_v53 = vrot.slane %v2108_v13, 5  ;;  %v854_v15 = vld [vmem:[#allocation2 + $0xc0] sm:$0x1] }
 0x168   : > { %v1823_v9 = vsel %vm7288_vm9, %v1818_v47, %v1822_v38  ;;  %v1828_v3 = vrot.slane %v1827_v4, 4  ;;  %v777_v25 = vmax.f32 %v745_v1, 0.0  ;;  %v775_v44 = vmax.f32 %v743_v26, 0.0  ;;  %v1399_v38 = vld [vmem:[#allocation2 + $0xa4] sm:$0x1] }
 0x169   : > { %v1216_v28 = vor.u32 %v1214_v11, %v7778_v60  ;;  %v1217_v51 = vrot.slane %v7778_v60, 4  ;;  %v1199_v29 = vor.u32 %v1197_v27, %v7780_v35  ;;  %v1200_v34 = vrot.slane %v7780_v35, 4  ;;  %v2110_v26 = vld [vmem:[#allocation2 + $0x70] sm:$0xf]  ;;  %v2111_v60 = vld [vmem:[#allocation2 + $0x74] sm:$0x1] }
 0x16a   : > { %v1833_v40 = vsel %vm7288_vm9, %v1828_v3, %v1832_v56  ;;  %v6234_v41 = vpack.c.bf16 %v777_v25, %v777_v25  ;;  %v6232_v45 = vpack.c.bf16 %v775_v44, %v775_v44  ;;  %v2240_v6 = vsel %vm7376_vm12, %v5979_v5, %v2239_v17  ;;  %v6907_v56 = vld [vmem:[#allocation2 + $0x78] sm:$0xff]  }
 0x16b   : > { %v1403_v20 = vsel %vm7409_vm15, %v1216_v28, %v1402_v32  ;;  %v1396_v52 = vsel %vm7409_vm15, %v1199_v29, %v1395_v31  ;;  %v5963_v49 = vcombine.low %v1823_v9, %v1833_v40  ;;  %v2241_v54 = vrot.slane %v2239_v17, 4  ;;  %v851_v31 = vld [vmem:[#allocation2 + $0xb4] sm:$0x1]  ;;  %v1597_v28 = vld [vmem:[#allocation2 + $0x78] sm:$0xf] }
 0x16c   : > { %1404 = vst [vmem:[#allocation2 + $0xa8] sm:$0xf] %v1403_v20  ;;  %1397 = vst [vmem:[#allocation2 + $0x9c] sm:$0xf] %v1396_v52  ;;  %v1219_v57 = vshrl.u32 %v6234_v41, 16  ;;  %v1222_v58 = vshll.u32 %v6234_v41, 16 }
 0x16d   : > { %v1202_v59 = vshrl.u32 %v6232_v45, 16  ;;  %v1205_v8 = vshll.u32 %v6232_v45, 16  ;;  %5078 = vmatprep.mubr.bf16.mxu1 %v5963_v49  ;;  %v2243_v63 = vsel %vm7376_vm12, %v2241_v54, %v2242_v53  ;;  %v1835_v0 = vshrl.u32 %v1594_v46, 16 }
 0x16e   : > { %v1838_v21 = vshll.u32 %v1594_v46, 16  ;;  %v1844_v2 = vshll.u32 %v1595_v16, 16  ;;  %v1221_v5 = vrot.slane %v1219_v57, 7  ;;  %v5995_v22 = vcombine.low %v2240_v6, %v2243_v63  ;;  %5079 = vmatmul.mubr.bf16.gmra.mrb[32].mxu1 %v6906_v55  ;;  %v1599_v57 = vld [vmem:[#allocation2 + $0x80] sm:$0x1] }
 0x16f   : > { %v1204_v7 = vrot.slane %v1202_v59, 7  ;;  %v1848_v12 = vshrl.u32 %v1595_v16, 16  ;;  %v1837_v37 = vrot.slane %v1835_v0, 4  ;;  %v1854_v11 = vshll.u32 %v1596_v42, 16  ;;  %v1598_v16 = vld [vmem:[#allocation2 + $0x7c] sm:$0xf] }
 0x170   : > { %v1840_v13 = vrot.slane %v1838_v21, 5  ;;  %v1846_v14 = vrot.slane %v1844_v2, 5  ;;  %v1224_v27 = vor.u32 %v1222_v58, %v1221_v5  ;;  %v1226_v47 = vrot.slane %v1221_v5, 4  ;;  %5240 = vmatmul.mubr.bf16.gmra.mrb[64].mxu0 %v5995_v22  ;;  %v6910_v2 = vld [vmem:[#allocation2 + $0x6c] sm:$0xff]   ;;  %v904_v5 = vld [vmem:[#allocation2 + $0xc8] sm:$0x1] }
 0x171   : > { %v1207_v4 = vor.u32 %v1205_v8, %v1204_v7  ;;  %v1209_v1 = vrot.slane %v1204_v7, 4  ;;  %5247 = vmatprep.mubr.bf16.mxu0 %v6907_v56  ;;  %v1850_v35 = vrot.slane %v1848_v12, 4  ;;  %v1856_v17 = vrot.slane %v1854_v11, 5 }
 0x172   : > { %v1841_v32 = vor.u32 %v1840_v13, %v1837_v37  ;;  %v5980_v53 = vrot.slane %v2109_v30, 9  ;;  %v1225_v9 = vsel %vm7416_vm0, %v1217_v51, %v1224_v27  ;;  %v1407_v3 = vsel %vm7206_vm4, %v1226_v47, %v1406_v62 }
 0x173   : > { %v1208_v25 = vsel %vm7416_vm0, %v1200_v34, %v1207_v4  ;;  %v1400_v44 = vsel %vm7206_vm4, %v1209_v1, %v1399_v38  ;;  %1405 = vst [vmem:[#allocation2 + $0xac] sm:$0xf] %v1225_v9  ;;  %1408 = vst [vmem:[#allocation2 + $0xb0] sm:$0x1] %v1407_v3  ;;  %v1851_v40 = vor.u32 %v1850_v35, %v1846_v14  ;;  %v2246_v41 = vrot.slane %v2110_v26, 5  ;;  %v6911_v38 = vld [vmem:[#allocation2 + $0x84] sm:$0xff]  }
 0x174   : > { %1398 = vst [vmem:[#allocation2 + $0xa0] sm:$0xf] %v1208_v25  ;;  %1401 = vst [vmem:[#allocation2 + $0xa4] sm:$0x1] %v1400_v44  ;;  %v1842_v29 = vrot.slane %v1841_v32, 4  ;;  %v2249_v45 = vrot.slane %v2111_v60, 5  ;;  %v709_v51 = vmul.f32 %v7691_v48, %v7602_v43  ;;  %v707_v34 = vmul.f32 %v7691_v48, %v7606_v61 }
 0x175   : > { %v855_v6 = vsel %vm7206_vm4, 0, %v854_v15  ;;  %v852_v46 = vsel %vm7206_vm4, 0, %v851_v31  ;;  %v1852_v52 = vrot.slane %v1851_v40, 4  ;;  %v2247_v49 = vsel %vm7376_vm12, %v5980_v53, %v2246_v41  ;;  %v901_v1 = vld [vmem:[#allocation2 + $0xbc] sm:$0x1] }
 0x176   : > { %v1847_v20 = vsel %vm7288_vm9, %v1842_v29, %v1846_v14  ;;  %v2248_v54 = vrot.slane %v2246_v41, 4  ;;  %856 = vst [vmem:[#allocation2 + $0xc0] sm:$0x1] %v855_v6  ;;  %853 = vst [vmem:[#allocation2 + $0xb4] sm:$0x1] %v852_v46  ;;  %v748_v43 = vadd.f32 %v7711_v18, %v709_v51  ;;  %v746_v55 = vadd.f32 %v7711_v18, %v707_v34 }
 0x177   : > { %v1859_v61 = vshrl.u32 %v1597_v28, 16  ;;  %v1862_v58 = vshll.u32 %v1597_v28, 16  ;;  %v1857_v59 = vsel %vm7288_vm9, %v1852_v52, %v1856_v17  ;;  %v1868_v42 = vshll.u32 %v1598_v16, 16  ;;  %v2112_v26 = vld [vmem:[#allocation2 + $0x78] sm:$0xe] }
 0x178   : > { %v2250_v8 = vsel %vm7376_vm12, %v2248_v54, %v2249_v45  ;;  %v1872_v62 = vshrl.u32 %v1598_v16, 16  ;;  %v5964_v63 = vcombine.low %v1847_v20, %v1857_v59  ;;  %v780_v21 = vmax.f32 %v748_v43, 0.0  ;;  %v2113_v53 = vld [vmem:[#allocation2 + $0x7c] sm:$0xf]  ;;  %v2114_v25 = vld [vmem:[#allocation2 + $0x80] sm:$0x1] }
 0x179   : > { %v5996_v0 = vcombine.low %v2247_v49, %v2250_v8  ;;  %v778_v30 = vmax.f32 %v746_v55, 0.0  ;;  %v1861_v7 = vrot.slane %v1859_v61, 4  ;;  %v1864_v22 = vrot.slane %v1862_v58, 5  ;;  %v1600_v44 = vld [vmem:[#allocation2 + $0x84] sm:$0xf]  ;;  %v6914_v43 = vld [vmem:[#allocation2 + $0x78] sm:$0xff]  }
 0x17a   : > { %v1870_v56 = vrot.slane %v1868_v42, 5  ;;  %v1874_v12 = vrot.slane %v1872_v62, 4  ;;  %5086 = vmatprep.mubr.bf16.mxu1 %v5964_v63  ;;  %v6237_v37 = vpack.c.bf16 %v780_v21, %v780_v21  ;;  %v1878_v14 = vshll.u32 %v1599_v57, 16  ;;  %v1601_v55 = vld [vmem:[#allocation2 + $0x88] sm:$0xf] }
 0x17b   : > { %5248 = vmatmul.mubr.bf16.gmra.mrb[68].mxu0 %v5996_v0  ;;  %v6235_v13 = vpack.c.bf16 %v778_v30, %v778_v30  ;;  %v710_v11 = vmul.f32 %v7691_v48, %v7631_v50  ;;  %5087 = vmatmul.mubr.bf16.gmra.mrb[36].mxu1 %v6910_v2  ;;  %v1865_v15 = vor.u32 %v1864_v22, %v1861_v7  ;;  %v905_v47 = vsel %vm7213_vm6, 0, %v904_v5  ;;  %v1602_v63 = vld [vmem:[#allocation2 + $0x8c] sm:$0x1]  ;;  %v1606_v23 = vld [vmem:[#allocation2 + $0x9c] sm:$0xf] }
 0x17c   : > { %v1875_v27 = vor.u32 %v1874_v12, %v1870_v56  ;;  %5255 = vmatprep.mubr.bf16.mxu0 %v6911_v38  ;;  %v708_v4 = vmul.f32 %v7691_v48, %v7639_v19  ;;  %v1245_v60 = vshrl.u32 %v6237_v37, 16  ;;  %v1248_v32 = vshll.u32 %v6237_v37, 16  ;;  %906 = vst [vmem:[#allocation2 + $0xc8] sm:$0x1] %v905_v47 }
 0x17d   : > { %v1228_v35 = vshrl.u32 %v6235_v13, 16  ;;  %v1231_v17 = vshll.u32 %v6235_v13, 16  ;;  %v1866_v31 = vrot.slane %v1865_v15, 4  ;;  %v1880_v9 = vrot.slane %v1878_v14, 5  ;;  %v1416_v29 = vld [vmem:[#allocation2 + $0xc0] sm:$0xf] }
 0x17e   : > { %v1876_v50 = vrot.slane %v1875_v27, 4  ;;  %v749_v3 = vadd.f32 %v7711_v18, %v710_v11  ;;  %v7831_v28 = vrot.slane %v1245_v60, 7  ;;  %v747_v19 = vadd.f32 %v7711_v18, %v708_v4  ;;  %v1409_v41 = vld [vmem:[#allocation2 + $0xb4] sm:$0xf]  ;;  %v1603_v15 = vld [vmem:[#allocation2 + $0x90] sm:$0xf] }
 0x17f   : > { %v7833_v40 = vrot.slane %v1228_v35, 7  ;;  %v902_v48 = vsel %vm7213_vm6, 0, %v901_v1  ;;  %v1871_v45 = vsel %vm7288_vm9, %v1866_v31, %v1870_v56  ;;  %v5981_v34 = vrot.slane %v2112_v26, 9  ;;  %v2115_v56 = vld [vmem:[#allocation2 + $0x84] sm:$0xe]  ;;  %v6915_v35 = vld [vmem:[#allocation2 + $0x90] sm:$0xff]  }
 0x180   : > { %v1881_v51 = vsel %vm7288_vm9, %v1876_v50, %v1880_v9  ;;  %v781_v6 = vmax.f32 %v749_v3, 0.0  ;;  %903 = vst [vmem:[#allocation2 + $0xbc] sm:$0x1] %v902_v48  ;;  %v1250_v46 = vor.u32 %v1248_v32, %v7831_v28  ;;  %v1251_v16 = vrot.slane %v7831_v28, 4  ;;  %v2116_v26 = vld [vmem:[#allocation2 + $0x88] sm:$0xf] }
 0x181   : > { %v1233_v20 = vor.u32 %v1231_v17, %v7833_v40  ;;  %v1234_v18 = vrot.slane %v7833_v40, 4  ;;  %v5965_v39 = vcombine.low %v1871_v45, %v1881_v51  ;;  %v779_v49 = vmax.f32 %v747_v19, 0.0  ;;  %v2117_v60 = vld [vmem:[#allocation2 + $0x8c] sm:$0x1]  ;;  %v1604_v28 = vld [vmem:[#allocation2 + $0x94] sm:$0xf] }
 0x182   : > { %v6238_v52 = vpack.c.bf16 %v781_v6, %v781_v6  ;;  %v2253_v54 = vrot.slane %v2113_v53, 5  ;;  %v1417_v57 = vsel %vm7409_vm15, %v1250_v46, %v1416_v29  ;;  %v2256_v58 = vrot.slane %v2114_v25, 5  ;;  %v1605_v29 = vld [vmem:[#allocation2 + $0x98] sm:$0x1]  ;;  %v2118_v19 = vld [vmem:[#allocation2 + $0x90] sm:$0xe] }
 0x183   : > { %v1410_v61 = vsel %vm7409_vm15, %v1233_v20, %v1409_v41  ;;  %v1883_v59 = vshrl.u32 %v1600_v44, 16  ;;  %1418 = vst [vmem:[#allocation2 + $0xc0] sm:$0xf] %v1417_v57  ;;  %5094 = vmatprep.mubr.bf16.mxu1 %v5965_v39  ;;  %v6236_v62 = vpack.c.bf16 %v779_v49, %v779_v49  ;;  %v1886_v2 = vshll.u32 %v1600_v44, 16  ;;  %v1420_v12 = vld [vmem:[#allocation2 + $0xc8] sm:$0x1] }
 0x184   : > { %1411 = vst [vmem:[#allocation2 + $0xb4] sm:$0xf] %v1410_v61  ;;  %v1253_v8 = vshrl.u32 %v6238_v52, 16  ;;  %v1256_v42 = vshll.u32 %v6238_v52, 16  ;;  %v2254_v38 = vsel %vm7376_vm12, %v5981_v34, %v2253_v54  ;;  %v2255_v0 = vrot.slane %v2253_v54, 4  ;;  %5095 = vmatmul.mubr.bf16.gmra.mrb[40].mxu1 %v6914_v43  ;;  %v6919_v43 = vld [vmem:[#allocation2 + $0x9c] sm:$0xff]  }
 0x185   : > { %v1885_v21 = vrot.slane %v1883_v59, 4  ;;  %v1892_v30 = vshll.u32 %v1601_v55, 16  ;;  %v1236_v10 = vshrl.u32 %v6236_v62, 16  ;;  %v1239_v7 = vshll.u32 %v6236_v62, 16  ;;  %v2119_v20 = vld [vmem:[#allocation2 + $0x94] sm:$0xf] }
 0x186   : > { %v1255_v5 = vrot.slane %v1253_v8, 7  ;;  %v1896_v22 = vshrl.u32 %v1601_v55, 16  ;;  %v2257_v37 = vsel %vm7376_vm12, %v2255_v0, %v2256_v58  ;;  %v1888_v13 = vrot.slane %v1886_v2, 5  ;;  %v2120_v39 = vld [vmem:[#allocation2 + $0x98] sm:$0x1] }
 0x187   : > { %v1894_v14 = vrot.slane %v1892_v30, 5  ;;  %v1902_v11 = vshll.u32 %v1602_v63, 16  ;;  %v1238_v4 = vrot.slane %v1236_v10, 7  ;;  %v5997_v1 = vcombine.low %v2254_v38, %v2257_v37  ;;  %v1413_v32 = vld [vmem:[#allocation2 + $0xbc] sm:$0x1]  ;;  %v6918_v63 = vld [vmem:[#allocation2 + $0x84] sm:$0xff]  }
 0x188   : > { %v1258_v27 = vor.u32 %v1256_v42, %v1255_v5  ;;  %v1260_v47 = vrot.slane %v1255_v5, 4  ;;  %v1889_v17 = vor.u32 %v1888_v13, %v1885_v21  ;;  %v1898_v53 = vrot.slane %v1896_v22, 4  ;;  %v1607_v61 = vld [vmem:[#allocation2 + $0xa0] sm:$0xf]  ;;  %v2121_v22 = vld [vmem:[#allocation2 + $0x9c] sm:$0xe] }
 0x189   : > { %v1904_v31 = vrot.slane %v1902_v11, 5  ;;  %v5982_v50 = vrot.slane %v2115_v56, 9  ;;  %v1241_v25 = vor.u32 %v1239_v7, %v1238_v4  ;;  %v1243_v44 = vrot.slane %v1238_v4, 4  ;;  %5256 = vmatmul.mubr.bf16.gmra.mrb[72].mxu0 %v5997_v1  ;;  %v1608_v7 = vld [vmem:[#allocation2 + $0xa4] sm:$0x1] }
 0x18a   : > { %v1259_v9 = vsel %vm7416_vm0, %v1251_v16, %v1258_v27  ;;  %v1421_v3 = vsel %vm7206_vm4, %v1260_v47, %v1420_v12  ;;  %5263 = vmatprep.mubr.bf16.mxu0 %v6915_v35  ;;  %v1890_v48 = vrot.slane %v1889_v17, 4  ;;  %v1899_v41 = vor.u32 %v1898_v53, %v1894_v14  ;;  %v2122_v47 = vld [vmem:[#allocation2 + $0xa0] sm:$0xf]  ;;  %v2123_v4 = vld [vmem:[#allocation2 + $0xa4] sm:$0x1] }
 0x18b   : > { %1419 = vst [vmem:[#allocation2 + $0xc4] sm:$0xf] %v1259_v9  ;;  %1422 = vst [vmem:[#allocation2 + $0xc8] sm:$0x1] %v1421_v3  ;;  %v2260_v45 = vrot.slane %v2116_v26, 5  ;;  %v2263_v51 = vrot.slane %v2117_v60, 5  ;;  %v1242_v6 = vsel %vm7416_vm0, %v1234_v18, %v1241_v25  ;;  %v1414_v34 = vsel %vm7206_vm4, %v1243_v44, %v1413_v32 }
 0x18c   : > { %v1907_v46 = vshrl.u32 %v1603_v15, 16  ;;  %v1910_v16 = vshll.u32 %v1603_v15, 16  ;;  %1412 = vst [vmem:[#allocation2 + $0xb8] sm:$0xf] %v1242_v6  ;;  %1415 = vst [vmem:[#allocation2 + $0xbc] sm:$0x1] %v1414_v34  ;;  %v1895_v52 = vsel %vm7288_vm9, %v1890_v48, %v1894_v14 }
 0x18d   : > { %v1900_v49 = vrot.slane %v1899_v41, 4  ;;  %v2261_v54 = vsel %vm7376_vm12, %v5982_v50, %v2260_v45  ;;  %v2262_v40 = vrot.slane %v2260_v45, 4  ;;  %v1916_v36 = vshll.u32 %v1604_v28, 16  ;;  %v1609_v44 = vld [vmem:[#allocation2 + $0xa8] sm:$0xf]  ;;  %v6922_v6 = vld [vmem:[#allocation2 + $0x90] sm:$0xff]  }
 0x18e   : > { %v1909_v18 = vrot.slane %v1907_v46, 4  ;;  %v1912_v55 = vrot.slane %v1910_v16, 5  ;;  %v1920_v57 = vshrl.u32 %v1604_v28, 16  ;;  %v1926_v8 = vshll.u32 %v1605_v29, 16  ;;  %v1610_v28 = vld [vmem:[#allocation2 + $0xac] sm:$0xf] }
 0x18f   : > { %v1905_v58 = vsel %vm7288_vm9, %v1900_v49, %v1904_v31  ;;  %v2264_v59 = vsel %vm7376_vm12, %v2262_v40, %v2263_v51  ;;  %v5983_v42 = vrot.slane %v2118_v19, 9  ;;  %v1918_v21 = vrot.slane %v1916_v36, 5  ;;  %v1611_v45 = vld [vmem:[#allocation2 + $0xb0] sm:$0x1]  ;;  %v6923_v34 = vld [vmem:[#allocation2 + $0xa8] sm:$0xff]  }
 0x190   : > { %v5966_v62 = vcombine.low %v1895_v52, %v1905_v58  ;;  %v5998_v38 = vcombine.low %v2261_v54, %v2264_v59  ;;  %v1913_v0 = vor.u32 %v1912_v55, %v1909_v18  ;;  %v1922_v2 = vrot.slane %v1920_v57, 4  ;;  %v2125_v52 = vld [vmem:[#allocation2 + $0xac] sm:$0xf] }
 0x191   : > { %v1928_v30 = vrot.slane %v1926_v8, 5  ;;  %v2267_v5 = vrot.slane %v2119_v20, 5  ;;  %v2270_v10 = vrot.slane %v2120_v39, 5  ;;  %v1931_v12 = vshrl.u32 %v1606_v23, 16  ;;  %v2124_v39 = vld [vmem:[#allocation2 + $0xa8] sm:$0xe] }
 0x192   : > { %5102 = vmatprep.mubr.bf16.mxu1 %v5966_v62  ;;  %5264 = vmatmul.mubr.bf16.gmra.mrb[76].mxu0 %v5998_v38  ;;  %v1914_v56 = vrot.slane %v1913_v0, 4  ;;  %v1934_v37 = vshll.u32 %v1606_v23, 16  ;;  %v1940_v13 = vshll.u32 %v1607_v61, 16  ;;  %v1923_v14 = vor.u32 %v1922_v2, %v1918_v21  ;;  %v2126_v23 = vld [vmem:[#allocation2 + $0xb0] sm:$0x1] }
 0x193   : > { %5103 = vmatmul.mubr.bf16.gmra.mrb[44].mxu1 %v6918_v63  ;;  %5271 = vmatprep.mubr.bf16.mxu0 %v6919_v43  ;;  %v2268_v11 = vsel %vm7376_vm12, %v5983_v42, %v2267_v5  ;;  %v2269_v15 = vrot.slane %v2267_v5, 4  ;;  %v1944_v27 = vshrl.u32 %v1607_v61, 16  ;;  %v1933_v26 = vrot.slane %v1931_v12, 4  ;;  %v1612_v61 = vld [vmem:[#allocation2 + $0xb4] sm:$0xf] }
 0x194   : > { %v1919_v1 = vsel %vm7288_vm9, %v1914_v56, %v1918_v21  ;;  %v1936_v60 = vrot.slane %v1934_v37, 5  ;;  %v1942_v32 = vrot.slane %v1940_v13, 5  ;;  %v1924_v35 = vrot.slane %v1923_v14, 4  ;;  %v1613_v58 = vld [vmem:[#allocation2 + $0xb8] sm:$0xf]  ;;  %v7888_v13 = vpop.f32.mrb[0].mxu1 }
 0x195   : > { %v2271_v17 = vsel %vm7376_vm12, %v2269_v15, %v2270_v10  ;;  %v1946_v53 = vrot.slane %v1944_v27, 4  ;;  %v1950_v31 = vshll.u32 %v1608_v7, 16  ;;  %v5984_v3 = vrot.slane %v2121_v22, 9  ;;  %v1614_v22 = vld [vmem:[#allocation2 + $0xbc] sm:$0x1] }
 0x196   : > { %v5999_v50 = vcombine.low %v2268_v11, %v2271_v17  ;;  %v1937_v9 = vor.u32 %v1936_v60, %v1933_v26  ;;  %v2274_v25 = vrot.slane %v2122_v47, 5  ;;  %v1929_v29 = vsel %vm7288_vm9, %v1924_v35, %v1928_v30  ;;  %v6927_v11 = vld [vmem:[#allocation2 + $0xb4] sm:$0xff]  }
 0x197   : > { %v1947_v19 = vor.u32 %v1946_v53, %v1942_v32  ;;  %v1952_v48 = vrot.slane %v1950_v31, 5  ;;  %v2277_v41 = vrot.slane %v2123_v4, 5  ;;  %v5967_v51 = vcombine.low %v1919_v1, %v1929_v29  ;;  %v2127_v4 = vld [vmem:[#allocation2 + $0xb4] sm:$0xe]  ;;  %v3462_v1 = vld [vmem:[#allocation2 + $0x18] sm:$0xf] }
 0x198   : > { %v1938_v46 = vrot.slane %v1937_v9, 4  ;;  %v2275_v16 = vsel %vm7376_vm12, %v5984_v3, %v2274_v25  ;;  %v2276_v20 = vrot.slane %v2274_v25, 4  ;;  %v1955_v54 = vshrl.u32 %v1609_v44, 16  ;;  %v2128_v17 = vld [vmem:[#allocation2 + $0xb8] sm:$0xf]  ;;  %v6926_v53 = vld [vmem:[#allocation2 + $0x9c] sm:$0xff]  }
 0x199   : > { %v1948_v49 = vrot.slane %v1947_v19, 4  ;;  %v1958_v40 = vshll.u32 %v1609_v44, 16  ;;  %v1964_v43 = vshll.u32 %v1610_v28, 16  ;;  %5110 = vmatprep.mubr.bf16.mxu1 %v5967_v51  ;;  %v1968_v36 = vshrl.u32 %v1610_v28, 16  ;;  %v2129_v25 = vld [vmem:[#allocation2 + $0xbc] sm:$0x1] }
 0x19a   : > { %5272 = vmatmul.mubr.bf16.gmra.mrb[80].mxu0 %v5999_v50  ;;  %v1943_v18 = vsel %vm7288_vm9, %v1938_v46, %v1942_v32  ;;  %v2278_v55 = vsel %vm7376_vm12, %v2276_v20, %v2277_v41  ;;  %v1974_v57 = vshll.u32 %v1611_v45, 16  ;;  %v1957_v42 = vrot.slane %v1955_v54, 4  ;;  %v3464_v41 = vld [vmem:[#allocation2 + $0x20] sm:$0x1]  ;;  %v7901_v45 = vpop.f32.mrb[1].mxu1 }
 0x19b   : > { %5111 = vmatmul.mubr.bf16.gmra.mrb[48].mxu1 %v6922_v6  ;;  %5279 = vmatprep.mubr.bf16.mxu0 %v6923_v34  ;;  %v1953_v59 = vsel %vm7288_vm9, %v1948_v49, %v1952_v48  ;;  %v6000_v8 = vcombine.low %v2275_v16, %v2278_v55  ;;  %v1960_v62 = vrot.slane %v1958_v40, 5  ;;  %v1966_v63 = vrot.slane %v1964_v43, 5  ;;  %v3463_v48 = vld [vmem:[#allocation2 + $0x1c] sm:$0xf]  ;;  %v3029_v49 = vld [vmem:[#allocation2 + $0xc] sm:$0xe] }
 0x19c   : > { %v5968_v38 = vcombine.low %v1943_v18, %v1953_v59  ;;  %v1970_v0 = vrot.slane %v1968_v36, 4  ;;  %v1976_v21 = vrot.slane %v1974_v57, 5  ;;  %v5985_v30 = vrot.slane %v2124_v39, 9  ;;  %v3030_v18 = vld [vmem:[#allocation2 + $0x10] sm:$0xf]  ;;  %v7907_v55 = vpop.f32.mrb[2].mxu1 }
 0x19d   : > { %v1961_v2 = vor.u32 %v1960_v62, %v1957_v42  ;;  %v2281_v5 = vrot.slane %v2125_v52, 5  ;;  %v2284_v10 = vrot.slane %v2126_v23, 5  ;;  %v1979_v56 = vshrl.u32 %v1612_v61, 16  ;;  %v3031_v59 = vld [vmem:[#allocation2 + $0x14] sm:$0x1] }
 0x19e   : > { %5118 = vmatprep.mubr.bf16.mxu1 %v5968_v38  ;;  %v1971_v7 = vor.u32 %v1970_v0, %v1966_v63  ;;  %v1982_v12 = vshll.u32 %v1612_v61, 16  ;;  %v1988_v37 = vshll.u32 %v1613_v58, 16  ;;  %v1992_v47 = vshrl.u32 %v1613_v58, 16  ;;  %v2517_v0 = vld [vmem:[#allocation2 + $0xc] sm:$0xf] }
 0x19f   : > { %v1962_v14 = vrot.slane %v1961_v2, 4  ;;  %v7892_v15 = vsel %vm7376_vm12, %v5985_v30, %v2281_v5  ;;  %v2283_v27 = vrot.slane %v2281_v5, 4  ;;  %v1981_v60 = vrot.slane %v1979_v56, 4  ;;  %v6931_v56 = vld [vmem:[#allocation2 + $0xc0] sm:$0xff]  }
 0x1a0   : > { %v1972_v26 = vrot.slane %v1971_v7, 4  ;;  %v1984_v32 = vrot.slane %v1982_v12, 5  ;;  %v1990_v35 = vrot.slane %v1988_v37, 5  ;;  %v1994_v9 = vrot.slane %v1992_v47, 4  ;;  %v2519_v7 = vld [vmem:[#allocation2 + $0x14] sm:$0x1] }
 0x1a1   : > { %v1967_v31 = vsel %vm7288_vm9, %v1962_v14, %v1966_v63  ;;  %v2285_v50 = vsel %vm7376_vm12, %v2283_v27, %v2284_v10  ;;  %v1998_v3 = vshll.u32 %v1614_v22, 16  ;;  %v5986_v19 = vrot.slane %v2127_v4, 9  ;;  %v2518_v10 = vld [vmem:[#allocation2 + $0x10] sm:$0xf]  ;;  %v6930_v22 = vld [vmem:[#allocation2 + $0xa8] sm:$0xff]  }
 0x1a2   : > { %5280 = vmatmul.mubr.bf16.gmra.mrb[84].mxu0 %v6000_v8  ;;  %v1977_v44 = vsel %vm7288_vm9, %v1972_v26, %v1976_v21  ;;  %v6001_v28 = vcombine.low %v7892_v15, %v2285_v50  ;;  %v1985_v29 = vor.u32 %v1984_v32, %v1981_v60  ;;  %v1995_v6 = vor.u32 %v1994_v9, %v1990_v35  ;;  %v7911_v8 = vpop.f32.mrb[3].mxu1 }
 0x1a3   : > { %5119 = vmatmul.mubr.bf16.gmra.mrb[52].mxu1 %v6926_v53  ;;  %v5969_v51 = vcombine.low %v1967_v31, %v1977_v44  ;;  %5287 = vmatprep.mubr.bf16.mxu0 %v6927_v11  ;;  %v2000_v34 = vrot.slane %v1998_v3, 5  ;;  %v2288_v46 = vrot.slane %v2128_v17, 5  ;;  %v2291_v20 = vrot.slane %v2129_v25, 5 }
 0x1a4   : > { %v1986_v16 = vrot.slane %v1985_v29, 4  ;;  %v3511_v39 = vshrl.u32 %v3462_v1, 16  ;;  %v3514_v52 = vshll.u32 %v3462_v1, 16  ;;  %v1996_v54 = vrot.slane %v1995_v6, 4  ;;  %v3465_v1 = vld [vmem:[#allocation2 + $0x24] sm:$0xf] }
 0x1a5   : > { %5126 = vmatprep.mubr.bf16.mxu1 %v5969_v51  ;;  %v7905_v40 = vsel %vm7376_vm12, %v5986_v19, %v2288_v46  ;;  %v2290_v43 = vrot.slane %v2288_v46, 4  ;;  %v3520_v23 = vshll.u32 %v3463_v48, 16  ;;  %v3524_v58 = vshrl.u32 %v3463_v48, 16  ;;  %v3032_v6 = vld [vmem:[#allocation2 + $0x18] sm:$0xe] }
 0x1a6   : > { %v1991_v36 = vsel %vm7288_vm9, %v1986_v16, %v1990_v35  ;;  %v3513_v57 = vrot.slane %v3511_v39, 4  ;;  %v3516_v61 = vrot.slane %v3514_v52, 5  ;;  %v2001_v42 = vsel %vm7288_vm9, %v1996_v54, %v2000_v34  ;;  %v3033_v39 = vld [vmem:[#allocation2 + $0x1c] sm:$0xf]  ;;  %v3034_v52 = vld [vmem:[#allocation2 + $0x20] sm:$0x1] }
 0x1a7   : > { %v2292_v62 = vsel %vm7376_vm12, %v2290_v43, %v2291_v20  ;;  %v3522_v38 = vrot.slane %v3520_v23, 5  ;;  %v3530_v63 = vshll.u32 %v3464_v41, 16  ;;  %v5970_v21 = vcombine.low %v1991_v36, %v2001_v42  ;;  %v3467_v41 = vld [vmem:[#allocation2 + $0x2c] sm:$0x1]  ;;  %v2520_v23 = vld [vmem:[#allocation2 + $0x18] sm:$0xf] }
 0x1a8   : > { %v6002_v2 = vcombine.low %v7905_v40, %v2292_v62  ;;  %v3517_v30 = vor.u32 %v3516_v61, %v3513_v57  ;;  %v3526_v5 = vrot.slane %v3524_v58, 4  ;;  %v6035_v37 = vrot.slane %v3029_v49, 9 }
 0x1a9   : > { %v3532_v12 = vrot.slane %v3530_v63, 5  ;;  %v3127_v14 = vrot.slane %v3030_v18, 5  ;;  %v3130_v11 = vrot.slane %v3031_v59, 5  ;;  %v2566_v47 = vshrl.u32 %v2517_v0, 16  ;;  %v6937_v18 = vld [vmem:[#allocation2 + $0xb4] sm:$0xff]  }
 0x1aa   : > { %5288 = vmatmul.mubr.bf16.gmra.mrb[88].mxu0 %v6001_v28  ;;  %v3518_v15 = vrot.slane %v3517_v30, 4  ;;  %v3527_v27 = vor.u32 %v3526_v5, %v3522_v38  ;;  %v2569_v4 = vshll.u32 %v2517_v0, 16  ;;  %v2575_v32 = vshll.u32 %v2518_v10, 16  ;;  %v3466_v28 = vld [vmem:[#allocation2 + $0x28] sm:$0xf] }
 0x1ab   : > { %5127 = vmatmul.mubr.bf16.gmra.mrb[56].mxu1 %v6930_v22  ;;  %5295 = vmatprep.mubr.bf16.mxu0 %v6931_v56  ;;  %v3128_v26 = vsel %vm7376_vm12, %v6035_v37, %v3127_v14  ;;  %v3129_v60 = vrot.slane %v3127_v14, 4  ;;  %v2579_v35 = vshrl.u32 %v2518_v10, 16  ;;  %v2568_v31 = vrot.slane %v2566_v47, 4  ;;  %v2521_v63 = vld [vmem:[#allocation2 + $0x1c] sm:$0xf] }
 0x1ac   : > { %5134 = vmatprep.mubr.bf16.mxu1 %v5970_v21  ;;  %v3523_v17 = vsel %vm7288_vm9, %v3518_v15, %v3522_v38  ;;  %v3528_v53 = vrot.slane %v3527_v27, 4  ;;  %v2571_v50 = vrot.slane %v2569_v4, 5  ;;  %v2577_v3 = vrot.slane %v2575_v32, 5  ;;  %v2522_v10 = vld [vmem:[#allocation2 + $0x20] sm:$0x1] }
 0x1ad   : > { %v3131_v9 = vsel %vm7376_vm12, %v3129_v60, %v3130_v11  ;;  %v2581_v25 = vrot.slane %v2579_v35, 4  ;;  %v2585_v44 = vshll.u32 %v2519_v7, 16  ;;  %v3535_v51 = vshrl.u32 %v3465_v1, 16 }
 0x1ae   : > { %v3533_v29 = vsel %vm7288_vm9, %v3528_v53, %v3532_v12  ;;  %v6051_v19 = vcombine.low %v3128_v26, %v3131_v9  ;;  %v2572_v48 = vor.u32 %v2571_v50, %v2568_v31  ;;  %v3538_v20 = vshll.u32 %v3465_v1, 16  ;;  %v3468_v1 = vld [vmem:[#allocation2 + $0x30] sm:$0xf]  ;;  %v3470_v53 = vld [vmem:[#allocation2 + $0x38] sm:$0x1] }
 0x1af   : > { %v6083_v34 = vcombine.low %v3523_v17, %v3533_v29  ;;  %v2582_v46 = vor.u32 %v2581_v25, %v2577_v3  ;;  %v2587_v16 = vrot.slane %v2585_v44, 5  ;;  %v3537_v54 = vrot.slane %v3535_v51, 4  ;;  %v3469_v17 = vld [vmem:[#allocation2 + $0x34] sm:$0xf]  ;;  %v6941_v31 = vld [vmem:[#allocation2 + $0x18] sm:$0xff]  }
 0x1b0   : > { %v2573_v49 = vrot.slane %v2572_v48, 4  ;;  %v3544_v40 = vshll.u32 %v3466_v28, 16  ;;  %v3548_v43 = vshrl.u32 %v3466_v28, 16  ;;  %v3540_v57 = vrot.slane %v3538_v20, 5  ;;  %v3035_v44 = vld [vmem:[#allocation2 + $0x24] sm:$0xe] }
 0x1b1   : > { %v2583_v36 = vrot.slane %v2582_v46, 4  ;;  %v3554_v61 = vshll.u32 %v3467_v41, 16  ;;  %v6036_v58 = vrot.slane %v3032_v6, 9  ;;  %v3134_v38 = vrot.slane %v3033_v39, 5  ;;  %v3036_v41 = vld [vmem:[#allocation2 + $0x28] sm:$0xf] }
 0x1b2   : > { %5296 = vmatmul.mubr.bf16.gmra.mrb[92].mxu0 %v6002_v2  ;;  %v2578_v59 = vsel %vm7288_vm9, %v2573_v49, %v2577_v3  ;;  %v3546_v42 = vrot.slane %v3544_v40, 5  ;;  %v3550_v62 = vrot.slane %v3548_v43, 4  ;;  %v3541_v21 = vor.u32 %v3540_v57, %v3537_v54  ;;  %v3037_v51 = vld [vmem:[#allocation2 + $0x2c] sm:$0x1]  ;;  %v2523_v39 = vld [vmem:[#allocation2 + $0x24] sm:$0xf] }
 0x1b3   : > { %5135 = vmatmul.mubr.bf16.gmra.mrb[60].mxu1 %v6937_v18  ;;  %5497 = vmatprep.mubr.bf16.mxu0 %v6083_v34  ;;  %v2588_v0 = vsel %vm7288_vm9, %v2583_v36, %v2587_v16  ;;  %v3556_v30 = vrot.slane %v3554_v61, 5  ;;  %v3137_v5 = vrot.slane %v3034_v52, 5  ;;  %v3135_v2 = vsel %vm7376_vm12, %v6036_v58, %v3134_v38  ;;  %v6945_v20 = vld [vmem:[%s8741_s6 + $0x208] sm:$0xff]   ;;  %v6967_v43 = vld [vmem:[%s8741_s6 + $0x200] sm:$0xff]  }
 0x1b4   : > { %5336 = vmatprep.mubr.bf16.mxu1 %v6051_v19  ;;  %v6019_v7 = vcombine.low %v2578_v59, %v2588_v0  ;;  %v3551_v22 = vor.u32 %v3550_v62, %v3546_v42  ;;  %v3136_v56 = vrot.slane %v3134_v38, 4  ;;  %v3542_v12 = vrot.slane %v3541_v21, 4  ;;  %v2524_v62 = vld [vmem:[#allocation2 + $0x28] sm:$0xf]  ;;  %v2525_v0 = vld [vmem:[#allocation2 + $0x2c] sm:$0x1] }
 0x1b5   : > { %v2590_v37 = vshrl.u32 %v2520_v23, 16  ;;  %v2593_v14 = vshll.u32 %v2520_v23, 16  ;;  %v2599_v11 = vshll.u32 %v2521_v63, 16  ;;  %v2603_v47 = vshrl.u32 %v2521_v63, 16 }
 0x1b6   : > { %v3552_v15 = vrot.slane %v3551_v22, 4  ;;  %v3138_v27 = vsel %vm7376_vm12, %v3136_v56, %v3137_v5  ;;  %v2609_v4 = vshll.u32 %v2522_v10, 16  ;;  %v3547_v26 = vsel %vm7288_vm9, %v3542_v12, %v3546_v42  ;;  %v6948_v5 = vld [vmem:[%s8741_s6 + $0x210] sm:$0xff]   ;;  %v6943_v10 = vld [vmem:[#allocation2 + $0x24] sm:$0xff]   ;;  %v3471_v12 = vld [vmem:[#allocation2 + $0x3c] sm:$0xf] }
 0x1b7   : > { %v6052_v60 = vcombine.low %v3135_v2, %v3138_v27  ;;  %v2592_v32 = vrot.slane %v2590_v37, 4  ;;  %v2595_v35 = vrot.slane %v2593_v14, 5  ;;  %v2601_v9 = vrot.slane %v2599_v11, 5  ;;  %v3472_v27 = vld [vmem:[#allocation2 + $0x40] sm:$0xf] }
 0x1b8   : > { %v3557_v50 = vsel %vm7288_vm9, %v3552_v15, %v3556_v30  ;;  %v2605_v3 = vrot.slane %v2603_v47, 4  ;;  %v2611_v25 = vrot.slane %v2609_v4, 5  ;;  %v3559_v19 = vshrl.u32 %v3468_v1, 16 }
 0x1b9   : > { %v6084_v28 = vcombine.low %v3547_v26, %v3557_v50  ;;  %v2596_v29 = vor.u32 %v2595_v35, %v2592_v32  ;;  %v3562_v48 = vshll.u32 %v3468_v1, 16  ;;  %v3568_v34 = vshll.u32 %v3469_v17, 16  ;;  %v3038_v32 = vld [vmem:[#allocation2 + $0x30] sm:$0xe] }
 0x1ba   : > { %5498 = vmatmul.mubr.bf16.vlgmr.msra.gmra.mrb[96].mxu0 %v6941_v31  ;;  %v2606_v6 = vor.u32 %v2605_v3, %v2601_v9  ;;  %v3572_v46 = vshrl.u32 %v3469_v17, 16  ;;  %v3578_v16 = vshll.u32 %v3470_v53, 16  ;;  %v3561_v49 = vrot.slane %v3559_v19, 4 }
 0x1bb   : > { %5337 = vmatmul.mubr.bf16.vlgmr.msra.gmra.mrb[64].mxu1 %v6019_v7  ;;  %5505 = vmatprep.mubr.bf16.mxu0 %v6084_v28  ;;  %v2597_v52 = vrot.slane %v2596_v29, 4  ;;  %v3564_v54 = vrot.slane %v3562_v48, 5  ;;  %v6037_v40 = vrot.slane %v3035_v44, 9  ;;  %v3570_v18 = vrot.slane %v3568_v34, 5  ;;  %v3039_v44 = vld [vmem:[#allocation2 + $0x34] sm:$0xf] }
 0x1bc   : > { %6824 = vmatpush3.bf16.msra.mxu1 %v6967_v43  ;;  %5344 = vmatprep.mubr.bf16.mxu1 %v6052_v60  ;;  %v2607_v23 = vrot.slane %v2606_v6, 4  ;;  %v3574_v36 = vrot.slane %v3572_v46, 4  ;;  %v3580_v57 = vrot.slane %v3578_v16, 5  ;;  %v3141_v59 = vrot.slane %v3036_v41, 5  ;;  %v3473_v60 = vld [vmem:[#allocation2 + $0x44] sm:$0x1] }
 0x1bd   : > { %v2602_v61 = vsel %vm7288_vm9, %v2597_v52, %v2601_v9  ;;  %v3565_v58 = vor.u32 %v3564_v54, %v3561_v49  ;;  %v3144_v42 = vrot.slane %v3037_v51, 5  ;;  %6817 = vmatprep.subr.bf16.mxu1 %v6945_v20  ;;  %6769 = vmatpush3.bf16.msra.mxu0 %v6967_v43  ;;  %v2614_v21 = vshrl.u32 %v2523_v39, 16  ;;  %v6951_v28 = vld [vmem:[%s8741_s6 + $0x218] sm:$0xff]  }
 0x1be   : > { %v2612_v38 = vsel %vm7288_vm9, %v2607_v23, %v2611_v25  ;;  %v3575_v63 = vor.u32 %v3574_v36, %v3570_v18  ;;  %v2617_v30 = vshll.u32 %v2523_v39, 16  ;;  %6770 = vmatprep.subr.bf16.mxu0 %v6945_v20  ;;  %v3142_v2 = vsel %vm7376_vm12, %v6037_v40, %v3141_v59  ;;  %v3040_v51 = vld [vmem:[#allocation2 + $0x38] sm:$0x1]  ;;  %v2527_v40 = vld [vmem:[#allocation2 + $0x34] sm:$0xf] }
 0x1bf   : > { %v6020_v7 = vcombine.low %v2602_v61, %v2612_v38  ;;  %v3566_v22 = vrot.slane %v3565_v58, 4  ;;  %v3143_v56 = vrot.slane %v3141_v59, 4  ;;  %v2616_v14 = vrot.slane %v2614_v21, 4  ;;  %v6944_v61 = vld [vmem:[#allocation2 + $0x30] sm:$0xff]  }
 0x1c0   : > { %v3576_v37 = vrot.slane %v3575_v63, 4  ;;  %v2619_v11 = vrot.slane %v2617_v30, 5  ;;  %v2623_v15 = vshll.u32 %v2524_v62, 16  ;;  %6825 = vmatpush3.bf16.msra.mxu1 %v6945_v20  ;;  %v2627_v1 = vshrl.u32 %v2524_v62, 16 }
 0x1c1   : > { %v3571_v47 = vsel %vm7288_vm9, %v3566_v22, %v3570_v18  ;;  %v3145_v4 = vsel %vm7376_vm12, %v3143_v56, %v3144_v42  ;;  %v2633_v26 = vshll.u32 %v2525_v0, 16  ;;  %6818 = vmatprep.subr.bf16.mxu1 %v6948_v5  ;;  %6771 = vmatpush3.bf16.msra.mxu0 %v6945_v20  ;;  %v3583_v25 = vshrl.u32 %v3471_v12, 16  ;;  %v2526_v20 = vld [vmem:[#allocation2 + $0x30] sm:$0xf]  ;;  %v2528_v42 = vld [vmem:[#allocation2 + $0x38] sm:$0x1] }
 0x1c2   : > { %5506 = vmatmul.mubr.bf16.gmra.mrb[100].mxu0 %v6943_v10  ;;  %v3581_v35 = vsel %vm7288_vm9, %v3576_v37, %v3580_v57  ;;  %v6053_v17 = vcombine.low %v3142_v2, %v3145_v4  ;;  %v2620_v53 = vor.u32 %v2619_v11, %v2616_v14  ;;  %v2625_v31 = vrot.slane %v2623_v15, 5  ;;  %6772 = vmatprep.subr.bf16.mxu0 %v6948_v5  ;;  %v6954_v57 = vld [vmem:[%s8741_s6 + $0x220] sm:$0xff]   ;;  %v3475_v10 = vld [vmem:[#allocation2 + $0x4c] sm:$0xf] }
 0x1c3   : > { %5345 = vmatmul.mubr.bf16.gmra.mrb[68].mxu1 %v6020_v7  ;;  %v6085_v50 = vcombine.low %v3571_v47, %v3581_v35  ;;  %v2629_v9 = vrot.slane %v2627_v1, 4  ;;  %v2635_v3 = vrot.slane %v2633_v26, 5  ;;  %v3586_v19 = vshll.u32 %v3471_v12, 16  ;;  %v3476_v1 = vld [vmem:[#allocation2 + $0x50] sm:$0x1]  ;;  %v6957_v26 = vld [vmem:[%s8741_s6 + $0x228] sm:$0xff]  }
 0x1c4   : > { %5352 = vmatprep.mubr.bf16.mxu1 %v6053_v17  ;;  %v2621_v29 = vrot.slane %v2620_v53, 4  ;;  %v3592_v48 = vshll.u32 %v3472_v27, 16  ;;  %v3596_v41 = vshrl.u32 %v3472_v27, 16  ;;  %6826 = vmatpush3.bf16.msra.mxu1 %v6948_v5  ;;  %v3585_v34 = vrot.slane %v3583_v25, 4  ;;  %v3041_v53 = vld [vmem:[#allocation2 + $0x3c] sm:$0xe] }
 0x1c5   : > { %5513 = vmatprep.mubr.bf16.mxu0 %v6085_v50  ;;  %v2630_v6 = vor.u32 %v2629_v9, %v2625_v31  ;;  %v3602_v46 = vshll.u32 %v3473_v60, 16  ;;  %v6038_v16 = vrot.slane %v3038_v32, 9  ;;  %6819 = vmatprep.subr.bf16.mxu1 %v6951_v28  ;;  %v3588_v52 = vrot.slane %v3586_v19, 5 }
 0x1c6   : > { %v2626_v39 = vsel %vm7288_vm9, %v2621_v29, %v2625_v31  ;;  %v3594_v49 = vrot.slane %v3592_v48, 5  ;;  %v3598_v54 = vrot.slane %v3596_v41, 4  ;;  %6773 = vmatpush3.bf16.msra.mxu0 %v6948_v5  ;;  %v3148_v18 = vrot.slane %v3039_v44, 5  ;;  %v3474_v5 = vld [vmem:[#allocation2 + $0x48] sm:$0xf] }
 0x1c7   : > { %v2631_v43 = vrot.slane %v2630_v6, 4  ;;  %v3604_v23 = vrot.slane %v3602_v46, 5  ;;  %v3151_v36 = vrot.slane %v3040_v51, 5  ;;  %6774 = vmatprep.subr.bf16.mxu0 %v6951_v28  ;;  %v3589_v58 = vor.u32 %v3588_v52, %v3585_v34  ;;  %v3042_v31 = vld [vmem:[#allocation2 + $0x40] sm:$0xf] }
 0x1c8   : > { %v3599_v59 = vor.u32 %v3598_v54, %v3594_v49  ;;  %v2638_v62 = vshrl.u32 %v2526_v20, 16  ;;  %v2641_v38 = vshll.u32 %v2526_v20, 16  ;;  %6827 = vmatpush3.bf16.msra.mxu1 %v6951_v28  ;;  %v3149_v0 = vsel %vm7376_vm12, %v6038_v16, %v3148_v18  ;;  %v3043_v44 = vld [vmem:[#allocation2 + $0x44] sm:$0x1]  ;;  %v2529_v41 = vld [vmem:[#allocation2 + $0x3c] sm:$0xf] }
 0x1c9   : > { %v2636_v63 = vsel %vm7288_vm9, %v2631_v43, %v2635_v3  ;;  %v3150_v21 = vrot.slane %v3148_v18, 4  ;;  %v2647_v30 = vshll.u32 %v2527_v40, 16  ;;  %6820 = vmatprep.subr.bf16.mxu1 %v6954_v57  ;;  %v3590_v22 = vrot.slane %v3589_v58, 4  ;;  %v6946_v51 = vld [vmem:[#allocation2 + $0x3c] sm:$0xff]   ;;  %v6960_v20 = vld [vmem:[%s8741_s6 + $0x230] sm:$0xff]  }
 0x1ca   : > { %5514 = vmatmul.mubr.bf16.gmra.mrb[104].mxu0 %v6944_v61  ;;  %v6021_v7 = vcombine.low %v2626_v39, %v2636_v63  ;;  %v3600_v2 = vrot.slane %v3599_v59, 4  ;;  %v2640_v56 = vrot.slane %v2638_v62, 4  ;;  %v2643_v37 = vrot.slane %v2641_v38, 5  ;;  %v2530_v18 = vld [vmem:[#allocation2 + $0x40] sm:$0xf] }
 0x1cb   : > { %v3152_v12 = vsel %vm7376_vm12, %v3150_v21, %v3151_v36  ;;  %v2649_v14 = vrot.slane %v2647_v30, 5  ;;  %v2651_v11 = vshrl.u32 %v2527_v40, 16  ;;  %6775 = vmatpush3.bf16.msra.mxu0 %v6951_v28  ;;  %v3595_v15 = vsel %vm7288_vm9, %v3590_v22, %v3594_v49  ;;  %v2531_v59 = vld [vmem:[#allocation2 + $0x44] sm:$0x1]  ;;  %v3477_v21 = vld [vmem:[#allocation2 + $0x54] sm:$0xf] }
 0x1cc   : > { %5353 = vmatmul.mubr.bf16.gmra.mrb[72].mxu1 %v6021_v7  ;;  %v3605_v27 = vsel %vm7288_vm9, %v3600_v2, %v3604_v23  ;;  %v6054_v47 = vcombine.low %v3149_v0, %v3152_v12  ;;  %v2657_v4 = vshll.u32 %v2528_v42, 16  ;;  %6776 = vmatprep.subr.bf16.mxu0 %v6954_v57  ;;  %v2644_v32 = vor.u32 %v2643_v37, %v2640_v56  ;;  %v6963_v30 = vld [vmem:[%s8741_s6 + $0x238] sm:$0xff]  }
 0x1cd   : > { %v6086_v60 = vcombine.low %v3595_v15, %v3605_v27  ;;  %v2653_v35 = vrot.slane %v2651_v11, 4  ;;  %v3607_v17 = vshrl.u32 %v3474_v5, 16  ;;  %6828 = vmatpush3.bf16.msra.mxu1 %v6954_v57  ;;  %v3610_v9 = vshll.u32 %v3474_v5, 16  ;;  %v3478_v2 = vld [vmem:[#allocation2 + $0x58] sm:$0xf] }
 0x1ce   : > { %5360 = vmatprep.mubr.bf16.mxu1 %v6054_v47  ;;  %v2659_v50 = vrot.slane %v2657_v4, 5  ;;  %v3616_v3 = vshll.u32 %v3475_v10, 16  ;;  %v3620_v25 = vshrl.u32 %v3475_v10, 16  ;;  %6821 = vmatprep.subr.bf16.mxu1 %v6957_v26  ;;  %v2645_v28 = vrot.slane %v2644_v32, 4  ;;  %v3479_v15 = vld [vmem:[#allocation2 + $0x5c] sm:$0x1] }
 0x1cf   : > { %5521 = vmatprep.mubr.bf16.mxu0 %v6086_v60  ;;  %v2654_v29 = vor.u32 %v2653_v35, %v2649_v14  ;;  %v3609_v19 = vrot.slane %v3607_v17, 4  ;;  %v3626_v48 = vshll.u32 %v3476_v1, 16  ;;  %6777 = vmatpush3.bf16.msra.mxu0 %v6954_v57  ;;  %v3612_v6 = vrot.slane %v3610_v9, 5  ;;  %v3044_v27 = vld [vmem:[#allocation2 + $0x48] sm:$0xe] }
 0x1d0   : > { %v3618_v34 = vrot.slane %v3616_v3, 5  ;;  %v3622_v46 = vrot.slane %v3620_v25, 4  ;;  %v6039_v16 = vrot.slane %v3041_v53, 9  ;;  %6778 = vmatprep.subr.bf16.mxu0 %v6957_v26  ;;  %v2650_v39 = vsel %vm7288_vm9, %v2645_v28, %v2649_v14  ;;  %v6947_v14 = vld [vmem:[#allocation2 + $0x48] sm:$0xff]   ;;  %v3046_v32 = vld [vmem:[#allocation2 + $0x50] sm:$0x1] }
 0x1d1   : > { %v2655_v52 = vrot.slane %v2654_v29, 4  ;;  %v3628_v49 = vrot.slane %v3626_v48, 5  ;;  %v3155_v54 = vrot.slane %v3042_v31, 5  ;;  %6829 = vmatpush3.bf16.msra.mxu1 %v6957_v26  ;;  %v3613_v40 = vor.u32 %v3612_v6, %v3609_v19  ;;  %v3045_v60 = vld [vmem:[#allocation2 + $0x4c] sm:$0xf] }
 0x1d2   : > { %5522 = vmatmul.mubr.bf16.gmra.mrb[108].mxu0 %v6946_v51  ;;  %v3623_v43 = vor.u32 %v3622_v46, %v3618_v34  ;;  %v3158_v23 = vrot.slane %v3043_v44, 5  ;;  %v2662_v36 = vshrl.u32 %v2529_v41, 16  ;;  %6822 = vmatprep.subr.bf16.mxu1 %v6960_v20  ;;  %v2665_v42 = vshll.u32 %v2529_v41, 16  ;;  %v2533_v28 = vld [vmem:[#allocation2 + $0x4c] sm:$0xf] }
 0x1d3   : > { %v2660_v57 = vsel %vm7288_vm9, %v2655_v52, %v2659_v50  ;;  %v3156_v61 = vsel %vm7376_vm12, %v6039_v16, %v3155_v54  ;;  %v3157_v58 = vrot.slane %v3155_v54, 4  ;;  %6779 = vmatpush3.bf16.msra.mxu0 %v6957_v26  ;;  %v3614_v38 = vrot.slane %v3613_v40, 4  ;;  %v2532_v50 = vld [vmem:[#allocation2 + $0x48] sm:$0xf]  ;;  %v2534_v40 = vld [vmem:[#allocation2 + $0x50] sm:$0x1] }
 0x1d4   : > { %v6022_v62 = vcombine.low %v2650_v39, %v2660_v57  ;;  %v3624_v63 = vrot.slane %v3623_v43, 4  ;;  %v2664_v0 = vrot.slane %v2662_v36, 4  ;;  %6780 = vmatprep.subr.bf16.mxu0 %v6960_v20  ;;  %v2667_v10 = vrot.slane %v2665_v42, 5 }
 0x1d5   : > { %v3159_v5 = vsel %vm7376_vm12, %v3157_v58, %v3158_v23  ;;  %v2671_v7 = vshll.u32 %v2530_v18, 16  ;;  %v2675_v22 = vshrl.u32 %v2530_v18, 16  ;;  %6830 = vmatpush3.bf16.msra.mxu1 %v6960_v20  ;;  %v3619_v56 = vsel %vm7288_vm9, %v3614_v38, %v3618_v34  ;;  %v3480_v58 = vld [vmem:[#allocation2 + $0x60] sm:$0xf] }
 0x1d6   : > { %5361 = vmatmul.mubr.bf16.gmra.mrb[76].mxu1 %v6022_v62  ;;  %v3629_v12 = vsel %vm7288_vm9, %v3624_v63, %v3628_v49  ;;  %v6055_v37 = vcombine.low %v3156_v61, %v3159_v5  ;;  %v2681_v11 = vshll.u32 %v2531_v59, 16  ;;  %6823 = vmatprep.subr.bf16.mxu1 %v6963_v30  ;;  %v2668_v4 = vor.u32 %v2667_v10, %v2664_v0  ;;  %v3481_v59 = vld [vmem:[#allocation2 + $0x64] sm:$0xf]  ;;  %v3482_v0 = vld [vmem:[#allocation2 + $0x68] sm:$0x1] }
 0x1d7   : > { %v6087_v47 = vcombine.low %v3619_v56, %v3629_v12  ;;  %v2673_v1 = vrot.slane %v2671_v7, 5  ;;  %v2677_v26 = vrot.slane %v2675_v22, 4  ;;  %6781 = vmatpush3.bf16.msra.mxu0 %v6960_v20  ;;  %v3631_v17 = vshrl.u32 %v3477_v21, 16  ;;  %v3047_v7 = vld [vmem:[#allocation2 + $0x54] sm:$0xe] }
 0x1d8   : > { %5368 = vmatprep.mubr.bf16.mxu1 %v6055_v37  ;;  %v2683_v35 = vrot.slane %v2681_v11, 5  ;;  %v3634_v53 = vshll.u32 %v3477_v21, 16  ;;  %v3640_v31 = vshll.u32 %v3478_v2, 16  ;;  %6782 = vmatprep.subr.bf16.mxu0 %v6963_v30  ;;  %v2669_v9 = vrot.slane %v2668_v4, 4  ;;  %v3048_v22 = vld [vmem:[#allocation2 + $0x58] sm:$0xf] }
 0x1d9   : > { %5529 = vmatprep.mubr.bf16.mxu0 %v6087_v47  ;;  %v2678_v3 = vor.u32 %v2677_v26, %v2673_v1  ;;  %v3644_v25 = vshrl.u32 %v3478_v2, 16  ;;  %v3650_v44 = vshll.u32 %v3479_v15, 16  ;;  %6831 = vmatpush3.bf16.msra.mxu1 %v6963_v30  ;;  %v3633_v29 = vrot.slane %v3631_v17, 4 }
 0x1da   : > { %5530 = vmatmul.mubr.bf16.gmra.mrb[112].mxu0 %v6947_v14  ;;  %v3636_v19 = vrot.slane %v3634_v53, 5  ;;  %v3642_v48 = vrot.slane %v3640_v31, 5  ;;  %v6040_v41 = vrot.slane %v3044_v27, 9  ;;  %v2674_v51 = vsel %vm7288_vm9, %v2669_v9, %v2673_v1  ;;  %v3049_v14 = vld [vmem:[#allocation2 + $0x5c] sm:$0x1]  ;;  %v6949_v1 = vld [vmem:[#allocation2 + $0x54] sm:$0xff]  }
 0x1db   : > { %v2679_v6 = vrot.slane %v2678_v3, 4  ;;  %v3646_v34 = vrot.slane %v3644_v25, 4  ;;  %v3652_v46 = vrot.slane %v3650_v44, 5  ;;  %6783 = vmatpush3.bf16.msra.mxu0 %v6963_v30  ;;  %v3162_v20 = vrot.slane %v3045_v60, 5  ;;  %v2535_v3 = vld [vmem:[#allocation2 + $0x54] sm:$0xf] }
 0x1dc   : > { %v3637_v16 = vor.u32 %v3636_v19, %v3633_v29  ;;  %v3165_v39 = vrot.slane %v3046_v32, 5  ;;  %v2686_v52 = vshrl.u32 %v2532_v50, 16  ;;  %v2689_v43 = vshll.u32 %v2532_v50, 16 }
 0x1dd   : > { %v2684_v49 = vsel %vm7288_vm9, %v2679_v6, %v2683_v35  ;;  %v3647_v54 = vor.u32 %v3646_v34, %v3642_v48  ;;  %v2695_v23 = vshll.u32 %v2533_v28, 16  ;;  %v3163_v57 = vsel %vm7376_vm12, %v6040_v41, %v3162_v20 }
 0x1de   : > { %v6023_v18 = vcombine.low %v2674_v51, %v2684_v49  ;;  %v3638_v36 = vrot.slane %v3637_v16, 4  ;;  %v3164_v61 = vrot.slane %v3162_v20, 4  ;;  %v2688_v62 = vrot.slane %v2686_v52, 4  ;;  %v2537_v52 = vld [vmem:[#allocation2 + $0x5c] sm:$0x1] }
 0x1df   : > { %v3648_v42 = vrot.slane %v3647_v54, 4  ;;  %v2691_v38 = vrot.slane %v2689_v43, 5  ;;  %v2697_v63 = vrot.slane %v2695_v23, 5  ;;  %v2699_v5 = vshrl.u32 %v2533_v28, 16  ;;  %v8010_v4 = vpop.f32.mrb[32].mxu0 }
 0x1e0   : > { %5369 = vmatmul.mubr.bf16.gmra.mrb[80].mxu1 %v6023_v18  ;;  %v3643_v21 = vsel %vm7288_vm9, %v3638_v36, %v3642_v48  ;;  %v3166_v30 = vsel %vm7376_vm12, %v3164_v61, %v3165_v39  ;;  %v2705_v10 = vshll.u32 %v2534_v40, 16  ;;  %v3655_v37 = vshrl.u32 %v3480_v58, 16  ;;  %v8012_v17 = vpop.f32.mrb[33].mxu0  ;;  %v2536_v48 = vld [vmem:[#allocation2 + $0x58] sm:$0xf] }
 0x1e1   : > { %v3653_v2 = vsel %vm7288_vm9, %v3648_v42, %v3652_v46  ;;  %v6056_v56 = vcombine.low %v3163_v57, %v3166_v30  ;;  %v2692_v12 = vor.u32 %v2691_v38, %v2688_v62  ;;  %v2701_v15 = vrot.slane %v2699_v5, 4  ;;  %v8014_v25 = vpop.f32.mrb[34].mxu0  ;;  %v3483_v18 = vld [vmem:[#allocation2 + $0x6c] sm:$0xf] }
 0x1e2   : > { %v6088_v11 = vcombine.low %v3643_v21, %v3653_v2  ;;  %v2707_v27 = vrot.slane %v2705_v10, 5  ;;  %v3658_v47 = vshll.u32 %v3480_v58, 16  ;;  %v3657_v60 = vrot.slane %v3655_v37, 4  ;;  %v8018_v41 = vpop.f32.mrb[35].mxu0  ;;  %v6950_v21 = vld [vmem:[#allocation2 + $0x60] sm:$0xff]  }
 0x1e3   : > { %5376 = vmatprep.mubr.bf16.mxu1 %v6056_v56  ;;  %v2693_v26 = vrot.slane %v2692_v12, 4  ;;  %v3664_v32 = vshll.u32 %v3481_v59, 16  ;;  %v3668_v35 = vshrl.u32 %v3481_v59, 16  ;;  %v2702_v53 = vor.u32 %v2701_v15, %v2697_v63  ;;  %v3484_v59 = vld [vmem:[#allocation2 + $0x70] sm:$0xf] }
 0x1e4   : > { %5537 = vmatprep.mubr.bf16.mxu0 %v6088_v11  ;;  %v3660_v31 = vrot.slane %v3658_v47, 5  ;;  %v3674_v50 = vshll.u32 %v3482_v0, 16  ;;  %v6041_v9 = vrot.slane %v3047_v7, 9  ;;  %v3169_v19 = vrot.slane %v3048_v22, 5  ;;  %v3485_v10 = vld [vmem:[#allocation2 + $0x74] sm:$0x1] }
 0x1e5   : > { %5538 = vmatmul.mubr.bf16.gmra.mrb[116].mxu0 %v6949_v1  ;;  %v2698_v44 = vsel %vm7288_vm9, %v2693_v26, %v2697_v63  ;;  %v3666_v28 = vrot.slane %v3664_v32, 5  ;;  %v3670_v29 = vrot.slane %v3668_v35, 4  ;;  %v2703_v51 = vrot.slane %v2702_v53, 4  ;;  %v3050_v37 = vld [vmem:[#allocation2 + $0x60] sm:$0xe] }
 0x1e6   : > { %v3661_v6 = vor.u32 %v3660_v31, %v3657_v60  ;;  %v3676_v34 = vrot.slane %v3674_v50, 5  ;;  %v3172_v46 = vrot.slane %v3049_v14, 5  ;;  %v3170_v20 = vsel %vm7376_vm12, %v6041_v9, %v3169_v19  ;;  %v3051_v14 = vld [vmem:[#allocation2 + $0x64] sm:$0xf]  ;;  %v3052_v1 = vld [vmem:[#allocation2 + $0x68] sm:$0x1] }
 0x1e7   : > { %v3671_v16 = vor.u32 %v3670_v29, %v3666_v28  ;;  %v3171_v39 = vrot.slane %v3169_v19, 4  ;;  %v2710_v49 = vshrl.u32 %v2535_v3, 16  ;;  %v2708_v54 = vsel %vm7288_vm9, %v2703_v51, %v2707_v27  ;;  %v2538_v53 = vld [vmem:[#allocation2 + $0x60] sm:$0xf] }
 0x1e8   : > { %v3662_v40 = vrot.slane %v3661_v6, 4  ;;  %v2713_v43 = vshll.u32 %v2535_v3, 16  ;;  %v2719_v23 = vshll.u32 %v2536_v48, 16  ;;  %v6024_v36 = vcombine.low %v2698_v44, %v2708_v54  ;;  %v2539_v44 = vld [vmem:[#allocation2 + $0x64] sm:$0xf] }
 0x1e9   : > { %v3672_v57 = vrot.slane %v3671_v16, 4  ;;  %v3173_v61 = vsel %vm7376_vm12, %v3171_v39, %v3172_v46  ;;  %v2712_v58 = vrot.slane %v2710_v49, 4  ;;  %v2723_v30 = vshrl.u32 %v2536_v48, 16 }
 0x1ea   : > { %v3667_v42 = vsel %vm7288_vm9, %v3662_v40, %v3666_v28  ;;  %v6057_v62 = vcombine.low %v3170_v20, %v3173_v61  ;;  %v2715_v38 = vrot.slane %v2713_v43, 5  ;;  %v2721_v63 = vrot.slane %v2719_v23, 5  ;;  %5377 = vmatmul.mubr.bf16.gmra.mrb[84].mxu1 %v6024_v36  ;;  %v2540_v20 = vld [vmem:[#allocation2 + $0x68] sm:$0x1] }
 0x1eb   : > { %v3677_v0 = vsel %vm7288_vm9, %v3672_v57, %v3676_v34  ;;  %v2729_v5 = vshll.u32 %v2537_v52, 16  ;;  %v3679_v7 = vshrl.u32 %v3483_v18, 16  ;;  %v3682_v56 = vshll.u32 %v3483_v18, 16  ;;  %v3486_v18 = vld [vmem:[#allocation2 + $0x78] sm:$0xf] }
 0x1ec   : > { %v6089_v22 = vcombine.low %v3667_v42, %v3677_v0  ;;  %5384 = vmatprep.mubr.bf16.mxu1 %v6057_v62  ;;  %v2716_v2 = vor.u32 %v2715_v38, %v2712_v58  ;;  %v3688_v12 = vshll.u32 %v3484_v59, 16  ;;  %v2725_v11 = vrot.slane %v2723_v30, 4  ;;  %v3487_v42 = vld [vmem:[#allocation2 + $0x7c] sm:$0xf]  ;;  %v3488_v62 = vld [vmem:[#allocation2 + $0x80] sm:$0x1] }
 0x1ed   : > { %v2731_v15 = vrot.slane %v2729_v5, 5  ;;  %v3681_v27 = vrot.slane %v3679_v7, 4  ;;  %v3692_v47 = vshrl.u32 %v3484_v59, 16  ;;  %v3684_v60 = vrot.slane %v3682_v56, 5  ;;  %v3053_v5 = vld [vmem:[#allocation2 + $0x6c] sm:$0xe] }
 0x1ee   : > { %5545 = vmatprep.mubr.bf16.mxu0 %v6089_v22  ;;  %v2717_v26 = vrot.slane %v2716_v2, 4  ;;  %v3690_v32 = vrot.slane %v3688_v12, 5  ;;  %v3698_v35 = vshll.u32 %v3485_v10, 16  ;;  %v2726_v31 = vor.u32 %v2725_v11, %v2721_v63  ;;  %v3054_v10 = vld [vmem:[#allocation2 + $0x70] sm:$0xf] }
 0x1ef   : > { %5546 = vmatmul.mubr.bf16.gmra.mrb[120].mxu0 %v6950_v21  ;;  %v3694_v50 = vrot.slane %v3692_v47, 4  ;;  %v6042_v9 = vrot.slane %v3050_v37, 9  ;;  %v3176_v3 = vrot.slane %v3051_v14, 5  ;;  %v3685_v29 = vor.u32 %v3684_v60, %v3681_v27  ;;  %v3055_v60 = vld [vmem:[#allocation2 + $0x74] sm:$0x1] }
 0x1f0   : > { %v2722_v28 = vsel %vm7288_vm9, %v2717_v26, %v2721_v63  ;;  %v3700_v19 = vrot.slane %v3698_v35, 5  ;;  %v3179_v48 = vrot.slane %v3052_v1, 5  ;;  %v2727_v51 = vrot.slane %v2726_v31, 4 }
 0x1f1   : > { %v3695_v6 = vor.u32 %v3694_v50, %v3690_v32  ;;  %v3177_v34 = vsel %vm7376_vm12, %v6042_v9, %v3176_v3  ;;  %v3178_v46 = vrot.slane %v3176_v3, 4  ;;  %v3686_v16 = vrot.slane %v3685_v29, 4 }
 0x1f2   : > { %v2734_v39 = vshrl.u32 %v2538_v53, 16  ;;  %v2737_v52 = vshll.u32 %v2538_v53, 16  ;;  %v2743_v49 = vshll.u32 %v2539_v44, 16  ;;  %v2732_v54 = vsel %vm7288_vm9, %v2727_v51, %v2731_v15  ;;  %v8038_v36 = vpop.f32.mrb[36].mxu0  ;;  %v6952_v15 = vld [vmem:[#allocation2 + $0x6c] sm:$0xff]  }
 0x1f3   : > { %v3696_v40 = vrot.slane %v3695_v6, 4  ;;  %v3180_v43 = vsel %vm7376_vm12, %v3178_v46, %v3179_v48  ;;  %v2747_v23 = vshrl.u32 %v2539_v44, 16  ;;  %v6025_v57 = vcombine.low %v2722_v28, %v2732_v54  ;;  %v8042_v38 = vpop.f32.mrb[37].mxu0  ;;  %v2542_v46 = vld [vmem:[#allocation2 + $0x70] sm:$0xf] }
 0x1f4   : > { %v3691_v61 = vsel %vm7288_vm9, %v3686_v16, %v3690_v32  ;;  %v6058_v58 = vcombine.low %v3177_v34, %v3180_v43  ;;  %v2736_v59 = vrot.slane %v2734_v39, 4  ;;  %v2739_v0 = vrot.slane %v2737_v52, 5  ;;  %v8046_v7 = vpop.f32.mrb[4].mxu1  ;;  %v8048_v22 = vpop.f32.mrb[38].mxu0 }
 0x1f5   : > { %v3701_v63 = vsel %vm7288_vm9, %v3696_v40, %v3700_v19  ;;  %v2745_v21 = vrot.slane %v2743_v49, 5  ;;  %v2749_v30 = vrot.slane %v2747_v23, 4  ;;  %5385 = vmatmul.mubr.bf16.gmra.mrb[88].mxu1 %v6025_v57  ;;  %v2753_v56 = vshll.u32 %v2540_v20, 16  ;;  %v8050_v14 = vpop.f32.mrb[5].mxu1  ;;  %v8052_v11 = vpop.f32.mrb[39].mxu0 }
 0x1f6   : > { %v6090_v2 = vcombine.low %v3691_v61, %v3701_v63  ;;  %v3703_v12 = vshrl.u32 %v3486_v18, 16  ;;  %v3706_v37 = vshll.u32 %v3486_v18, 16  ;;  %5392 = vmatprep.mubr.bf16.mxu1 %v6058_v58  ;;  %v2740_v27 = vor.u32 %v2739_v0, %v2736_v59  ;;  %v8054_v32 = vpop.f32.mrb[6].mxu1  ;;  %v2541_v19 = vld [vmem:[#allocation2 + $0x6c] sm:$0xf] }
 0x1f7   : > { %v2750_v47 = vor.u32 %v2749_v30, %v2745_v21  ;;  %v3712_v1 = vshll.u32 %v3487_v42, 16  ;;  %v3716_v26 = vshrl.u32 %v3487_v42, 16  ;;  %v2755_v35 = vrot.slane %v2753_v56, 5  ;;  %v8056_v9 = vpop.f32.mrb[7].mxu1  ;;  %v2543_v49 = vld [vmem:[#allocation2 + $0x74] sm:$0x1] }
 0x1f8   : > { %5553 = vmatprep.mubr.bf16.mxu0 %v6090_v2  ;;  %v3705_v53 = vrot.slane %v3703_v12, 4  ;;  %v3708_v31 = vrot.slane %v3706_v37, 5  ;;  %v3722_v50 = vshll.u32 %v3488_v62, 16  ;;  %v2741_v3 = vrot.slane %v2740_v27, 4  ;;  %v3489_v18 = vld [vmem:[#allocation2 + $0x84] sm:$0xf] }
 0x1f9   : > { %5554 = vmatmul.mubr.bf16.gmra.mrb[124].mxu0 %v6952_v15  ;;  %v2751_v44 = vrot.slane %v2750_v47, 4  ;;  %v3714_v28 = vrot.slane %v3712_v1, 5  ;;  %v3718_v29 = vrot.slane %v3716_v26, 4  ;;  %v6043_v6 = vrot.slane %v3053_v5, 9  ;;  %v3490_v57 = vld [vmem:[#allocation2 + $0x88] sm:$0xf] }
 0x1fa   : > { %v3709_v48 = vor.u32 %v3708_v31, %v3705_v53  ;;  %v3724_v51 = vrot.slane %v3722_v50, 5  ;;  %v3183_v34 = vrot.slane %v3054_v10, 5  ;;  %v2746_v16 = vsel %vm7288_vm9, %v2741_v3, %v2745_v21  ;;  %v3491_v5 = vld [vmem:[#allocation2 + $0x8c] sm:$0x1]  ;;  %v3056_v15 = vld [vmem:[#allocation2 + $0x78] sm:$0xe] }
 0x1fb   : > { %v2756_v20 = vsel %vm7288_vm9, %v2751_v44, %v2755_v35  ;;  %v3719_v39 = vor.u32 %v3718_v29, %v3714_v28  ;;  %v3186_v52 = vrot.slane %v3055_v60, 5  ;;  %v2758_v58 = vshrl.u32 %v2541_v19, 16  ;;  %v3057_v35 = vld [vmem:[#allocation2 + $0x7c] sm:$0xf]  ;;  %v3058_v29 = vld [vmem:[#allocation2 + $0x80] sm:$0x1] }
 0x1fc   : > { %v6026_v54 = vcombine.low %v2746_v16, %v2756_v20  ;;  %v3710_v40 = vrot.slane %v3709_v48, 4  ;;  %v3184_v43 = vsel %vm7376_vm12, %v6043_v6, %v3183_v34  ;;  %v3185_v23 = vrot.slane %v3183_v34, 4  ;;  %v8064_v62 = vpop.f32.mrb[8].mxu1  ;;  %v6953_v31 = vld [vmem:[#allocation2 + $0x78] sm:$0xff]  }
 0x1fd   : > { %v3720_v61 = vrot.slane %v3719_v39, 4  ;;  %v2761_v59 = vshll.u32 %v2541_v19, 16  ;;  %v2767_v42 = vshll.u32 %v2542_v46, 16  ;;  %v2771_v21 = vshrl.u32 %v2542_v46, 16  ;;  %v8070_v10 = vpop.f32.mrb[9].mxu1 }
 0x1fe   : > { %5393 = vmatmul.mubr.bf16.gmra.mrb[92].mxu1 %v6026_v54  ;;  %v3715_v63 = vsel %vm7288_vm9, %v3710_v40, %v3714_v28  ;;  %v3187_v0 = vsel %vm7376_vm12, %v3185_v23, %v3186_v52  ;;  %v2777_v30 = vshll.u32 %v2543_v49, 16  ;;  %v2760_v12 = vrot.slane %v2758_v58, 4  ;;  %v8074_v27 = vpop.f32.mrb[10].mxu1  ;;  %v2544_v34 = vld [vmem:[#allocation2 + $0x78] sm:$0xf] }
 0x1ff   : > { %v3725_v2 = vsel %vm7288_vm9, %v3720_v61, %v3724_v51  ;;  %v6059_v56 = vcombine.low %v3184_v43, %v3187_v0  ;;  %v2763_v37 = vrot.slane %v2761_v59, 5  ;;  %v2769_v1 = vrot.slane %v2767_v42, 5  ;;  %v8076_v53 = vpop.f32.mrb[11].mxu1  ;;  %v2545_v58 = vld [vmem:[#allocation2 + $0x7c] sm:$0xf] }
 0x200   : > { %v6091_v47 = vcombine.low %v3715_v63, %v3725_v2  ;;  %v2773_v26 = vrot.slane %v2771_v21, 4  ;;  %v2779_v60 = vrot.slane %v2777_v30, 5  ;;  %v3727_v3 = vshrl.u32 %v3489_v18, 16 }
 0x201   : > { %5400 = vmatprep.mubr.bf16.mxu1 %v6059_v56  ;;  %v2764_v50 = vor.u32 %v2763_v37, %v2760_v12  ;;  %v3730_v44 = vshll.u32 %v3489_v18, 16  ;;  %v3736_v28 = vshll.u32 %v3490_v57, 16  ;;  %v3740_v48 = vshrl.u32 %v3490_v57, 16  ;;  %v8078_v52 = vpop.f32.mrb[40].mxu0 }
 0x202   : > { %5561 = vmatprep.mubr.bf16.mxu0 %v6091_v47  ;;  %v2774_v19 = vor.u32 %v2773_v26, %v2769_v1  ;;  %v3746_v51 = vshll.u32 %v3491_v5, 16  ;;  %v6044_v6 = vrot.slane %v3056_v15, 9  ;;  %v3729_v16 = vrot.slane %v3727_v3, 4  ;;  %v8080_v23 = vpop.f32.mrb[41].mxu0  ;;  %v2546_v5 = vld [vmem:[#allocation2 + $0x80] sm:$0x1] }
 0x203   : > { %5562 = vmatmul.mubr.bf16.gmra.mrb[128].mxu0 %v6953_v31  ;;  %v2765_v46 = vrot.slane %v2764_v50, 4  ;;  %v3732_v20 = vrot.slane %v3730_v44, 5  ;;  %v3738_v39 = vrot.slane %v3736_v28, 5  ;;  %v3742_v54 = vrot.slane %v3740_v48, 4  ;;  %v8084_v42 = vpop.f32.mrb[42].mxu0 }
 0x204   : > { %v2775_v49 = vrot.slane %v2774_v19, 4  ;;  %v3748_v40 = vrot.slane %v3746_v51, 5  ;;  %v3190_v43 = vrot.slane %v3057_v35, 5  ;;  %v3193_v61 = vrot.slane %v3058_v29, 5  ;;  %v8090_v2 = vpop.f32.mrb[43].mxu0 }
 0x205   : > { %v2770_v18 = vsel %vm7288_vm9, %v2765_v46, %v2769_v1  ;;  %v3733_v57 = vor.u32 %v3732_v20, %v3729_v16  ;;  %v2782_v59 = vshrl.u32 %v2544_v34, 16  ;;  %v3743_v0 = vor.u32 %v3742_v54, %v3738_v39  ;;  %v3492_v47 = vld [vmem:[#allocation2 + $0x90] sm:$0xf]  ;;  %v3494_v29 = vld [vmem:[#allocation2 + $0x98] sm:$0x1] }
 0x206   : > { %v2780_v63 = vsel %vm7288_vm9, %v2775_v49, %v2779_v60  ;;  %v3191_v21 = vsel %vm7376_vm12, %v6044_v6, %v3190_v43  ;;  %v3192_v30 = vrot.slane %v3190_v43, 4  ;;  %v2785_v15 = vshll.u32 %v2544_v34, 16  ;;  %v3493_v60 = vld [vmem:[#allocation2 + $0x94] sm:$0xf]  ;;  %v3059_v19 = vld [vmem:[#allocation2 + $0x84] sm:$0xe] }
 0x207   : > { %v6027_v56 = vcombine.low %v2770_v18, %v2780_v63  ;;  %v3734_v12 = vrot.slane %v3733_v57, 4  ;;  %v2784_v37 = vrot.slane %v2782_v59, 4  ;;  %v3744_v1 = vrot.slane %v3743_v0, 4  ;;  %v3060_v46 = vld [vmem:[#allocation2 + $0x88] sm:$0xf] }
 0x208   : > { %v3194_v26 = vsel %vm7376_vm12, %v3192_v30, %v3193_v61  ;;  %v2791_v35 = vshll.u32 %v2545_v58, 16  ;;  %v2795_v31 = vshrl.u32 %v2545_v58, 16  ;;  %v2787_v44 = vrot.slane %v2785_v15, 5  ;;  %v3061_v43 = vld [vmem:[#allocation2 + $0x8c] sm:$0x1]  ;;  %v6955_v57 = vld [vmem:[#allocation2 + $0x84] sm:$0xff]  }
 0x209   : > { %5401 = vmatmul.mubr.bf16.gmra.mrb[96].mxu1 %v6027_v56  ;;  %v3739_v50 = vsel %vm7288_vm9, %v3734_v12, %v3738_v39  ;;  %v6060_v3 = vcombine.low %v3191_v21, %v3194_v26  ;;  %v2801_v28 = vshll.u32 %v2546_v5, 16  ;;  %v3749_v48 = vsel %vm7288_vm9, %v3744_v1, %v3748_v40  ;;  %v2547_v40 = vld [vmem:[#allocation2 + $0x84] sm:$0xf] }
 0x20a   : > { %v2793_v51 = vrot.slane %v2791_v35, 5  ;;  %v2797_v6 = vrot.slane %v2795_v31, 4  ;;  %v3751_v34 = vshrl.u32 %v3492_v47, 16  ;;  %v6092_v16 = vcombine.low %v3739_v50, %v3749_v48  ;;  %v8098_v18 = vpop.f32.mrb[44].mxu0  ;;  %v8100_v39 = vpop.f32.mrb[12].mxu1 }
 0x20b   : > { %5408 = vmatprep.mubr.bf16.mxu1 %v6060_v3  ;;  %v2788_v20 = vor.u32 %v2787_v44, %v2784_v37  ;;  %v2803_v49 = vrot.slane %v2801_v28, 5  ;;  %v3754_v54 = vshll.u32 %v3492_v47, 16  ;;  %v3760_v59 = vshll.u32 %v3493_v60, 16  ;;  %v8102_v0 = vpop.f32.mrb[45].mxu0  ;;  %v8104_v21 = vpop.f32.mrb[13].mxu1 }
 0x20c   : > { %v2798_v61 = vor.u32 %v2797_v6, %v2793_v51  ;;  %v3753_v58 = vrot.slane %v3751_v34, 4  ;;  %v3764_v63 = vshrl.u32 %v3493_v60, 16  ;;  %5569 = vmatprep.mubr.bf16.mxu0 %v6092_v16  ;;  %v3770_v56 = vshll.u32 %v3494_v29, 16  ;;  %v8106_v37 = vpop.f32.mrb[46].mxu0  ;;  %v8108_v15 = vpop.f32.mrb[14].mxu1 }
 0x20d   : > { %v2789_v30 = vrot.slane %v2788_v20, 4  ;;  %v3756_v5 = vrot.slane %v3754_v54, 5  ;;  %v6045_v12 = vrot.slane %v3059_v19, 9  ;;  %5570 = vmatmul.mubr.bf16.gmra.mrb[132].mxu0 %v6955_v57  ;;  %v3762_v1 = vrot.slane %v3760_v59, 5  ;;  %v8110_v31 = vpop.f32.mrb[47].mxu0  ;;  %v8112_v60 = vpop.f32.mrb[15].mxu1 }
 0x20e   : > { %v2799_v47 = vrot.slane %v2798_v61, 4  ;;  %v3766_v26 = vrot.slane %v3764_v63, 4  ;;  %v3197_v35 = vrot.slane %v3060_v46, 5  ;;  %v3772_v44 = vrot.slane %v3770_v56, 5  ;;  %v2548_v29 = vld [vmem:[#allocation2 + $0x88] sm:$0xf] }
 0x20f   : > { %v2794_v50 = vsel %vm7288_vm9, %v2789_v30, %v2793_v51  ;;  %v3757_v3 = vor.u32 %v3756_v5, %v3753_v58  ;;  %v3200_v28 = vrot.slane %v3061_v43, 5  ;;  %v2549_v20 = vld [vmem:[#allocation2 + $0x8c] sm:$0x1]  ;;  %v2806_v54 = vshrl.u32 %v2547_v40, 16  ;;  %v3495_v59 = vld [vmem:[#allocation2 + $0x9c] sm:$0xf] }
 0x210   : > { %v2804_v19 = vsel %vm7288_vm9, %v2799_v47, %v2803_v49  ;;  %v3767_v48 = vor.u32 %v3766_v26, %v3762_v1  ;;  %v3198_v6 = vsel %vm7376_vm12, %v6045_v12, %v3197_v35  ;;  %v3199_v34 = vrot.slane %v3197_v35, 4  ;;  %v3496_v56 = vld [vmem:[#allocation2 + $0xa0] sm:$0xf]  ;;  %v3497_v12 = vld [vmem:[#allocation2 + $0xa4] sm:$0x1] }
 0x211   : > { %v6028_v46 = vcombine.low %v2794_v50, %v2804_v19  ;;  %v3758_v16 = vrot.slane %v3757_v3, 4  ;;  %v2809_v57 = vshll.u32 %v2547_v40, 16  ;;  %v2815_v58 = vshll.u32 %v2548_v29, 16  ;;  %v3062_v50 = vld [vmem:[#allocation2 + $0x90] sm:$0xe] }
 0x212   : > { %v3768_v61 = vrot.slane %v3767_v48, 4  ;;  %v3201_v51 = vsel %vm7376_vm12, %v3199_v34, %v3200_v28  ;;  %v2819_v43 = vshrl.u32 %v2548_v29, 16  ;;  %v2808_v30 = vrot.slane %v2806_v54, 4  ;;  %v6956_v28 = vld [vmem:[#allocation2 + $0x90] sm:$0xff]  }
 0x213   : > { %5409 = vmatmul.mubr.bf16.gmra.mrb[100].mxu1 %v6028_v46  ;;  %v3763_v49 = vsel %vm7288_vm9, %v3758_v16, %v3762_v1  ;;  %v6061_v63 = vcombine.low %v3198_v6, %v3201_v51  ;;  %v2811_v5 = vrot.slane %v2809_v57, 5  ;;  %v2817_v40 = vrot.slane %v2815_v58, 5  ;;  %v3063_v34 = vld [vmem:[#allocation2 + $0x94] sm:$0xf]  ;;  %v3064_v57 = vld [vmem:[#allocation2 + $0x98] sm:$0x1] }
 0x214   : > { %v3773_v47 = vsel %vm7288_vm9, %v3768_v61, %v3772_v44  ;;  %v2821_v26 = vrot.slane %v2819_v43, 4  ;;  %v2825_v35 = vshll.u32 %v2549_v20, 16  ;;  %v3775_v19 = vshrl.u32 %v3495_v59, 16  ;;  %v8126_v1 = vpop.f32.mrb[16].mxu1 }
 0x215   : > { %v6093_v3 = vcombine.low %v3763_v49, %v3773_v47  ;;  %5416 = vmatprep.mubr.bf16.mxu1 %v6061_v63  ;;  %v2812_v29 = vor.u32 %v2811_v5, %v2808_v30  ;;  %v3778_v48 = vshll.u32 %v3495_v59, 16  ;;  %v3784_v16 = vshll.u32 %v3496_v56, 16  ;;  %v8128_v51 = vpop.f32.mrb[17].mxu1 }
 0x216   : > { %v2822_v6 = vor.u32 %v2821_v26, %v2817_v40  ;;  %v2827_v46 = vrot.slane %v2825_v35, 5  ;;  %v3788_v54 = vshrl.u32 %v3496_v56, 16  ;;  %v3777_v20 = vrot.slane %v3775_v19, 4  ;;  %v8130_v43 = vpop.f32.mrb[48].mxu0  ;;  %v8132_v49 = vpop.f32.mrb[18].mxu1 }
 0x217   : > { %5577 = vmatprep.mubr.bf16.mxu0 %v6093_v3  ;;  %v2813_v44 = vrot.slane %v2812_v29, 4  ;;  %v3780_v61 = vrot.slane %v3778_v48, 5  ;;  %v3794_v58 = vshll.u32 %v3497_v12, 16  ;;  %v3786_v63 = vrot.slane %v3784_v16, 5  ;;  %v8136_v56 = vpop.f32.mrb[49].mxu0  ;;  %v8138_v47 = vpop.f32.mrb[19].mxu1 }
 0x218   : > { %5578 = vmatmul.mubr.bf16.gmra.mrb[136].mxu0 %v6956_v28  ;;  %v2823_v59 = vrot.slane %v2822_v6, 4  ;;  %v3790_v30 = vrot.slane %v3788_v54, 4  ;;  %v6276_v5 = vadd.f32 %v7901_v45, %v7888_v13  ;;  %8755 = vst [vmem:[#allocation4_spill] sm:$0xff] %v8138_v47  ;;  %v6046_v3 = vrot.slane %v3062_v50, 9  ;;  %v8142_v29 = vpop.f32.mrb[50].mxu0 }
 0x219   : > { %v2818_v26 = vsel %vm7288_vm9, %v2813_v44, %v2817_v40  ;;  %v3781_v35 = vor.u32 %v3780_v61, %v3777_v20  ;;  %v3796_v12 = vrot.slane %v3794_v58, 5  ;;  %v3204_v48 = vrot.slane %v3063_v34, 5  ;;  %v2550_v16 = vld [vmem:[#allocation2 + $0x90] sm:$0xf]  ;;  %v8146_v13 = vpop.f32.mrb[51].mxu0 }
 0x21a   : > { %v2828_v28 = vsel %vm7288_vm9, %v2823_v59, %v2827_v46  ;;  %v3791_v19 = vor.u32 %v3790_v30, %v3786_v63  ;;  %v3207_v6 = vrot.slane %v3064_v57, 5  ;;  %v6279_v47 = vadd.f32 %v7911_v8, %v7907_v55  ;;  %v2551_v50 = vld [vmem:[#allocation2 + $0x94] sm:$0xf]  ;;  %v2552_v58 = vld [vmem:[#allocation2 + $0x98] sm:$0x1] }
 0x21b   : > { %v6029_v45 = vcombine.low %v2818_v26, %v2828_v28  ;;  %v3782_v54 = vrot.slane %v3781_v35, 4  ;;  %v6388_v40 = vadd.f32 %v8012_v17, %v8010_v4  ;;  %v3205_v20 = vsel %vm7376_vm12, %v6046_v3, %v3204_v48  ;;  %v3498_v59 = vld [vmem:[#allocation2 + $0xa8] sm:$0xf]  ;;  %v6958_v26 = vld [vmem:[#allocation2 + $0x9c] sm:$0xff]   ;;  %v3500_v35 = vld [vmem:[#allocation2 + $0xb0] sm:$0x1] }
 0x21c   : > { %v3792_v44 = vrot.slane %v3791_v19, 4  ;;  %v3206_v46 = vrot.slane %v3204_v48, 4  ;;  %v6391_v34 = vadd.f32 %v8018_v41, %v8014_v25  ;;  %v2830_v55 = vshrl.u32 %v2550_v16, 16  ;;  %v3499_v41 = vld [vmem:[#allocation2 + $0xac] sm:$0xf] }
 0x21d   : > { %5417 = vmatmul.mubr.bf16.gmra.mrb[104].mxu1 %v6029_v45  ;;  %v3787_v57 = vsel %vm7288_vm9, %v3782_v54, %v3786_v63  ;;  %v8158_v61 = vadd.f32 %v6388_v40, %v6276_v5  ;;  %v2833_v8 = vshll.u32 %v2550_v16, 16  ;;  %v2839_v25 = vshll.u32 %v2551_v50, 16  ;;  %v3065_v19 = vld [vmem:[#allocation2 + $0x9c] sm:$0xe]  ;;  %v3066_v48 = vld [vmem:[#allocation2 + $0xa0] sm:$0xf] }
 0x21e   : > { %v3797_v4 = vsel %vm7288_vm9, %v3792_v44, %v3796_v12  ;;  %v3208_v17 = vsel %vm7376_vm12, %v3206_v46, %v3207_v6  ;;  %v8164_v30 = vadd.f32 %v6391_v34, %v6279_v47  ;;  %v2832_v5 = vrot.slane %v2830_v55, 4  ;;  %v3067_v12 = vld [vmem:[#allocation2 + $0xa4] sm:$0x1] }
 0x21f   : > { %8756 = vst [vmem:[#allocation5_spill] sm:$0xff] %v8158_v61  ;;  %v6094_v3 = vcombine.low %v3787_v57, %v3797_v4  ;;  %v6062_v63 = vcombine.low %v3205_v20, %v3208_v17  ;;  %v2835_v28 = vrot.slane %v2833_v8, 5  ;;  %v2841_v16 = vrot.slane %v2839_v25, 5  ;;  %v8166_v44 = vpop.f32.mrb[52].mxu0  ;;  %v8168_v6 = vpop.f32.mrb[20].mxu1 }
 0x220   : > { %8757 = vst [vmem:[#allocation6_spill] sm:$0xff] %v8164_v30  ;;  %v2843_v45 = vshrl.u32 %v2551_v50, 16  ;;  %v2849_v54 = vshll.u32 %v2552_v58, 16  ;;  %v3799_v40 = vshrl.u32 %v3498_v59, 16  ;;  %v3802_v46 = vshll.u32 %v3498_v59, 16  ;;  %v8170_v20 = vpop.f32.mrb[53].mxu0 }
 0x221   : > { %5585 = vmatprep.mubr.bf16.mxu0 %v6094_v3  ;;  %5424 = vmatprep.mubr.bf16.mxu1 %v6062_v63  ;;  %v2836_v47 = vor.u32 %v2835_v28, %v2832_v5  ;;  %v3808_v34 = vshll.u32 %v3499_v41, 16  ;;  %v3812_v57 = vshrl.u32 %v3499_v41, 16  ;;  %v8172_v55 = vpop.f32.mrb[21].mxu1  ;;  %v3818_v4 = vshll.u32 %v3500_v35, 16  ;;  %v8174_v17 = vpop.f32.mrb[54].mxu0 }
 0x222   : > { %8758 = vst [vmem:[#allocation7_spill] sm:$0xff] %v8172_v55  ;;  %5586 = vmatmul.mubr.bf16.gmra.mrb[140].mxu0 %v6958_v26  ;;  %v2845_v8 = vrot.slane %v2843_v45, 4  ;;  %v2851_v50 = vrot.slane %v2849_v54, 5  ;;  %v3801_v58 = vrot.slane %v3799_v40, 4  ;;  %8759 = vst [vmem:[#allocation8_spill] sm:$0xff] %v8174_v17  ;;  %v8176_v25 = vpop.f32.mrb[22].mxu1 }
 0x223   : > { %8760 = vst [vmem:[#allocation9_spill] sm:$0xff] %v8176_v25  ;;  %v2837_v30 = vrot.slane %v2836_v47, 4  ;;  %v3804_v3 = vrot.slane %v3802_v46, 5  ;;  %v3810_v63 = vrot.slane %v3808_v34, 5  ;;  %v3814_v5 = vrot.slane %v3812_v57, 4  ;;  %v8178_v59 = vpop.f32.mrb[55].mxu0 }
 0x224   : > { %v8180_v41 = vpop.f32.mrb[23].mxu1  ;;  %v2846_v28 = vor.u32 %v2845_v8, %v2841_v16  ;;  %v3820_v61 = vrot.slane %v3818_v4, 5  ;;  %v6047_v55 = vrot.slane %v3065_v19, 9  ;;  %v3211_v26 = vrot.slane %v3066_v48, 5  ;;  %v2553_v17 = vld [vmem:[#allocation2 + $0x9c] sm:$0xf] }
 0x225   : > { %v2842_v45 = vsel %vm7288_vm9, %v2837_v30, %v2841_v16  ;;  %v3805_v35 = vor.u32 %v3804_v3, %v3801_v58  ;;  %v3815_v54 = vor.u32 %v3814_v5, %v3810_v63  ;;  %v3214_v40 = vrot.slane %v3067_v12, 5  ;;  %v2555_v58 = vld [vmem:[#allocation2 + $0xa4] sm:$0x1] }
 0x226   : > { %v2847_v25 = vrot.slane %v2846_v28, 4  ;;  %v3212_v47 = vsel %vm7376_vm12, %v6047_v55, %v3211_v26  ;;  %v3213_v46 = vrot.slane %v3211_v26, 4  ;;  %v6394_v34 = vadd.f32 %v8042_v38, %v8038_v36  ;;  %v2554_v55 = vld [vmem:[#allocation2 + $0xa0] sm:$0xf]  ;;  %v6959_v28 = vld [vmem:[#allocation2 + $0xa8] sm:$0xff]  }
 0x227   : > { %v3806_v57 = vrot.slane %v3805_v35, 4  ;;  %v3816_v8 = vrot.slane %v3815_v54, 4  ;;  %v6282_v19 = vadd.f32 %v8050_v14, %v8046_v7  ;;  %v6397_v30 = vadd.f32 %v8052_v11, %v8048_v22  ;;  %v3501_v14 = vld [vmem:[#allocation2 + $0xb4] sm:$0xf]  ;;  %v3502_v11 = vld [vmem:[#allocation2 + $0xb8] sm:$0xf] }
 0x228   : > { %v2852_v48 = vsel %vm7288_vm9, %v2847_v25, %v2851_v50  ;;  %v3215_v16 = vsel %vm7376_vm12, %v3213_v46, %v3214_v40  ;;  %v6285_v12 = vadd.f32 %v8056_v9, %v8054_v32  ;;  %v2854_v36 = vshrl.u32 %v2553_v17, 16  ;;  %v3503_v32 = vld [vmem:[#allocation2 + $0xbc] sm:$0x1]  ;;  %v3068_v9 = vld [vmem:[#allocation2 + $0xa8] sm:$0xe] }
 0x229   : > { %v6030_v38 = vcombine.low %v2842_v45, %v2852_v48  ;;  %v3811_v4 = vsel %vm7288_vm9, %v3806_v57, %v3810_v63  ;;  %v3821_v7 = vsel %vm7288_vm9, %v3816_v8, %v3820_v61  ;;  %v6063_v22 = vcombine.low %v3212_v47, %v3215_v16  ;;  %v3069_v54 = vld [vmem:[#allocation2 + $0xac] sm:$0xf]  ;;  %v3070_v40 = vld [vmem:[#allocation2 + $0xb0] sm:$0x1] }
 0x22a   : > { %v6095_v50 = vcombine.low %v3811_v4, %v3821_v7  ;;  %v8202_v25 = vadd.f32 %v6394_v34, %v6282_v19  ;;  %v8204_v3 = vadd.f32 %v6397_v30, %v6285_v12  ;;  %v2856_v5 = vrot.slane %v2854_v36, 4  ;;  %v8206_v61 = vpop.f32.mrb[24].mxu1 }
 0x22b   : > { %5425 = vmatmul.mubr.bf16.gmra.mrb[108].mxu1 %v6030_v38  ;;  %v2857_v26 = vshll.u32 %v2553_v17, 16  ;;  %v2863_v45 = vshll.u32 %v2554_v55, 16  ;;  %v2867_v35 = vshrl.u32 %v2554_v55, 16  ;;  %v2873_v63 = vshll.u32 %v2555_v58, 16  ;;  %v8208_v8 = vpop.f32.mrb[25].mxu1 }
 0x22c   : > { %8761 = vst [vmem:[#allocation10_spill] sm:$0xff] %v8202_v25  ;;  %8762 = vst [vmem:[#allocation11_spill] sm:$0xff] %v8204_v3  ;;  %5593 = vmatprep.mubr.bf16.mxu0 %v6095_v50  ;;  %5432 = vmatprep.mubr.bf16.mxu1 %v6063_v22  ;;  %v3823_v47 = vshrl.u32 %v3501_v14, 16  ;;  %v3826_v46 = vshll.u32 %v3501_v14, 16  ;;  %v3832_v34 = vshll.u32 %v3502_v11, 16  ;;  %v3836_v57 = vshrl.u32 %v3502_v11, 16 }
 0x22d   : > { %5594 = vmatmul.mubr.bf16.gmra.mrb[144].mxu0 %v6959_v28  ;;  %v2859_v19 = vrot.slane %v2857_v26, 5  ;;  %v2865_v30 = vrot.slane %v2863_v45, 5  ;;  %v2869_v48 = vrot.slane %v2867_v35, 4  ;;  %v2875_v17 = vrot.slane %v2873_v63, 5  ;;  %v8210_v16 = vpop.f32.mrb[26].mxu1 }
 0x22e   : > { %v3825_v12 = vrot.slane %v3823_v47, 4  ;;  %v3828_v55 = vrot.slane %v3826_v46, 5  ;;  %v3834_v58 = vrot.slane %v3832_v34, 5  ;;  %v3838_v36 = vrot.slane %v3836_v57, 4  ;;  %v8212_v38 = vpop.f32.mrb[27].mxu1  ;;  %v8214_v11 = vpop.f32.mrb[56].mxu0 }
 0x22f   : > { %v2860_v4 = vor.u32 %v2859_v19, %v2856_v5  ;;  %v2870_v7 = vor.u32 %v2869_v48, %v2865_v30  ;;  %v3842_v22 = vshll.u32 %v3503_v32, 16  ;;  %v6048_v14 = vrot.slane %v3068_v9, 9  ;;  %v8216_v35 = vpop.f32.mrb[57].mxu0 }
 0x230   : > { %v3829_v50 = vor.u32 %v3828_v55, %v3825_v12  ;;  %v3839_v28 = vor.u32 %v3838_v36, %v3834_v58  ;;  %v3218_v26 = vrot.slane %v3069_v54, 5  ;;  %v3221_v45 = vrot.slane %v3070_v40, 5  ;;  %v8220_v34 = vpop.f32.mrb[58].mxu0  ;;  %v2557_v12 = vld [vmem:[#allocation2 + $0xac] sm:$0xf] }
 0x231   : > { %v2861_v63 = vrot.slane %v2860_v4, 4  ;;  %v2871_v3 = vrot.slane %v2870_v7, 4  ;;  %v3844_v47 = vrot.slane %v3842_v22, 5  ;;  %v6400_v46 = vadd.f32 %v8080_v23, %v8078_v52  ;;  %v8224_v19 = vpop.f32.mrb[59].mxu0  ;;  %v2556_v23 = vld [vmem:[#allocation2 + $0xa8] sm:$0xf] }
 0x232   : > { %v3830_v5 = vrot.slane %v3829_v50, 4  ;;  %v3840_v57 = vrot.slane %v3839_v28, 4  ;;  %v3219_v32 = vsel %vm7376_vm12, %v6048_v14, %v3218_v26  ;;  %v3220_v9 = vrot.slane %v3218_v26, 4  ;;  %v2558_v7 = vld [vmem:[#allocation2 + $0xb0] sm:$0x1] }
 0x233   : > { %v2866_v54 = vsel %vm7288_vm9, %v2861_v63, %v2865_v30  ;;  %v2876_v40 = vsel %vm7288_vm9, %v2871_v3, %v2875_v17  ;;  %v6288_v48 = vadd.f32 %v8070_v10, %v8064_v62  ;;  %v6403_v52 = vadd.f32 %v8090_v2, %v8084_v42  ;;  %v3504_v3 = vld [vmem:[#allocation2 + $0xc0] sm:$0xf]  ;;  %v6961_v42 = vld [vmem:[#allocation2 + $0xb4] sm:$0xff]   ;;  %v3505_v2 = vld [vmem:[#allocation2 + $0xc4] sm:$0xf] }
 0x234   : > { %v6031_v55 = vcombine.low %v2866_v54, %v2876_v40  ;;  %v3835_v36 = vsel %vm7288_vm9, %v3830_v5, %v3834_v58  ;;  %v3845_v4 = vsel %vm7288_vm9, %v3840_v57, %v3844_v47  ;;  %v3222_v30 = vsel %vm7376_vm12, %v3220_v9, %v3221_v45  ;;  %v3506_v14 = vld [vmem:[#allocation2 + $0xc8] sm:$0x1]  ;;  %v3071_v63 = vld [vmem:[#allocation2 + $0xb4] sm:$0xe]  ;;  %v3072_v57 = vld [vmem:[#allocation2 + $0xb8] sm:$0xf] }
 0x235   : > { %v6096_v17 = vcombine.low %v3835_v36, %v3845_v4  ;;  %v6064_v22 = vcombine.low %v3219_v32, %v3222_v30  ;;  %v8240_v62 = vadd.f32 %v6400_v46, %v6288_v48  ;;  %v6291_v10 = vadd.f32 %v8076_v53, %v8074_v27 }
 0x236   : > { %5433 = vmatmul.mubr.bf16.gmra.mrb[112].mxu1 %v6031_v55  ;;  %v2878_v58 = vshrl.u32 %v2556_v23, 16  ;;  %v2881_v50 = vshll.u32 %v2556_v23, 16  ;;  %v2887_v28 = vshll.u32 %v2557_v12, 16  ;;  %v2891_v26 = vshrl.u32 %v2557_v12, 16  ;;  %v8246_v32 = vpop.f32.mrb[60].mxu0 }
 0x237   : > { %8763 = vst [vmem:[#allocation12_spill] sm:$0xff] %v8240_v62  ;;  %5601 = vmatprep.mubr.bf16.mxu0 %v6096_v17  ;;  %5440 = vmatprep.mubr.bf16.mxu1 %v6064_v22  ;;  %v8244_v45 = vadd.f32 %v6403_v52, %v6291_v10  ;;  %v2897_v47 = vshll.u32 %v2558_v7, 16  ;;  %v3847_v5 = vshrl.u32 %v3504_v3, 16  ;;  %v3850_v46 = vshll.u32 %v3504_v3, 16  ;;  %v8248_v40 = vpop.f32.mrb[28].mxu1  ;;  %v8250_v48 = vpop.f32.mrb[61].mxu0 }
 0x238   : > { %5602 = vmatmul.mubr.bf16.gmra.mrb[148].mxu0 %v6961_v42  ;;  %v2880_v27 = vrot.slane %v2878_v58, 4  ;;  %v2883_v53 = vrot.slane %v2881_v50, 5  ;;  %v2889_v9 = vrot.slane %v2887_v28, 5  ;;  %v2893_v54 = vrot.slane %v2891_v26, 4  ;;  %v8252_v36 = vpop.f32.mrb[29].mxu1  ;;  %v8254_v4 = vpop.f32.mrb[62].mxu0 }
 0x239   : > { %8764 = vst [vmem:[#allocation13_spill] sm:$0xff] %v8244_v45  ;;  %v2899_v23 = vrot.slane %v2897_v47, 5  ;;  %v3849_v12 = vrot.slane %v3847_v5, 4  ;;  %v3852_v55 = vrot.slane %v3850_v46, 5  ;;  %v3856_v52 = vshll.u32 %v3505_v2, 16  ;;  %v8256_v10 = vpop.f32.mrb[30].mxu1 }
 0x23a   : > { %v2884_v30 = vor.u32 %v2883_v53, %v2880_v27  ;;  %v2894_v7 = vor.u32 %v2893_v54, %v2889_v9  ;;  %v3860_v3 = vshrl.u32 %v3505_v2, 16  ;;  %v3866_v17 = vshll.u32 %v3506_v14, 16  ;;  %v3073_v22 = vld [vmem:[#allocation2 + $0xbc] sm:$0x1]  ;;  %v8258_v42 = vpop.f32.mrb[63].mxu0  ;;  %v8260_v47 = vpop.f32.mrb[31].mxu1 }
 0x23b   : > { %v3853_v58 = vor.u32 %v3852_v55, %v3849_v12  ;;  %v3858_v50 = vrot.slane %v3856_v52, 5  ;;  %v6049_v28 = vrot.slane %v3071_v63, 9  ;;  %v3225_v26 = vrot.slane %v3072_v57, 5  ;;  %v2559_v12 = vld [vmem:[#allocation2 + $0xb4] sm:$0xf] }
 0x23c   : > { %v2885_v5 = vrot.slane %v2884_v30, 4  ;;  %v2895_v46 = vrot.slane %v2894_v7, 4  ;;  %v3862_v45 = vrot.slane %v3860_v3, 4  ;;  %v3868_v62 = vrot.slane %v3866_v17, 5  ;;  %v2560_v55 = vld [vmem:[#allocation2 + $0xb8] sm:$0xf] }
 0x23d   : > { %v3854_v25 = vrot.slane %v3853_v58, 4  ;;  %v3226_v2 = vsel %vm7376_vm12, %v6049_v28, %v3225_v26  ;;  %v3227_v14 = vrot.slane %v3225_v26, 4  ;;  %v3228_v27 = vrot.slane %v3073_v22, 5  ;;  %v3075_v28 = vld [vmem:[#allocation2 + $0xc4] sm:$0xf] }
 0x23e   : > { %v2890_v53 = vsel %vm7288_vm9, %v2885_v5, %v2889_v9  ;;  %v2900_v54 = vsel %vm7288_vm9, %v2895_v46, %v2899_v23  ;;  %v3863_v63 = vor.u32 %v3862_v45, %v3858_v50  ;;  %v6406_v57 = vadd.f32 %v8102_v0, %v8098_v18  ;;  %v2561_v9 = vld [vmem:[#allocation2 + $0xbc] sm:$0x1]  ;;  %v3074_v0 = vld [vmem:[#allocation2 + $0xc0] sm:$0xe] }
 0x23f   : > { %v6032_v52 = vcombine.low %v2890_v53, %v2900_v54  ;;  %v3859_v30 = vsel %vm7288_vm9, %v3854_v25, %v3858_v50  ;;  %v3229_v7 = vsel %vm7376_vm12, %v3227_v14, %v3228_v27  ;;  %v6294_v3 = vadd.f32 %v8104_v21, %v8100_v39  ;;  %v6962_v26 = vld [vmem:[#allocation2 + $0xc0] sm:$0xff]   ;;  %v3507_v27 = vld [vmem:[#allocation2 + $0xcc] sm:$0xf] }
 0x240   : > { %v3864_v17 = vrot.slane %v3863_v63, 4  ;;  %v6065_v22 = vcombine.low %v3226_v2, %v3229_v7  ;;  %v6409_v45 = vadd.f32 %v8110_v31, %v8106_v37  ;;  %v6297_v18 = vadd.f32 %v8112_v60, %v8108_v15  ;;  %v3076_v31 = vld [vmem:[#allocation2 + $0xc8] sm:$0x1] }
 0x241   : > { %5441 = vmatmul.mubr.bf16.gmra.mrb[116].mxu1 %v6032_v52  ;;  %v8280_v23 = vadd.f32 %v6406_v57, %v6294_v3  ;;  %v2902_v25 = vshrl.u32 %v2559_v12, 16  ;;  %v2905_v58 = vshll.u32 %v2559_v12, 16  ;;  %v2911_v50 = vshll.u32 %v2560_v55, 16  ;;  %v8286_v46 = vpop.f32.mrb[32].mxu1 }
 0x242   : > { %v3869_v39 = vsel %vm7288_vm9, %v3864_v17, %v3868_v62  ;;  %5448 = vmatprep.mubr.bf16.mxu1 %v6065_v22  ;;  %v8284_v21 = vadd.f32 %v6409_v45, %v6297_v18  ;;  %v2915_v5 = vshrl.u32 %v2560_v55, 16  ;;  %v2921_v37 = vshll.u32 %v2561_v9, 16  ;;  %v8288_v53 = vpop.f32.mrb[33].mxu1  ;;  %v3508_v9 = vld [vmem:[#allocation2 + $0xd0] sm:$0xf] }
 0x243   : > { %8765 = vst [vmem:[#allocation14_spill] sm:$0xff] %v8280_v23  ;;  %v6097_v15 = vcombine.low %v3859_v30, %v3869_v39  ;;  %v2904_v60 = vrot.slane %v2902_v25, 4  ;;  %v2907_v2 = vrot.slane %v2905_v58, 5  ;;  %v2913_v14 = vrot.slane %v2911_v50, 5  ;;  %v8290_v12 = vpop.f32.mrb[64].mxu0  ;;  %v8292_v52 = vpop.f32.mrb[34].mxu1 }
 0x244   : > { %8766 = vst [vmem:[#allocation15_spill] sm:$0xff] %v8284_v21  ;;  %v2917_v54 = vrot.slane %v2915_v5, 4  ;;  %v2923_v63 = vrot.slane %v2921_v37, 5  ;;  %v6050_v57 = vrot.slane %v3074_v0, 9  ;;  %v3232_v62 = vrot.slane %v3075_v28, 5  ;;  %v8298_v17 = vpop.f32.mrb[65].mxu0 }
 0x245   : > { %5609 = vmatprep.mubr.bf16.mxu0 %v6097_v15  ;;  %v2908_v55 = vor.u32 %v2907_v2, %v2904_v60  ;;  %v3235_v7 = vrot.slane %v3076_v31, 5  ;;  %v6412_v30 = vadd.f32 %v8136_v56, %v8130_v43  ;;  %v6300_v3 = vadd.f32 %v8128_v51, %v8126_v1  ;;  %v8300_v22 = vpop.f32.mrb[35].mxu1  ;;  %v8306_v58 = vpop.f32.mrb[66].mxu0  ;;  %v8768_v1 = vld [vmem:[#allocation4_spill] sm:$0xff]  ;;  %v3509_v50 = vld [vmem:[#allocation2 + $0xd4] sm:$0x1] }
 0x246   : > { %5610 = vmatmul.mubr.bf16.gmra.mrb[152].mxu0 %v6962_v26  ;;  %v2918_v45 = vor.u32 %v2917_v54, %v2913_v14  ;;  %v3233_v18 = vsel %vm7376_vm12, %v6050_v57, %v3232_v62  ;;  %v3234_v0 = vrot.slane %v3232_v62, 4  ;;  %v6415_v25 = vadd.f32 %v8146_v13, %v8142_v29  ;;  %v8312_v39 = vpop.f32.mrb[67].mxu0  ;;  %v2562_v15 = vld [vmem:[#allocation2 + $0xc0] sm:$0xf]  ;;  %v2563_v54 = vld [vmem:[#allocation2 + $0xc4] sm:$0xf] }
 0x247   : > { %v2909_v43 = vrot.slane %v2908_v55, 4  ;;  %v8308_v56 = vadd.f32 %v6412_v30, %v6300_v3  ;;  %v6303_v51 = vadd.f32 %v8768_v1, %v8132_v49  ;;  %v3871_v28 = vshrl.u32 %v3507_v27, 16  ;;  %v2564_v49 = vld [vmem:[#allocation2 + $0xc8] sm:$0x1]  ;;  %v3974_v3 = vld [vmem:[#allocation2 + $0x18] sm:$0xe] }
 0x248   : > { %v2919_v26 = vrot.slane %v2918_v45, 4  ;;  %v3236_v5 = vsel %vm7376_vm12, %v3234_v0, %v3235_v7  ;;  %v3874_v37 = vshll.u32 %v3507_v27, 16  ;;  %v3880_v31 = vshll.u32 %v3508_v9, 16  ;;  %v3975_v7 = vld [vmem:[#allocation2 + $0x1c] sm:$0xf] }
 0x249   : > { %8767 = vst [vmem:[#allocation16_spill] sm:$0xff] %v8308_v56  ;;  %v2914_v29 = vsel %vm7288_vm9, %v2909_v43, %v2913_v14  ;;  %v6066_v13 = vcombine.low %v3233_v18, %v3236_v5  ;;  %v8318_v60 = vadd.f32 %v6415_v25, %v6303_v51  ;;  %v3873_v2 = vrot.slane %v3871_v28, 4  ;;  %v3976_v56 = vld [vmem:[#allocation2 + $0x20] sm:$0x1]  ;;  %v3980_v51 = vld [vmem:[#allocation2 + $0x30] sm:$0xe] }
 0x24a   : > { %v2924_v57 = vsel %vm7288_vm9, %v2919_v26, %v2923_v63  ;;  %v3876_v62 = vrot.slane %v3874_v37, 5  ;;  %v3882_v55 = vrot.slane %v3880_v31, 5  ;;  %v3884_v30 = vshrl.u32 %v3508_v9, 16  ;;  %v3981_v26 = vld [vmem:[#allocation2 + $0x34] sm:$0xf] }
 0x24b   : > { %8769 = vst [vmem:[#allocation4_spill] sm:$0xff] %v8318_v60  ;;  %v6033_v27 = vcombine.low %v2914_v29, %v2924_v57  ;;  %v3890_v45 = vshll.u32 %v3509_v50, 16  ;;  %v2926_v0 = vshrl.u32 %v2562_v15, 16  ;;  %v2929_v1 = vshll.u32 %v2562_v15, 16  ;;  %v3982_v50 = vld [vmem:[#allocation2 + $0x38] sm:$0x1] }
 0x24c   : > { %v3877_v14 = vor.u32 %v3876_v62, %v3873_v2  ;;  %v3886_v18 = vrot.slane %v3884_v30, 4  ;;  %v2935_v25 = vshll.u32 %v2563_v54, 16  ;;  %v2939_v43 = vshrl.u32 %v2563_v54, 16  ;;  %v3978_v21 = vld [vmem:[#allocation2 + $0x28] sm:$0xf] }
 0x24d   : > { %5449 = vmatmul.mubr.bf16.gmra.mrb[120].mxu1 %v6033_v27  ;;  %v3892_v28 = vrot.slane %v3890_v45, 5  ;;  %v2928_v5 = vrot.slane %v2926_v0, 4  ;;  %v2931_v60 = vrot.slane %v2929_v1, 5  ;;  %v2945_v63 = vshll.u32 %v2564_v49, 16  ;;  %v3979_v23 = vld [vmem:[#allocation2 + $0x2c] sm:$0x1] }
 0x24e   : > { %5456 = vmatprep.mubr.bf16.mxu1 %v6066_v13  ;;  %v3878_v9 = vrot.slane %v3877_v14, 4  ;;  %v3887_v37 = vor.u32 %v3886_v18, %v3882_v55  ;;  %v2937_v31 = vrot.slane %v2935_v25, 5  ;;  %v2941_v29 = vrot.slane %v2939_v43, 4  ;;  %v8322_v57 = vpop.f32.mrb[68].mxu0  ;;  %v8324_v54 = vpop.f32.mrb[36].mxu1 }
 0x24f   : > { %v2932_v15 = vor.u32 %v2931_v60, %v2928_v5  ;;  %v2947_v2 = vrot.slane %v2945_v63, 5  ;;  %v6099_v62 = vrot.slane %v3974_v3, 9  ;;  %v4072_v30 = vrot.slane %v3975_v7, 5  ;;  %v8326_v27 = vpop.f32.mrb[69].mxu0  ;;  %v8330_v1 = vpop.f32.mrb[37].mxu1  ;;  %v6964_v5 = vld [vmem:[#allocation2 + $0xcc] sm:$0xff]  }
 0x250   : > { %v3883_v49 = vsel %vm7288_vm9, %v3878_v9, %v3882_v55  ;;  %v3888_v45 = vrot.slane %v3887_v37, 4  ;;  %v2942_v13 = vor.u32 %v2941_v29, %v2937_v31  ;;  %v4075_v0 = vrot.slane %v3976_v56, 5  ;;  %v8332_v14 = vpop.f32.mrb[70].mxu0  ;;  %v8336_v25 = vpop.f32.mrb[38].mxu1 }
 0x251   : > { %v2933_v18 = vrot.slane %v2932_v15, 4  ;;  %v4073_v60 = vsel %vm7376_vm12, %v6099_v62, %v4072_v30  ;;  %v4074_v3 = vrot.slane %v4072_v30, 4  ;;  %v6101_v7 = vrot.slane %v3980_v51, 9  ;;  %v8338_v43 = vpop.f32.mrb[71].mxu0  ;;  %v8342_v37 = vpop.f32.mrb[39].mxu1 }
 0x252   : > { %v3893_v55 = vsel %vm7288_vm9, %v3888_v45, %v3892_v28  ;;  %v2943_v63 = vrot.slane %v2942_v13, 4  ;;  %v4086_v56 = vrot.slane %v3981_v26, 5  ;;  %v4089_v9 = vrot.slane %v3982_v50, 5  ;;  %v3977_v30 = vld [vmem:[#allocation2 + $0x24] sm:$0xe] }
 0x253   : > { %v6098_v29 = vcombine.low %v3883_v49, %v3893_v55  ;;  %v2938_v15 = vsel %vm7288_vm9, %v2933_v18, %v2937_v31  ;;  %v4076_v51 = vsel %vm7376_vm12, %v4074_v3, %v4075_v0  ;;  %v6418_v62 = vadd.f32 %v8170_v20, %v8166_v44  ;;  %v3983_v45 = vld [vmem:[#allocation2 + $0x3c] sm:$0xe]  ;;  %v3984_v13 = vld [vmem:[#allocation2 + $0x40] sm:$0xf]  ;;  %v8770_v0 = vld [vmem:[#allocation7_spill] sm:$0xff] }
 0x254   : > { %v2948_v28 = vsel %vm7288_vm9, %v2943_v63, %v2947_v2  ;;  %v6115_v26 = vcombine.low %v4073_v60, %v4076_v51  ;;  %v4087_v50 = vsel %vm7376_vm12, %v6101_v7, %v4086_v56  ;;  %v4088_v49 = vrot.slane %v4086_v56, 4  ;;  %v8771_v3 = vld [vmem:[#allocation8_spill] sm:$0xff]  ;;  %v8772_v20 = vld [vmem:[#allocation9_spill] sm:$0xff]  ;;  %v3986_v2 = vld [vmem:[#allocation2 + $0x48] sm:$0xe] }
 0x255   : > { %5617 = vmatprep.mubr.bf16.mxu0 %v6098_v29  ;;  %v6034_v31 = vcombine.low %v2938_v15, %v2948_v28  ;;  %v6306_v18 = vadd.f32 %v8770_v0, %v8168_v6  ;;  %v6421_v44 = vadd.f32 %v8178_v59, %v8771_v3  ;;  %v6309_v55 = vadd.f32 %v8180_v41, %v8772_v20  ;;  %v3987_v60 = vld [vmem:[#allocation2 + $0x4c] sm:$0xf]  ;;  %v3988_v15 = vld [vmem:[#allocation2 + $0x50] sm:$0x1] }
 0x256   : > { %5618 = vmatmul.mubr.bf16.gmra.mrb[156].mxu0 %v6964_v5  ;;  %v4090_v7 = vsel %vm7376_vm12, %v4088_v49, %v4089_v9  ;;  %v6100_v63 = vrot.slane %v3977_v30, 9  ;;  %v4079_v56 = vrot.slane %v3978_v21, 5  ;;  %v4082_v29 = vrot.slane %v3979_v23, 5 }
 0x257   : > { %5457 = vmatmul.mubr.bf16.gmra.mrb[124].mxu1 %v6034_v31  ;;  %6784 = vmatprep.mubr.bf16.mxu0 %v6115_v26  ;;  %v6117_v6 = vcombine.low %v4087_v50, %v4090_v7  ;;  %v8362_v51 = vadd.f32 %v6418_v62, %v6306_v18  ;;  %v8364_v59 = vadd.f32 %v6421_v44, %v6309_v55  ;;  %v6102_v28 = vrot.slane %v3983_v45, 9  ;;  %v8368_v20 = vpop.f32.mrb[40].mxu1  ;;  %v3989_v62 = vld [vmem:[#allocation2 + $0x54] sm:$0xe]  ;;  %v3990_v31 = vld [vmem:[#allocation2 + $0x58] sm:$0xf] }
 0x258   : > { %v4080_v41 = vsel %vm7376_vm12, %v6100_v63, %v4079_v56  ;;  %v4081_v0 = vrot.slane %v4079_v56, 4  ;;  %v4093_v5 = vrot.slane %v3984_v13, 5  ;;  %v4096_v3 = vrot.slane %v3985_v24, 5  ;;  %v8372_v26 = vpop.f32.mrb[41].mxu1  ;;  %v3991_v18 = vld [vmem:[#allocation2 + $0x5c] sm:$0x1] }
 0x259   : > { %6788 = vmatprep.mubr.bf16.mxu1 %v6117_v6  ;;  %v6103_v21 = vrot.slane %v3986_v2, 9  ;;  %v4100_v23 = vrot.slane %v3987_v60, 5  ;;  %v4103_v9 = vrot.slane %v3988_v15, 5  ;;  %v6424_v30 = vadd.f32 %v8216_v35, %v8214_v11  ;;  %v8380_v44 = vpop.f32.mrb[42].mxu1  ;;  %v3993_v2 = vld [vmem:[#allocation2 + $0x64] sm:$0xf] }
 0x25a   : > { %v4083_v50 = vsel %vm7376_vm12, %v4081_v0, %v4082_v29  ;;  %v4094_v49 = vsel %vm7376_vm12, %v6102_v28, %v4093_v5  ;;  %v4095_v45 = vrot.slane %v4093_v5, 4  ;;  %v6312_v13 = vadd.f32 %v8208_v8, %v8206_v61  ;;  %v8386_v60 = vpop.f32.mrb[43].mxu1  ;;  %v3992_v56 = vld [vmem:[#allocation2 + $0x60] sm:$0xe]  ;;  %v3994_v29 = vld [vmem:[#allocation2 + $0x68] sm:$0x1] }
 0x25b   : > { %v6116_v55 = vcombine.low %v4080_v41, %v4083_v50  ;;  %v4101_v11 = vsel %vm7376_vm12, %v6103_v21, %v4100_v23  ;;  %v4102_v35 = vrot.slane %v4100_v23, 4  ;;  %v6427_v24 = vadd.f32 %v8224_v19, %v8220_v34 }
 0x25c   : > { %v4097_v7 = vsel %vm7376_vm12, %v4095_v45, %v4096_v3  ;;  %v8390_v63 = vadd.f32 %v6424_v30, %v6312_v13  ;;  %v6315_v61 = vadd.f32 %v8212_v38, %v8210_v16  ;;  %v6104_v8 = vrot.slane %v3989_v62, 9  ;;  %v8396_v19 = vpop.f32.mrb[72].mxu0  ;;  %v3996_v3 = vld [vmem:[#allocation2 + $0x70] sm:$0xf]  ;;  %v3995_v45 = vld [vmem:[#allocation2 + $0x6c] sm:$0xe] }
 0x25d   : > { %v6118_v15 = vcombine.low %v4094_v49, %v4097_v7  ;;  %v4104_v6 = vsel %vm7376_vm12, %v4102_v35, %v4103_v9  ;;  %v4107_v28 = vrot.slane %v3990_v31, 5  ;;  %v4110_v34 = vrot.slane %v3991_v18, 5  ;;  %v8400_v21 = vpop.f32.mrb[73].mxu0 }
 0x25e   : > { %6785 = vmatmul.mubr.bf16.vlgmr.msra.gmra.mrb[160].mxu0 %v6116_v55  ;;  %v6119_v41 = vcombine.low %v4101_v11, %v4104_v6  ;;  %v8398_v0 = vadd.f32 %v6427_v24, %v6315_v61  ;;  %v4114_v5 = vrot.slane %v3993_v2, 5  ;;  %v6105_v38 = vrot.slane %v3992_v56, 9  ;;  %v8404_v9 = vpop.f32.mrb[74].mxu0  ;;  %v3999_v11 = vld [vmem:[#allocation2 + $0x7c] sm:$0xf] }
 0x25f   : > { %6789 = vmatmul.mubr.bf16.vlgmr.msra.gmra.mrb[128].mxu1 %v6118_v15  ;;  %v4109_v16 = vrot.slane %v4107_v28, 4  ;;  %v4117_v23 = vrot.slane %v3994_v29, 5  ;;  %v6430_v30 = vadd.f32 %v8250_v48, %v8246_v32  ;;  %v6318_v50 = vadd.f32 %v8252_v36, %v8248_v40  ;;  %v8410_v13 = vpop.f32.mrb[75].mxu0  ;;  %v3997_v48 = vld [vmem:[#allocation2 + $0x74] sm:$0x1] }
 0x260   : > { %6792 = vmatprep.mubr.bf16.mxu1 %v6119_v41  ;;  %v4116_v62 = vrot.slane %v4114_v5, 4  ;;  %v6433_v49 = vadd.f32 %v8258_v42, %v8254_v4  ;;  %v4108_v31 = vsel %vm7376_vm12, %v6104_v8, %v4107_v28  ;;  %v6321_v32 = vadd.f32 %v8260_v47, %v8256_v10  ;;  %v3998_v24 = vld [vmem:[#allocation2 + $0x78] sm:$0xe]  ;;  %v4000_v61 = vld [vmem:[#allocation2 + $0x80] sm:$0x1] }
 0x261   : > { %v4111_v18 = vsel %vm7376_vm12, %v4109_v16, %v4110_v34  ;;  %v4121_v55 = vrot.slane %v3996_v3, 5  ;;  %v8418_v35 = vadd.f32 %v6430_v30, %v6318_v50  ;;  %v4115_v40 = vsel %vm7376_vm12, %v6105_v38, %v4114_v5  ;;  %v4001_v30 = vld [vmem:[#allocation2 + $0x84] sm:$0xe] }
 0x262   : > { %v4118_v36 = vsel %vm7376_vm12, %v4116_v62, %v4117_v23  ;;  %v8424_v4 = vadd.f32 %v6433_v49, %v6321_v32  ;;  %v6106_v42 = vrot.slane %v3995_v45, 9  ;;  %v6120_v2 = vcombine.low %v4108_v31, %v4111_v18  ;;  %v4003_v49 = vld [vmem:[#allocation2 + $0x8c] sm:$0x1]  ;;  %v4004_v31 = vld [vmem:[#allocation2 + $0x90] sm:$0xe] }
 0x263   : > { %v4124_v7 = vrot.slane %v3997_v48, 5  ;;  %v4128_v8 = vrot.slane %v3999_v11, 5  ;;  %v6436_v10 = vadd.f32 %v8298_v17, %v8290_v12  ;;  %v4123_v47 = vrot.slane %v4121_v55, 4  ;;  %v4006_v11 = vld [vmem:[#allocation2 + $0x98] sm:$0x1] }
 0x264   : > { %v6324_v56 = vadd.f32 %v8288_v53, %v8286_v46  ;;  %v6439_v29 = vadd.f32 %v8312_v39, %v8306_v58  ;;  %v6327_v15 = vadd.f32 %v8300_v22, %v8292_v52  ;;  %v6121_v28 = vcombine.low %v4115_v40, %v4118_v36  ;;  %v4002_v53 = vld [vmem:[#allocation2 + $0x88] sm:$0xf]  ;;  %v4005_v52 = vld [vmem:[#allocation2 + $0x94] sm:$0xf] }
 0x265   : > { %v8434_v6 = vpop.f32.mrb[76].mxu0  ;;  %v6107_v34 = vrot.slane %v3998_v24, 9  ;;  %v4130_v12 = vrot.slane %v4128_v8, 4  ;;  %v4131_v17 = vrot.slane %v4000_v61, 5  ;;  %v4122_v38 = vsel %vm7376_vm12, %v6106_v42, %v4121_v55  ;;  %v4008_v61 = vld [vmem:[#allocation2 + $0xa0] sm:$0xf] }
 0x266   : > { %v8436_v41 = vpop.f32.mrb[44].mxu1  ;;  %v8438_v5 = vpop.f32.mrb[77].mxu0  ;;  %v8440_v3 = vadd.f32 %v6436_v10, %v6324_v56  ;;  %v8442_v46 = vadd.f32 %v6439_v29, %v6327_v15  ;;  %v4125_v23 = vsel %vm7376_vm12, %v4123_v47, %v4124_v7  ;;  %v6442_v62 = vadd.f32 %v8326_v27, %v8322_v57 }
 0x267   : > { %6793 = vmatmul.mubr.bf16.gmra.mrb[132].mxu1 %v6120_v2  ;;  %v6341_v58 = vpop.f32.mrb[45].mxu1  ;;  %v6455_v39 = vpop.f32.mrb[78].mxu0  ;;  %v4135_v45 = vrot.slane %v4002_v53, 5  ;;  %v6330_v18 = vadd.f32 %v8330_v1, %v8324_v54  ;;  %v6445_v32 = vadd.f32 %v8338_v43, %v8332_v14  ;;  %v4129_v48 = vsel %vm7376_vm12, %v6107_v34, %v4128_v8 }
 0x268   : > { %6796 = vmatprep.mubr.bf16.mxu1 %v6121_v28  ;;  %v6343_v22 = vpop.f32.mrb[46].mxu1  ;;  %v6456_v16 = vpop.f32.mrb[79].mxu0  ;;  %v4132_v55 = vsel %vm7376_vm12, %v4130_v12, %v4131_v17  ;;  %v4142_v40 = vrot.slane %v4005_v52, 5  ;;  %v6333_v57 = vadd.f32 %v8342_v37, %v8336_v25  ;;  %v6122_v27 = vcombine.low %v4122_v38, %v4125_v23  ;;  %v4007_v37 = vld [vmem:[#allocation2 + $0x9c] sm:$0xe] }
 0x269   : > { %v6344_v50 = vpop.f32.mrb[47].mxu1  ;;  %v8460_v36 = vadd.f32 %v6442_v62, %v6330_v18  ;;  %v6108_v42 = vrot.slane %v4001_v30, 9  ;;  %v4138_v24 = vrot.slane %v4003_v49, 5  ;;  %v6109_v54 = vrot.slane %v4004_v31, 9  ;;  %v4011_v12 = vld [vmem:[#allocation2 + $0xac] sm:$0xf] }
 0x26a   : > { %v8462_v1 = vadd.f32 %v6445_v32, %v6333_v57  ;;  %v6123_v43 = vcombine.low %v4129_v48, %v4132_v55  ;;  %v4137_v2 = vrot.slane %v4135_v45, 4  ;;  %v4145_v7 = vrot.slane %v4006_v11, 5  ;;  %v4010_v62 = vld [vmem:[#allocation2 + $0xa8] sm:$0xe]  ;;  %v4012_v49 = vld [vmem:[#allocation2 + $0xb0] sm:$0x1] }
 0x26b   : > { %v6448_v8 = vadd.f32 %v8400_v21, %v8396_v19  ;;  %v4144_v25 = vrot.slane %v4142_v40, 4  ;;  %v6336_v56 = vadd.f32 %v8372_v26, %v8368_v20  ;;  %v6451_v29 = vadd.f32 %v8410_v13, %v8404_v9  ;;  %v4009_v9 = vld [vmem:[#allocation2 + $0xa4] sm:$0x1] }
 0x26c   : > { %v6339_v15 = vadd.f32 %v8386_v60, %v8380_v44  ;;  %v4149_v21 = vrot.slane %v4008_v61, 5  ;;  %v4136_v20 = vsel %vm7376_vm12, %v6108_v42, %v4135_v45  ;;  %v4139_v26 = vsel %vm7376_vm12, %v4137_v2, %v4138_v24 }
 0x26d   : > { %v6458_v14 = vpop.f32.mrb[80].mxu0  ;;  %v8472_v53 = vadd.f32 %v6448_v8, %v6336_v56  ;;  %v6110_v44 = vrot.slane %v4007_v37, 9  ;;  %v4143_v60 = vsel %vm7376_vm12, %v6109_v54, %v4142_v40  ;;  %v4146_v13 = vsel %vm7376_vm12, %v4144_v25, %v4145_v7 }
 0x26e   : > { %v6346_v10 = vpop.f32.mrb[48].mxu1  ;;  %v6459_v47 = vpop.f32.mrb[81].mxu0  ;;  %v8474_v52 = vadd.f32 %v6451_v29, %v6339_v15  ;;  %v4156_v23 = vrot.slane %v4011_v12, 5  ;;  %v6454_v30 = vadd.f32 %v8438_v5, %v8434_v6  ;;  %v6342_v31 = vadd.f32 %v6341_v58, %v8436_v41 }
 0x26f   : > { %6797 = vmatmul.mubr.bf16.gmra.mrb[136].mxu1 %v6122_v27  ;;  %v6347_v28 = vpop.f32.mrb[49].mxu1  ;;  %v6461_v34 = vpop.f32.mrb[82].mxu0  ;;  %v6457_v45 = vadd.f32 %v6456_v16, %v6455_v39  ;;  %v6124_v18 = vcombine.low %v4136_v20, %v4139_v26  ;;  %v4151_v32 = vrot.slane %v4149_v21, 4  ;;  %v4152_v48 = vrot.slane %v4009_v9, 5  ;;  %v8489_v27 = vld [vmem:[#allocation2 + $0xb8] sm:$0xf] }
 0x270   : > { %6800 = vmatprep.mubr.bf16.mxu1 %v6123_v43  ;;  %v6349_v17 = vpop.f32.mrb[50].mxu1  ;;  %v6462_v19 = vpop.f32.mrb[83].mxu0  ;;  %v6345_v55 = vadd.f32 %v6344_v50, %v6343_v22  ;;  %v6125_v57 = vcombine.low %v4143_v60, %v4146_v13  ;;  %v4150_v40 = vsel %vm7376_vm12, %v6110_v44, %v4149_v21  ;;  %v8491_v42 = vadd.f32 %v6454_v30, %v6342_v31  ;;  %v4017_v22 = vld [vmem:[#allocation2 + $0xc4] sm:$0xf]  ;;  %v4020_v60 = vld [vmem:[#allocation2 + $0xd0] sm:$0xf] }
 0x271   : > { %v6350_v38 = vpop.f32.mrb[51].mxu1  ;;  %v6111_v5 = vrot.slane %v4010_v62, 9  ;;  %v4158_v54 = vrot.slane %v4156_v23, 4  ;;  %v4159_v41 = vrot.slane %v4012_v49, 5  ;;  %v6460_v50 = vadd.f32 %v6459_v47, %v6458_v14  ;;  %v4013_v47 = vld [vmem:[#allocation2 + $0xb4] sm:$0xe] }
 0x272   : > { %v8493_v58 = vadd.f32 %v6457_v45, %v6345_v55  ;;  %v6348_v43 = vadd.f32 %v6347_v28, %v6346_v10  ;;  %v6463_v2 = vadd.f32 %v6462_v19, %v6461_v34  ;;  %v6351_v7 = vadd.f32 %v6350_v38, %v6349_v17  ;;  %v4015_v28 = vld [vmem:[#allocation2 + $0xbc] sm:$0x1]  ;;  %v4016_v19 = vld [vmem:[#allocation2 + $0xc0] sm:$0xe]  ;;  %v4018_v38 = vld [vmem:[#allocation2 + $0xc8] sm:$0x1] }
 0x273   : > { %v4153_v25 = vsel %vm7376_vm12, %v4151_v32, %v4152_v48  ;;  %v4163_v12 = vrot.slane %v8489_v27, 5  ;;  %v4157_v14 = vsel %vm7376_vm12, %v6111_v5, %v4156_v23  ;;  %v4160_v10 = vsel %vm7376_vm12, %v4158_v54, %v4159_v41  ;;  %v4019_v5 = vld [vmem:[#allocation2 + $0xcc] sm:$0xe]  ;;  %v4021_v54 = vld [vmem:[#allocation2 + $0xd4] sm:$0x1] }
 0x274   : > { %v8498_v21 = vadd.f32 %v6460_v50, %v6348_v43  ;;  %v8500_v20 = vadd.f32 %v6463_v2, %v6351_v7  ;;  %v4170_v34 = vrot.slane %v4017_v22, 5  ;;  %v6126_v44 = vcombine.low %v4150_v40, %v4153_v25 }
 0x275   : > { %v6464_v11 = vpop.f32.mrb[84].mxu0  ;;  %v6127_v30 = vcombine.low %v4157_v14, %v4160_v10  ;;  %v6112_v62 = vrot.slane %v4013_v47, 9  ;;  %v4165_v49 = vrot.slane %v4163_v12, 4  ;;  %v4166_v31 = vrot.slane %v4015_v28, 5 }
 0x276   : > { %v6352_v24 = vpop.f32.mrb[52].mxu1  ;;  %v6465_v6 = vpop.f32.mrb[85].mxu0  ;;  %v4172_v32 = vrot.slane %v4170_v34, 4  ;;  %v4173_v48 = vrot.slane %v4018_v38, 5  ;;  %v4177_v27 = vrot.slane %v4020_v60, 5  ;;  %v4180_v25 = vrot.slane %v4021_v54, 5 }
 0x277   : > { %6801 = vmatmul.mubr.bf16.gmra.mrb[140].mxu1 %v6124_v18  ;;  %v6353_v39 = vpop.f32.mrb[53].mxu1  ;;  %v6467_v16 = vpop.f32.mrb[86].mxu0  ;;  %v6466_v37 = vadd.f32 %v6465_v6, %v6464_v11  ;;  %v6113_v18 = vrot.slane %v4016_v19, 9  ;;  %v4167_v22 = vsel %vm7376_vm12, %v4165_v49, %v4166_v31  ;;  %v8774_v54 = vld [vmem:[#allocation6_spill] sm:$0xff] }
 0x278   : > { %6804 = vmatprep.mubr.bf16.mxu1 %v6125_v57  ;;  %v6355_v61 = vpop.f32.mrb[54].mxu1  ;;  %v6468_v8 = vpop.f32.mrb[87].mxu0  ;;  %v6354_v56 = vadd.f32 %v6353_v39, %v6352_v24  ;;  %v4174_v7 = vsel %vm7376_vm12, %v4172_v32, %v4173_v48 }
 0x279   : > { %v6469_v29 = vadd.f32 %v6468_v8, %v6467_v16  ;;  %v6356_v15 = vpop.f32.mrb[55].mxu1  ;;  %v4164_v16 = vsel %vm7376_vm12, %v6112_v62, %v4163_v12  ;;  %v4171_v2 = vsel %vm7376_vm12, %v6113_v18, %v4170_v34  ;;  %v4179_v8 = vrot.slane %v4177_v27, 4 }
 0x27a   : > { %v6357_v26 = vadd.f32 %v6356_v15, %v6355_v61  ;;  %v8506_v17 = vadd.f32 %v6466_v37, %v6354_v56  ;;  %v6114_v61 = vrot.slane %v4019_v5, 9  ;;  %v6128_v56 = vcombine.low %v4164_v16, %v4167_v22 }
 0x27b   : > { %v6129_v15 = vcombine.low %v4171_v2, %v4174_v7  ;;  %v4181_v34 = vsel %vm7376_vm12, %v4179_v8, %v4180_v25 }
 0x27c   : > { %v8508_v9 = vadd.f32 %v6469_v29, %v6357_v26  ;;  %v4178_v28 = vsel %vm7376_vm12, %v6114_v61, %v4177_v27 }
 0x27d   : > { %v6470_v13 = vpop.f32.mrb[88].mxu0  ;;  %v6130_v49 = vcombine.low %v4178_v28, %v4181_v34 }
 0x27e   : > { %v6358_v23 = vpop.f32.mrb[56].mxu1  ;;  %v6471_v45 = vpop.f32.mrb[89].mxu0 }
 0x27f   : > { %6805 = vmatmul.mubr.bf16.gmra.mrb[144].mxu1 %v6126_v44  ;;  %v6472_v55 = vadd.f32 %v6471_v45, %v6470_v13  ;;  %v6359_v11 = vpop.f32.mrb[57].mxu1  ;;  %v6473_v57 = vpop.f32.mrb[90].mxu0 }
 0x280   : > { %6808 = vmatprep.mubr.bf16.mxu1 %v6127_v30  ;;  %v6360_v24 = vadd.f32 %v6359_v11, %v6358_v23  ;;  %v6361_v6 = vpop.f32.mrb[58].mxu1  ;;  %v6474_v40 = vpop.f32.mrb[91].mxu0 }
 0x281   : > { %v6475_v41 = vadd.f32 %v6474_v40, %v6473_v57  ;;  %v6362_v39 = vpop.f32.mrb[59].mxu1 }
 0x282   : > { %v8514_v50 = vadd.f32 %v6472_v55, %v6360_v24  ;;  %v6363_v43 = vadd.f32 %v6362_v39, %v6361_v6  ;;  %v8773_v6 = vld [vmem:[#allocation5_spill] sm:$0xff] }
 0x284   : > { %v8520_v37 = vadd.f32 %v6475_v41, %v6363_v43 }
 0x285   : > { %v6476_v29 = vpop.f32.mrb[92].mxu0 }
 0x286   : > { %v6364_v12 = vpop.f32.mrb[60].mxu1  ;;  %v6477_v26 = vpop.f32.mrb[93].mxu0 }
 0x287   : > { %6809 = vmatmul.mubr.bf16.gmra.mrb[148].mxu1 %v6128_v56  ;;  %v6478_v14 = vadd.f32 %v6477_v26, %v6476_v29  ;;  %v6365_v10 = vpop.f32.mrb[61].mxu1  ;;  %v6479_v47 = vpop.f32.mrb[94].mxu0 }
 0x288   : > { %6812 = vmatprep.mubr.bf16.mxu1 %v6129_v15  ;;  %v6366_v19 = vadd.f32 %v6365_v10, %v6364_v12  ;;  %v6367_v38 = vpop.f32.mrb[62].mxu1  ;;  %v6480_v44 = vpop.f32.mrb[95].mxu0  ;;  %v8775_v15 = vld [vmem:[#allocation10_spill] sm:$0xff] }
 0x289   : > { %v6481_v60 = vadd.f32 %v6480_v44, %v6479_v47  ;;  %v6368_v13 = vpop.f32.mrb[63].mxu1 }
 0x28a   : > { %v8526_v30 = vadd.f32 %v6478_v14, %v6366_v19  ;;  %v6369_v62 = vadd.f32 %v6368_v13, %v6367_v38  ;;  %v8776_v14 = vld [vmem:[#allocation11_spill] sm:$0xff] }
 0x28c   : > { %v8528_v31 = vadd.f32 %v6481_v60, %v6369_v62 }
 0x28d   : > { %v6610_v23 = vpop.f32.mrb[96].mxu0 }
 0x28e   : > { %v6498_v45 = vpop.f32.mrb[64].mxu1  ;;  %v6611_v18 = vpop.f32.mrb[97].mxu0 }
 0x28f   : > { %6813 = vmatmul.mubr.bf16.gmra.mrb[152].mxu1 %v6130_v49  ;;  %v6612_v32 = vadd.f32 %v6611_v18, %v6610_v23  ;;  %v6499_v48 = vpop.f32.mrb[65].mxu1  ;;  %v6613_v55 = vpop.f32.mrb[98].mxu0 }
 0x290   : > { %v6500_v33 = vadd.f32 %v6499_v48, %v6498_v45  ;;  %v6501_v11 = vpop.f32.mrb[66].mxu1  ;;  %v6614_v57 = vpop.f32.mrb[99].mxu0  ;;  %v8777_v45 = vld [vmem:[#allocation12_spill] sm:$0xff] }
 0x291   : > { %v8530_v27 = vadd.f32 %v6614_v57, %v6613_v55  ;;  %v6502_v24 = vpop.f32.mrb[67].mxu1  ;;  %v8778_v55 = vld [vmem:[#allocation13_spill] sm:$0xff] }
 0x292   : > { %v5339_v40 = vadd.f32 %v6500_v33, %v8773_v6  ;;  %v6503_v5 = vadd.f32 %v6502_v24, %v6501_v11 }
 0x294   : > { %v5342_v41 = vadd.f32 %v6503_v5, %v8774_v54 }
 0x295   : > { %v6616_v39 = vpop.f32.mrb[100].mxu0 }
 0x296   : > { %v6504_v16 = vpop.f32.mrb[68].mxu1  ;;  %v6617_v22 = vpop.f32.mrb[101].mxu0 }
 0x297   : > { %v6618_v43 = vadd.f32 %v6617_v22, %v6616_v39  ;;  %v6505_v2 = vpop.f32.mrb[69].mxu1  ;;  %v6619_v7 = vpop.f32.mrb[102].mxu0 }
 0x298   : > { %v6506_v61 = vadd.f32 %v6505_v2, %v6504_v16  ;;  %v6507_v8 = vpop.f32.mrb[70].mxu1  ;;  %v6620_v25 = vpop.f32.mrb[103].mxu0 }
 0x299   : > { %v6621_v56 = vadd.f32 %v6620_v25, %v6619_v7  ;;  %v6508_v29 = vpop.f32.mrb[71].mxu1 }
 0x29a   : > { %v5347_v12 = vadd.f32 %v6506_v61, %v8775_v15  ;;  %v6509_v26 = vadd.f32 %v6508_v29, %v6507_v8  ;;  %v8779_v61 = vld [vmem:[#allocation14_spill] sm:$0xff] }
 0x29c   : > { %v5350_v10 = vadd.f32 %v6509_v26, %v8776_v14  ;;  %v8780_v26 = vld [vmem:[#allocation15_spill] sm:$0xff] }
 0x29d   : > { %v6622_v47 = vpop.f32.mrb[104].mxu0 }
 0x29e   : > { %v6623_v28 = vpop.f32.mrb[105].mxu0 }
 0x29f   : > { %v6510_v34 = vpop.f32.mrb[72].mxu1  ;;  %v6624_v19 = vadd.f32 %v6623_v28, %v6622_v47  ;;  %v6625_v38 = vpop.f32.mrb[106].mxu0 }
 0x2a0   : > { %v6511_v44 = vpop.f32.mrb[73].mxu1  ;;  %v6626_v60 = vpop.f32.mrb[107].mxu0 }
 0x2a1   : > { %v6512_v13 = vadd.f32 %v6511_v44, %v6510_v34  ;;  %v6513_v62 = vpop.f32.mrb[74].mxu1  ;;  %v6627_v49 = vadd.f32 %v6626_v60, %v6625_v38  ;;  %v8540_v38 = vadd.f32 %v6618_v43, %v5347_v12 }
 0x2a2   : > { %v6514_v23 = vpop.f32.mrb[75].mxu1 }
 0x2a3   : > { %v5355_v18 = vadd.f32 %v6512_v13, %v8777_v45  ;;  %v6515_v48 = vadd.f32 %v6514_v23, %v6513_v62  ;;  %v8542_v62 = vadd.f32 %v6612_v32, %v5339_v40  ;;  %v8782_v40 = vld [vmem:[#allocation4_spill] sm:$0xff] }
 0x2a5   : > { %v5358_v33 = vadd.f32 %v6515_v48, %v8778_v55  ;;  %v6628_v11 = vpop.f32.mrb[108].mxu0  ;;  %v8546_v55 = vadd.f32 %v6621_v56, %v5350_v10 }
 0x2a6   : > { %v6629_v57 = vpop.f32.mrb[109].mxu0 }
 0x2a7   : > { %v6630_v24 = vadd.f32 %v6629_v57, %v6628_v11  ;;  %v6631_v6 = vpop.f32.mrb[110].mxu0  ;;  %v8548_v57 = vadd.f32 %v6624_v19, %v5355_v18 }
 0x2a8   : > { %v6632_v5 = vpop.f32.mrb[111].mxu0 }
 0x2a9   : > { %v6516_v54 = vpop.f32.mrb[76].mxu1  ;;  %v6633_v39 = vadd.f32 %v6632_v5, %v6631_v6  ;;  %v8551_v6 = vadd.f32 %v8530_v27, %v5342_v41  ;;  %v8781_v5 = vld [vmem:[#allocation16_spill] sm:$0xff] }
 0x2aa   : > { %v6517_v16 = vpop.f32.mrb[77].mxu1 }
 0x2ab   : > { %v6518_v22 = vadd.f32 %v6517_v16, %v6516_v54  ;;  %v6519_v2 = vpop.f32.mrb[78].mxu1  ;;  %v8556_v16 = vadd.f32 %v6627_v49, %v5358_v33 }
 0x2ac   : > { %v6520_v7 = vpop.f32.mrb[79].mxu1 }
 0x2ad   : > { %v5363_v8 = vadd.f32 %v6518_v22, %v8779_v61  ;;  %v6521_v25 = vadd.f32 %v6520_v7, %v6519_v2  ;;  %v6634_v29 = vpop.f32.mrb[112].mxu0 }
 0x2ae   : > { %v6635_v15 = vpop.f32.mrb[113].mxu0 }
 0x2af   : > { %v5366_v14 = vadd.f32 %v6521_v25, %v8780_v26  ;;  %v6636_v47 = vadd.f32 %v6635_v15, %v6634_v29  ;;  %v6637_v28 = vpop.f32.mrb[114].mxu0  ;;  %v8544_v48 = vadd.f32 %v6630_v24, %v5363_v8 }
 0x2b0   : > { %v6638_v34 = vpop.f32.mrb[115].mxu0 }
 0x2b1   : > { %v6639_v44 = vadd.f32 %v6638_v34, %v6637_v28  ;;  %v8554_v54 = vadd.f32 %v6633_v39, %v5366_v14 }
 0x2b3   : > { %v6522_v60 = vpop.f32.mrb[80].mxu1 }
 0x2b4   : > { %v6523_v13 = vpop.f32.mrb[81].mxu1 }
 0x2b5   : > { %v6524_v23 = vadd.f32 %v6523_v13, %v6522_v60  ;;  %v6525_v45 = vpop.f32.mrb[82].mxu1 }
 0x2b6   : > { %v6526_v11 = vpop.f32.mrb[83].mxu1 }
 0x2b7   : > { %v5371_v43 = vadd.f32 %v6524_v23, %v8781_v5  ;;  %v6527_v12 = vadd.f32 %v6526_v11, %v6525_v45 }
 0x2b8   : > { %v6640_v32 = vpop.f32.mrb[116].mxu0 }
 0x2b9   : > { %v5374_v22 = vadd.f32 %v6527_v12, %v8782_v40  ;;  %v6641_v24 = vpop.f32.mrb[117].mxu0  ;;  %v8559_v19 = vadd.f32 %v6636_v47, %v5371_v43 }
 0x2ba   : > { %v6642_v2 = vadd.f32 %v6641_v24, %v6640_v32  ;;  %v6643_v56 = vpop.f32.mrb[118].mxu0 }
 0x2bb   : > { %v6644_v10 = vpop.f32.mrb[119].mxu0  ;;  %v8561_v41 = vadd.f32 %v6639_v44, %v5374_v22 }
 0x2bc   : > { %v6645_v7 = vadd.f32 %v6644_v10, %v6643_v56 }
 0x2bd   : > { %v6528_v18 = vpop.f32.mrb[84].mxu1 }
 0x2be   : > { %v6529_v27 = vpop.f32.mrb[85].mxu1 }
 0x2bf   : > { %v6530_v61 = vadd.f32 %v6529_v27, %v6528_v18  ;;  %v6531_v8 = vpop.f32.mrb[86].mxu1 }
 0x2c0   : > { %v6532_v39 = vpop.f32.mrb[87].mxu1 }
 0x2c1   : > { %v5379_v49 = vadd.f32 %v6530_v61, %v8362_v51  ;;  %v6533_v33 = vadd.f32 %v6532_v39, %v6531_v8 }
 0x2c2   : > { %v6646_v25 = vpop.f32.mrb[120].mxu0 }
 0x2c3   : > { %v6647_v29 = vpop.f32.mrb[121].mxu0  ;;  %v5382_v15 = vadd.f32 %v6533_v33, %v8364_v59  ;;  %v8565_v28 = vadd.f32 %v6642_v2, %v5379_v49 }
 0x2c4   : > { %v6648_v26 = vadd.f32 %v6647_v29, %v6646_v25  ;;  %v6649_v14 = vpop.f32.mrb[122].mxu0 }
 0x2c5   : > { %v6650_v47 = vpop.f32.mrb[123].mxu0  ;;  %v8567_v60 = vadd.f32 %v6645_v7, %v5382_v15 }
 0x2c6   : > { %v6651_v34 = vadd.f32 %v6650_v47, %v6649_v14 }
 0x2c8   : > { %v6534_v44 = vpop.f32.mrb[88].mxu1 }
 0x2c9   : > { %v6535_v13 = vpop.f32.mrb[89].mxu1 }
 0x2ca   : > { %v6536_v23 = vadd.f32 %v6535_v13, %v6534_v44  ;;  %v6537_v45 = vpop.f32.mrb[90].mxu1 }
 0x2cb   : > { %v6538_v11 = vpop.f32.mrb[91].mxu1 }
 0x2cc   : > { %v6652_v5 = vpop.f32.mrb[124].mxu0  ;;  %v5387_v51 = vadd.f32 %v6536_v23, %v8390_v63  ;;  %v6539_v43 = vadd.f32 %v6538_v11, %v6537_v45 }
 0x2cd   : > { %v6653_v12 = vpop.f32.mrb[125].mxu0 }
 0x2ce   : > { %v6654_v32 = vadd.f32 %v6653_v12, %v6652_v5  ;;  %v6655_v59 = vpop.f32.mrb[126].mxu0  ;;  %v5390_v40 = vadd.f32 %v6539_v43, %v8398_v0  ;;  %v8571_v24 = vadd.f32 %v6648_v26, %v5387_v51 }
 0x2cf   : > { %v6656_v22 = vpop.f32.mrb[127].mxu0 }
 0x2d0   : > { %v6657_v2 = vadd.f32 %v6656_v22, %v6655_v59  ;;  %v8573_v10 = vadd.f32 %v6651_v34, %v5390_v40 }
 0x2d1   : > { %v6540_v56 = vpop.f32.mrb[92].mxu1 }
 0x2d2   : > { %v6541_v7 = vpop.f32.mrb[93].mxu1 }
 0x2d3   : > { %v6542_v18 = vadd.f32 %v6541_v7, %v6540_v56  ;;  %v6543_v27 = vpop.f32.mrb[94].mxu1 }
 0x2d4   : > { %v6544_v61 = vpop.f32.mrb[95].mxu1 }
 0x2d5   : > { %v5395_v8 = vadd.f32 %v6542_v18, %v8418_v35  ;;  %v6545_v63 = vadd.f32 %v6544_v61, %v6543_v27 }
 0x2d6   : > { %v6658_v39 = vpop.f32.mrb[128].mxu0 }
 0x2d7   : > { %v5398_v49 = vadd.f32 %v6545_v63, %v8424_v4  ;;  %v6659_v33 = vpop.f32.mrb[129].mxu0  ;;  %v8577_v25 = vadd.f32 %v6654_v32, %v5395_v8 }
 0x2d8   : > { %v6660_v0 = vadd.f32 %v6659_v33, %v6658_v39  ;;  %v6661_v29 = vpop.f32.mrb[130].mxu0 }
 0x2d9   : > { %v6662_v15 = vpop.f32.mrb[131].mxu0  ;;  %v8579_v26 = vadd.f32 %v6657_v2, %v5398_v49 }
 0x2da   : > { %v6663_v14 = vadd.f32 %v6662_v15, %v6661_v29 }
 0x2dc   : > { %v6546_v47 = vpop.f32.mrb[96].mxu1 }
 0x2dd   : > { %v6547_v34 = vpop.f32.mrb[97].mxu1 }
 0x2de   : > { %v6548_v44 = vadd.f32 %v6547_v34, %v6546_v47  ;;  %v6549_v13 = vpop.f32.mrb[98].mxu1 }
 0x2df   : > { %v6550_v23 = vpop.f32.mrb[99].mxu1 }
 0x2e0   : > { %v5403_v35 = vadd.f32 %v6548_v44, %v8440_v3  ;;  %v6551_v45 = vadd.f32 %v6550_v23, %v6549_v13  ;;  %v6664_v11 = vpop.f32.mrb[132].mxu0 }
 0x2e1   : > { %v6665_v5 = vpop.f32.mrb[133].mxu0 }
 0x2e2   : > { %v5406_v4 = vadd.f32 %v6551_v45, %v8442_v46  ;;  %v8583_v51 = vadd.f32 %v6660_v0, %v5403_v35  ;;  %v6666_v43 = vadd.f32 %v6665_v5, %v6664_v11  ;;  %v6667_v12 = vpop.f32.mrb[134].mxu0 }
 0x2e3   : > { %v6668_v32 = vpop.f32.mrb[135].mxu0 }
 0x2e4   : > { %v8585_v59 = vadd.f32 %v6663_v14, %v5406_v4  ;;  %v6669_v40 = vadd.f32 %v6668_v32, %v6667_v12 }
 0x2e6   : > { %v6552_v22 = vpop.f32.mrb[100].mxu1 }
 0x2e7   : > { %v6553_v2 = vpop.f32.mrb[101].mxu1 }
 0x2e8   : > { %v6554_v56 = vadd.f32 %v6553_v2, %v6552_v22  ;;  %v6555_v7 = vpop.f32.mrb[102].mxu1 }
 0x2e9   : > { %v6556_v18 = vpop.f32.mrb[103].mxu1 }
 0x2ea   : > { %v5411_v3 = vadd.f32 %v6554_v56, %v8460_v36  ;;  %v6557_v27 = vadd.f32 %v6556_v18, %v6555_v7 }
 0x2eb   : > { %v6670_v61 = vpop.f32.mrb[136].mxu0 }
 0x2ec   : > { %v5414_v46 = vadd.f32 %v6557_v27, %v8462_v1  ;;  %v6671_v8 = vpop.f32.mrb[137].mxu0  ;;  %v8589_v63 = vadd.f32 %v6666_v43, %v5411_v3 }
 0x2ed   : > { %v6672_v39 = vadd.f32 %v6671_v8, %v6670_v61  ;;  %v6673_v49 = vpop.f32.mrb[138].mxu0 }
 0x2ee   : > { %v6674_v33 = vpop.f32.mrb[139].mxu0  ;;  %v8591_v0 = vadd.f32 %v6669_v40, %v5414_v46 }
 0x2ef   : > { %v6675_v29 = vadd.f32 %v6674_v33, %v6673_v49 }
 0x2f0   : > { %v6558_v15 = vpop.f32.mrb[104].mxu1 }
 0x2f1   : > { %v6559_v14 = vpop.f32.mrb[105].mxu1 }
 0x2f2   : > { %v6560_v47 = vadd.f32 %v6559_v14, %v6558_v15  ;;  %v6561_v34 = vpop.f32.mrb[106].mxu1 }
 0x2f3   : > { %v6562_v44 = vpop.f32.mrb[107].mxu1 }
 0x2f4   : > { %v5419_v36 = vadd.f32 %v6560_v47, %v8472_v53  ;;  %v6563_v13 = vadd.f32 %v6562_v44, %v6561_v34 }
 0x2f5   : > { %v6676_v23 = vpop.f32.mrb[140].mxu0 }
 0x2f6   : > { %v5422_v1 = vadd.f32 %v6563_v13, %v8474_v52  ;;  %v6677_v35 = vpop.f32.mrb[141].mxu0  ;;  %v8595_v45 = vadd.f32 %v6672_v39, %v5419_v36 }
 0x2f7   : > { %v6678_v11 = vadd.f32 %v6677_v35, %v6676_v23  ;;  %v6679_v4 = vpop.f32.mrb[142].mxu0 }
 0x2f8   : > { %v6680_v5 = vpop.f32.mrb[143].mxu0  ;;  %v8597_v43 = vadd.f32 %v6675_v29, %v5422_v1 }
 0x2f9   : > { %v6681_v12 = vadd.f32 %v6680_v5, %v6679_v4 }
 0x2fe   : > { %v6564_v32 = vpop.f32.mrb[108].mxu1 }
 0x2ff   : > { %v6565_v40 = vpop.f32.mrb[109].mxu1 }
 0x300   : > { %v6566_v22 = vadd.f32 %v6565_v40, %v6564_v32  ;;  %v6567_v2 = vpop.f32.mrb[110].mxu1  ;;  %v6682_v56 = vpop.f32.mrb[144].mxu0 }
 0x301   : > { %v6568_v7 = vpop.f32.mrb[111].mxu1  ;;  %v6683_v53 = vpop.f32.mrb[145].mxu0 }
 0x302   : > { %v5427_v18 = vadd.f32 %v6566_v22, %v8491_v42  ;;  %v6569_v3 = vadd.f32 %v6568_v7, %v6567_v2  ;;  %v6684_v52 = vadd.f32 %v6683_v53, %v6682_v56  ;;  %v6685_v27 = vpop.f32.mrb[146].mxu0 }
 0x303   : > { %v6686_v61 = vpop.f32.mrb[147].mxu0 }
 0x304   : > { %v5430_v46 = vadd.f32 %v6569_v3, %v8493_v58  ;;  %v6687_v8 = vadd.f32 %v6686_v61, %v6685_v27  ;;  %v8601_v39 = vadd.f32 %v6678_v11, %v5427_v18 }
 0x306   : > { %v8603_v49 = vadd.f32 %v6681_v12, %v5430_v46 }
 0x309   : > { %v6570_v33 = vpop.f32.mrb[112].mxu1 }
 0x30a   : > { %v6571_v29 = vpop.f32.mrb[113].mxu1 }
 0x30b   : > { %v6572_v15 = vadd.f32 %v6571_v29, %v6570_v33  ;;  %v6573_v14 = vpop.f32.mrb[114].mxu1  ;;  %v6688_v47 = vpop.f32.mrb[148].mxu0 }
 0x30c   : > { %v6574_v34 = vpop.f32.mrb[115].mxu1  ;;  %v6689_v44 = vpop.f32.mrb[149].mxu0 }
 0x30d   : > { %v5435_v42 = vadd.f32 %v6572_v15, %v8498_v21  ;;  %v6575_v36 = vadd.f32 %v6574_v34, %v6573_v14  ;;  %v6690_v13 = vadd.f32 %v6689_v44, %v6688_v47  ;;  %v6691_v23 = vpop.f32.mrb[150].mxu0 }
 0x30e   : > { %v6692_v1 = vpop.f32.mrb[151].mxu0 }
 0x30f   : > { %v5438_v58 = vadd.f32 %v6575_v36, %v8500_v20  ;;  %v6693_v35 = vadd.f32 %v6692_v1, %v6691_v23  ;;  %v8607_v11 = vadd.f32 %v6684_v52, %v5435_v42 }
 0x311   : > { %v8609_v4 = vadd.f32 %v6687_v8, %v5438_v58 }
 0x314   : > { %v6576_v5 = vpop.f32.mrb[116].mxu1 }
 0x315   : > { %v6577_v12 = vpop.f32.mrb[117].mxu1 }
 0x316   : > { %v6578_v32 = vadd.f32 %v6577_v12, %v6576_v5  ;;  %v6579_v40 = vpop.f32.mrb[118].mxu1 }
 0x317   : > { %v6580_v22 = vpop.f32.mrb[119].mxu1 }
 0x318   : > { %v5443_v2 = vadd.f32 %v6578_v32, %v8506_v17  ;;  %v6581_v56 = vadd.f32 %v6580_v22, %v6579_v40 }
 0x319   : > { %v6694_v21 = vpop.f32.mrb[152].mxu0 }
 0x31a   : > { %v5446_v7 = vadd.f32 %v6581_v56, %v8508_v9  ;;  %v6695_v53 = vpop.f32.mrb[153].mxu0  ;;  %v8613_v18 = vadd.f32 %v6690_v13, %v5443_v2 }
 0x31b   : > { %v6696_v20 = vadd.f32 %v6695_v53, %v6694_v21  ;;  %v6697_v3 = vpop.f32.mrb[154].mxu0 }
 0x31c   : > { %v6698_v52 = vpop.f32.mrb[155].mxu0  ;;  %v8615_v27 = vadd.f32 %v6693_v35, %v5446_v7 }
 0x31d   : > { %v6699_v61 = vadd.f32 %v6698_v52, %v6697_v3 }
 0x320   : > { %v6582_v46 = vpop.f32.mrb[120].mxu1 }
 0x321   : > { %v6583_v8 = vpop.f32.mrb[121].mxu1 }
 0x322   : > { %v6584_v33 = vadd.f32 %v6583_v8, %v6582_v46  ;;  %v6585_v29 = vpop.f32.mrb[122].mxu1 }
 0x323   : > { %v6586_v15 = vpop.f32.mrb[123].mxu1 }
 0x324   : > { %v5451_v17 = vadd.f32 %v6584_v33, %v8514_v50  ;;  %v6587_v14 = vadd.f32 %v6586_v15, %v6585_v29 }
 0x326   : > { %v5454_v47 = vadd.f32 %v6587_v14, %v8520_v37  ;;  %v8619_v9 = vadd.f32 %v6696_v20, %v5451_v17 }
 0x328   : > { %v8621_v34 = vadd.f32 %v6699_v61, %v5454_v47 }
 0x329   : > { %v6700_v44 = vpop.f32.mrb[156].mxu0 }
 0x32a   : > { %v6588_v42 = vpop.f32.mrb[124].mxu1  ;;  %v6701_v36 = vpop.f32.mrb[157].mxu0 }
 0x32b   : > { %v6589_v13 = vpop.f32.mrb[125].mxu1  ;;  %v6702_v23 = vadd.f32 %v6701_v36, %v6700_v44  ;;  %v6703_v1 = vpop.f32.mrb[158].mxu0 }
 0x32c   : > { %v6590_v58 = vadd.f32 %v6589_v13, %v6588_v42  ;;  %v6591_v35 = vpop.f32.mrb[126].mxu1  ;;  %v6704_v5 = vpop.f32.mrb[159].mxu0 }
 0x32d   : > { %v6592_v12 = vpop.f32.mrb[127].mxu1  ;;  %v6705_v32 = vadd.f32 %v6704_v5, %v6703_v1 }
 0x32e   : > { %v5459_v50 = vadd.f32 %v6590_v58, %v8526_v30  ;;  %v6593_v40 = vadd.f32 %v6592_v12, %v6591_v35 }
 0x330   : > { %v5462_v37 = vadd.f32 %v6593_v40, %v8528_v31  ;;  %v8625_v22 = vadd.f32 %v6702_v23, %v5459_v50 }
 0x331   : > { %v6786_v2 = vpop.f32.mrb[160].mxu0 }
 0x332   : > { %v5669_v56 = vadd.f32 %v6786_v2, %v8540_v38  ;;  %v5660_v21 = vpop.f32.mrb[161].mxu0  ;;  %v6790_v30 = vpop.f32.mrb[128].mxu1  ;;  %v8635_v7 = vadd.f32 %v6705_v32, %v5462_v37 }
 0x333   : > { %v5661_v31 = vadd.f32 %v5660_v21, %v8542_v62  ;;  %v5685_v53 = vadd.f32 %v6790_v30, %v8544_v48  ;;  %v6787_v20 = vpop.f32.mrb[162].mxu0  ;;  %v5676_v3 = vpop.f32.mrb[129].mxu1 }
 0x334   : > { %5790 = vst.msk [vmem:[%s8632_s12 + $0x10] sm:$0xff] %vm5787_vm1, %v5669_v56  ;;  %v5672_v52 = vadd.f32 %v6787_v20, %v8546_v55  ;;  %v5677_v38 = vadd.f32 %v5676_v3, %v8548_v57  ;;  %v5663_v61 = vpop.f32.mrb[163].mxu0  ;;  %v6791_v46 = vpop.f32.mrb[130].mxu1 }
 0x335   : > { %5788 = vst.msk [vmem:[%s8632_s12] sm:$0xff] %vm5787_vm1, %v5661_v31  ;;  %5794 = vst.msk [vmem:[%s8632_s12 + $0x30] sm:$0xff] %vm5787_vm1, %v5685_v53  ;;  %v5664_v62 = vadd.f32 %v5663_v61, %v8551_v6  ;;  %v5688_v48 = vadd.f32 %v6791_v46, %v8554_v54  ;;  %v5679_v8 = vpop.f32.mrb[131].mxu1 }
 0x336   : > { %5791 = vst.msk [vmem:[%s8632_s12 + $0x18] sm:$0xff] %vm5787_vm1, %v5672_v52  ;;  %5792 = vst.msk [vmem:[%s8632_s12 + $0x20] sm:$0xff] %vm5787_vm1, %v5677_v38  ;;  %v5680_v55 = vadd.f32 %v5679_v8, %v8556_v16 }
 0x337   : > { %5789 = vst.msk [vmem:[%s8632_s12 + $0x8] sm:$0xff] %vm5787_vm1, %v5664_v62  ;;  %5795 = vst.msk [vmem:[%s8632_s12 + $0x38] sm:$0xff] %vm5787_vm1, %v5688_v48 }
 0x338   : > { %5793 = vst.msk [vmem:[%s8632_s12 + $0x28] sm:$0xff] %vm5787_vm1, %v5680_v55 }
 0x33a   : > { %v6794_v57 = vpop.f32.mrb[132].mxu1 }
 0x33b   : > { %v5701_v6 = vadd.f32 %v6794_v57, %v8565_v28  ;;  %v5692_v54 = vpop.f32.mrb[133].mxu1 }
 0x33c   : > { %v5693_v33 = vadd.f32 %v5692_v54, %v8559_v19  ;;  %v6795_v29 = vpop.f32.mrb[134].mxu1 }
 0x33d   : > { %5798 = vst.msk [vmem:[%s8632_s12 + $0x50] sm:$0xff] %vm5787_vm1, %v5701_v6  ;;  %v5704_v15 = vadd.f32 %v6795_v29, %v8567_v60  ;;  %v5695_v16 = vpop.f32.mrb[135].mxu1 }
 0x33e   : > { %5796 = vst.msk [vmem:[%s8632_s12 + $0x40] sm:$0xff] %vm5787_vm1, %v5693_v33  ;;  %v5696_v17 = vadd.f32 %v5695_v16, %v8561_v41 }
 0x33f   : > { %5799 = vst.msk [vmem:[%s8632_s12 + $0x58] sm:$0xff] %vm5787_vm1, %v5704_v15 }
 0x340   : > { %5797 = vst.msk [vmem:[%s8632_s12 + $0x48] sm:$0xff] %vm5787_vm1, %v5696_v17 }
 0x342   : > { %v6798_v28 = vpop.f32.mrb[136].mxu1 }
 0x343   : > { %v5717_v19 = vadd.f32 %v6798_v28, %v8577_v25  ;;  %v5708_v14 = vpop.f32.mrb[137].mxu1 }
 0x344   : > { %v5709_v47 = vadd.f32 %v5708_v14, %v8571_v24  ;;  %v6799_v44 = vpop.f32.mrb[138].mxu1 }
 0x345   : > { %5802 = vst.msk [vmem:[%s8632_s12 + $0x70] sm:$0xff] %vm5787_vm1, %v5717_v19  ;;  %v5720_v60 = vadd.f32 %v6799_v44, %v8579_v26  ;;  %v5711_v42 = vpop.f32.mrb[139].mxu1 }
 0x346   : > { %5800 = vst.msk [vmem:[%s8632_s12 + $0x60] sm:$0xff] %vm5787_vm1, %v5709_v47  ;;  %v5712_v41 = vadd.f32 %v5711_v42, %v8573_v10 }
 0x347   : > { %5803 = vst.msk [vmem:[%s8632_s12 + $0x78] sm:$0xff] %vm5787_vm1, %v5720_v60 }
 0x348   : > { %5801 = vst.msk [vmem:[%s8632_s12 + $0x68] sm:$0xff] %vm5787_vm1, %v5712_v41 }
 0x34a   : > { %v6802_v25 = vpop.f32.mrb[140].mxu1 }
 0x34b   : > { %v5733_v24 = vadd.f32 %v6802_v25, %v8589_v63  ;;  %v5724_v36 = vpop.f32.mrb[141].mxu1 }
 0x34c   : > { %v5725_v13 = vadd.f32 %v5724_v36, %v8583_v51  ;;  %v6803_v23 = vpop.f32.mrb[142].mxu1 }
 0x34d   : > { %5806 = vst.msk [vmem:[%s8632_s12 + $0x90] sm:$0xff] %vm5787_vm1, %v5733_v24  ;;  %v5736_v26 = vadd.f32 %v6803_v23, %v8591_v0  ;;  %v5727_v1 = vpop.f32.mrb[143].mxu1 }
 0x34e   : > { %5804 = vst.msk [vmem:[%s8632_s12 + $0x80] sm:$0xff] %vm5787_vm1, %v5725_v13  ;;  %v5728_v10 = vadd.f32 %v5727_v1, %v8585_v59 }
 0x34f   : > { %5807 = vst.msk [vmem:[%s8632_s12 + $0x98] sm:$0xff] %vm5787_vm1, %v5736_v26 }
 0x350   : > { %5805 = vst.msk [vmem:[%s8632_s12 + $0x88] sm:$0xff] %vm5787_vm1, %v5728_v10 }
 0x352   : > { %v6806_v63 = vpop.f32.mrb[144].mxu1 }
 0x353   : > { %v5749_v51 = vadd.f32 %v6806_v63, %v8601_v39  ;;  %v5740_v58 = vpop.f32.mrb[145].mxu1 }
 0x354   : > { %v5741_v35 = vadd.f32 %v5740_v58, %v8595_v45  ;;  %v6807_v5 = vpop.f32.mrb[146].mxu1 }
 0x355   : > { %5810 = vst.msk [vmem:[%s8632_s12 + $0xb0] sm:$0xff] %vm5787_vm1, %v5749_v51  ;;  %v5752_v0 = vadd.f32 %v6807_v5, %v8603_v49  ;;  %v5743_v12 = vpop.f32.mrb[147].mxu1 }
 0x356   : > { %5808 = vst.msk [vmem:[%s8632_s12 + $0xa0] sm:$0xff] %vm5787_vm1, %v5741_v35  ;;  %v5744_v59 = vadd.f32 %v5743_v12, %v8597_v43 }
 0x357   : > { %5811 = vst.msk [vmem:[%s8632_s12 + $0xb8] sm:$0xff] %vm5787_vm1, %v5752_v0 }
 0x358   : > { %5809 = vst.msk [vmem:[%s8632_s12 + $0xa8] sm:$0xff] %vm5787_vm1, %v5744_v59 }
 0x35a   : > { %v6810_v39 = vpop.f32.mrb[148].mxu1 }
 0x35b   : > { %v5765_v45 = vadd.f32 %v6810_v39, %v8613_v18  ;;  %v5756_v32 = vpop.f32.mrb[149].mxu1 }
 0x35c   : > { %v5757_v50 = vadd.f32 %v5756_v32, %v8607_v11  ;;  %v6811_v40 = vpop.f32.mrb[150].mxu1 }
 0x35d   : > { %5814 = vst.msk [vmem:[%s8632_s12 + $0xd0] sm:$0xff] %vm5787_vm1, %v5765_v45  ;;  %v5768_v49 = vadd.f32 %v6811_v40, %v8615_v27  ;;  %v5759_v37 = vpop.f32.mrb[151].mxu1 }
 0x35e   : > { %5812 = vst.msk [vmem:[%s8632_s12 + $0xc0] sm:$0xff] %vm5787_vm1, %v5757_v50  ;;  %v5760_v43 = vadd.f32 %v5759_v37, %v8609_v4 }
 0x35f   : > { %5815 = vst.msk [vmem:[%s8632_s12 + $0xd8] sm:$0xff] %vm5787_vm1, %v5768_v49 }
 0x360   : > { %5813 = vst.msk [vmem:[%s8632_s12 + $0xc8] sm:$0xff] %vm5787_vm1, %v5760_v43 }
 0x362   : > { %v6814_v18 = vpop.f32.mrb[152].mxu1 }
 0x363   : > { %v5781_v11 = vadd.f32 %v6814_v18, %v8625_v22  ;;  %v5772_v2 = vpop.f32.mrb[153].mxu1 }
 0x364   : > { %v5773_v56 = vadd.f32 %v5772_v2, %v8619_v9  ;;  %v6815_v21 = vpop.f32.mrb[154].mxu1 }
 0x365   : > { %5818 = vst.msk [vmem:[%s8632_s12 + $0xf0] sm:$0xff] %vm5787_vm1, %v5781_v11  ;;  %v5784_v27 = vadd.f32 %v6815_v21, %v8635_v7  ;;  %v5775_v30 = vpop.f32.mrb[155].mxu1 }
 0x366   : > { %5816 = vst.msk [vmem:[%s8632_s12 + $0xe0] sm:$0xff] %vm5787_vm1, %v5773_v56  ;;  %v5776_v4 = vadd.f32 %v5775_v30, %v8621_v34 }
 0x367   : > { %5819 = vst.msk [vmem:[%s8632_s12 + $0xf8] sm:$0xff] %vm5787_vm1, %v5784_v27 }
 0x368   : > { %5817 = vst.msk [vmem:[%s8632_s12 + $0xe8] sm:$0xff] %vm5787_vm1, %v5776_v4 }
 0x369 PF: > { %s17_s24 = sadd.s32 1, %s6974_s24  }
 0x36a   : > { %p14_p4 = scmp.ge.s32.totalorder %s17_s24, 4  }
 0x36c   :  { %16 = sbr.rel (!%p14_p4) target bundleno = 1 (0x1), region = 81 }

</bundles_post_ra>
